<compile_context>
chip_gen: v7x
topology: tpu7x:2x2x1
jax: 0.10.0
libtpu: 0.0.40
codegen_flags: <defaults>
</compile_context>

<pallas_src>
import jax
import jax.numpy as jnp
from jax.experimental import pallas as pl
from jax.experimental.pallas import tpu as pltpu
import numpy as np

# Small shapes consistent with the module (D_IN stands in for BERT hidden size).
B = 2        # batch
T = 8        # max sequence length (after padding/truncation)
D_IN = 64    # embedding dim (BERT hidden_size surrogate)
H = 32       # RNN hidden size
D_OUT = 4    # number of classes

# TPU-friendly padded dims.
B_TILE = 128  # batch tile: fills the MXU (use 256 on v6e/v7x at real batch sizes)
H_PAD = 128   # hidden padded to one lane group (zero pads are exact: tanh(0)=0)
C_PAD = 128   # lane-dense classifier output width


def rnn_classifier_kernel(x_ref, lens_ref, wih_ref, whh_ref, b_ref,
                          wc_ref, bc_ref, out_ref):
    """One batch tile.

    x_ref:    (T, B_TILE, D_IN)  bf16  time-major embeddings block
    lens_ref: (B_TILE, 1)        int32 true sequence lengths (0 for batch pad)
    wih_ref:  (D_IN, H_PAD)      bf16  W_ih^T, zero-padded
    whh_ref:  (H_PAD, H_PAD)     bf16  W_hh^T, zero-padded
    b_ref:    (1, H_PAD)         f32   b_ih + b_hh, zero-padded
    wc_ref:   (H_PAD, C_PAD)     bf16  W_c^T, zero-padded
    bc_ref:   (1, C_PAD)         f32   b_c, zero-padded
    out_ref:  (B_TILE, C_PAD)    f32   lane-dense logits block
    """
    t_steps = x_ref.shape[0]
    b_tile = x_ref.shape[1]
    h_pad = whh_ref.shape[0]

    wih = wih_ref[...]           # loop-invariant weights, loaded once
    whh = whh_ref[...]
    bias = b_ref[...]
    lens = lens_ref[...]         # (B_TILE, 1) int32

    # Hoisted length masks: one compare against an iota instead of T compares
    # inside the loop (JAX does not CSE broadcast_in_dim).
    step_ids = jax.lax.broadcasted_iota(jnp.int32, (b_tile, t_steps), 1)
    masks = lens > step_ids      # (B_TILE, T) bool

    # Recurrence, fully unrolled (T=8 static).  Per step: one (B_TILE,D)x(D,H)
    # projection dot + one (B_TILE,H)x(H,H) recurrence dot on the MXU (f32
    # accumulate), tanh on the EUP, and a masked carry implementing
    # pack_padded_sequence semantics (rows past their length are frozen, so
    # the final carry equals the hidden state at each sequence's last valid
    # token).  h is carried in bf16: all consumers see it bf16 anyway.
    h = jnp.zeros((b_tile, h_pad), dtype=jnp.bfloat16)
    for t in range(t_steps):
        x_t = x_ref[t]                                   # (B_TILE, D) bf16, static index
        pre = (jnp.dot(x_t, wih, preferred_element_type=jnp.float32)
               + jnp.dot(h, whh, preferred_element_type=jnp.float32)
               + bias)
        h_new = jnp.tanh(pre).astype(jnp.bfloat16)
        h = jnp.where(masks[:, t:t + 1], h_new, h)

    # TODO(synk): nn.Dropout — identity in eval/inference mode; PyTorch's
    # training-mode RNG mask is not reproducible here, so dropout is a no-op.
    logits = jnp.dot(h, wc_ref[...],
                     preferred_element_type=jnp.float32) + bc_ref[...]
    out_ref[...] = logits                                # unmasked lane-dense store


def rnn_text_classifier_forward(embeddings, seq_lens, params, *, b_tile=B_TILE):
    """embeddings: (B, T, D) f32 (BERT last_hidden_state surrogate),
       seq_lens:   (B,) int32 (sum of attention mask).  Returns (B, D_OUT) f32."""
    w_ih, w_hh, b_ih, b_hh, w_c, b_c = params
    b, t, d = embeddings.shape
    h = w_ih.shape[0]
    c = w_c.shape[0]

    # Pad batch to a multiple of the tile; padded rows get length 0 so their
    # hidden state stays frozen at zero and they are sliced off at the end.
    b_pad = ((b + b_tile - 1) // b_tile) * b_tile

    # One-time XLA transpose to time-major: (T, b_pad, D) bf16.  Per-step
    # access inside the kernel is then a static leading-axis slab (no perm
    # matrix, no in-kernel relayout).
    x_tm = jnp.zeros((t, b_pad, d), jnp.bfloat16).at[:, :b, :].set(
        jnp.transpose(embeddings, (1, 0, 2)).astype(jnp.bfloat16))
    lens = jnp.zeros((b_pad, 1), jnp.int32).at[:b, 0].set(
        seq_lens.astype(jnp.int32))

    # Zero-padded, pre-transposed weights (padding is exact: tanh(0)=0 keeps the
    # extra hidden lanes at 0, and their classifier rows are 0).
    wih_p = jnp.zeros((d, H_PAD), jnp.bfloat16).at[:, :h].set(
        w_ih.T.astype(jnp.bfloat16))
    whh_p = jnp.zeros((H_PAD, H_PAD), jnp.bfloat16).at[:h, :h].set(
        w_hh.T.astype(jnp.bfloat16))
    bias_p = jnp.zeros((1, H_PAD), jnp.float32).at[0, :h].set(
        (b_ih + b_hh).astype(jnp.float32))
    wc_p = jnp.zeros((H_PAD, C_PAD), jnp.bfloat16).at[:h, :c].set(
        w_c.T.astype(jnp.bfloat16))
    bc_p = jnp.zeros((1, C_PAD), jnp.float32).at[0, :c].set(
        b_c.astype(jnp.float32))

    n_tiles = b_pad // b_tile
    grid_spec = pltpu.PrefetchScalarGridSpec(
        num_scalar_prefetch=0,
        grid=(n_tiles,),
        in_specs=[
            pl.BlockSpec((t, b_tile, d), lambda i: (0, i, 0)),   # time-major embeddings
            pl.BlockSpec((b_tile, 1), lambda i: (i, 0)),         # lengths block
            pl.BlockSpec((d, H_PAD), lambda i: (0, 0)),          # W_ih^T (invariant)
            pl.BlockSpec((H_PAD, H_PAD), lambda i: (0, 0)),      # W_hh^T (invariant)
            pl.BlockSpec((1, H_PAD), lambda i: (0, 0)),          # b_ih + b_hh
            pl.BlockSpec((H_PAD, C_PAD), lambda i: (0, 0)),      # W_c^T (invariant)
            pl.BlockSpec((1, C_PAD), lambda i: (0, 0)),          # b_c
        ],
        out_specs=pl.BlockSpec((b_tile, C_PAD), lambda i: (i, 0)),
    )

    logits_pad = pl.pallas_call(
        rnn_classifier_kernel,
        out_shape=jax.ShapeDtypeStruct((b_pad, C_PAD), jnp.float32),
        grid_spec=grid_spec,
        compiler_params=pltpu.CompilerParams(
            dimension_semantics=("parallel",)),   # batch tiles are independent
    )(x_tm, lens, wih_p, whh_p, bias_p, wc_p, bc_p)

    return logits_pad[:b, :c]


def reference_forward(embeddings, seq_lens, params):
    """Pure-JAX reference matching PyTorch nn.RNN + pack_padded_sequence +
    Linear, mirroring the kernel's bf16 MXU inputs / f32 accumulation."""
    w_ih, w_hh, b_ih, b_hh, w_c, b_c = params
    bf = lambda a: a.astype(jnp.bfloat16).astype(jnp.float32)
    x = bf(embeddings)
    wih, whh, wc = bf(w_ih), bf(w_hh), bf(w_c)
    bsum = (b_ih + b_hh).astype(jnp.float32)
    b, t, _ = embeddings.shape
    h = jnp.zeros((b, w_ih.shape[0]), jnp.float32)
    for i in range(t):
        pre = x[:, i, :] @ wih.T + bf(h) @ whh.T + bsum
        h = jnp.where((seq_lens > i)[:, None], jnp.tanh(pre), h)
    return bf(h) @ wc.T + b_c


if __name__ == "__main__":
    key = jax.random.PRNGKey(0)
    k_emb, k_len, k1, k2, k3, k4, k5, k6 = jax.random.split(key, 8)

    # Synthetic stand-in for BERT last_hidden_state and attention-mask lengths.
    # TODO(synk): BertTokenizer/BertModel (frozen pretrained encoder) has no
    # Pallas equivalent; the kernel consumes its output embeddings directly.
    embeddings = jax.random.normal(k_emb, (B, T, D_IN), dtype=jnp.float32)
    seq_lens = jax.random.randint(k_len, (B,), minval=1, maxval=T + 1,
                                  dtype=jnp.int32)

    # Deterministic parameter init (PyTorch-like uniform(-1/sqrt(H), 1/sqrt(H))).
    bound = 1.0 / np.sqrt(H)
    w_ih = jax.random.uniform(k1, (H, D_IN), minval=-bound, maxval=bound)
    w_hh = jax.random.uniform(k2, (H, H), minval=-bound, maxval=bound)
    b_ih = jax.random.uniform(k3, (H,), minval=-bound, maxval=bound)
    b_hh = jax.random.uniform(k4, (H,), minval=-bound, maxval=bound)
    w_c = jax.random.uniform(k5, (D_OUT, H), minval=-bound, maxval=bound)
    b_c = jax.random.uniform(k6, (D_OUT,), minval=-bound, maxval=bound)
    params = (w_ih, w_hh, b_ih, b_hh, w_c, b_c)

    out = rnn_text_classifier_forward(embeddings, seq_lens, params)
    out = jax.block_until_ready(out)

    ref = reference_forward(embeddings, seq_lens, params)
    # bf16 MXU inputs with f32 accumulation -> allow small rounding-order slack.
    np.testing.assert_allclose(np.asarray(out), np.asarray(ref),
                               rtol=5e-3, atol=5e-3)
    print("KERNEL_OK")
</pallas_src>

<mosaic_0001>
module attributes {stable_mosaic.version = 11 : i64} {
  func.func @rnn_classifier_kernel(%arg0: i32, %arg1: memref<8x128x64xbf16, #tpu.memory_space<vmem>>, %arg2: memref<128x1xi32, #tpu.memory_space<vmem>>, %arg3: memref<64x128xbf16, #tpu.memory_space<vmem>>, %arg4: memref<128x128xbf16, #tpu.memory_space<vmem>>, %arg5: memref<1x128xf32, #tpu.memory_space<vmem>>, %arg6: memref<128x128xbf16, #tpu.memory_space<vmem>>, %arg7: memref<1x128xf32, #tpu.memory_space<vmem>>, %arg8: memref<128x128xf32, #tpu.memory_space<vmem>>) attributes {dimension_semantics = [#tpu.dimension_semantics<parallel>], iteration_bounds = array<i64: 1>, scalar_prefetch = 0 : i64, scratch_operands = 0 : i64, tpu.core_type = #tpu.core_type<tc>, window_params = [{transform_indices = @transform_0, window_bounds = array<i64: 8, 128, 64>}, {transform_indices = @transform_1, window_bounds = array<i64: 128, 1>}, {pipeline_mode = #tpu.pipeline_mode<synchronous>, transform_indices = @transform_2, window_bounds = array<i64: 64, 128>}, {pipeline_mode = #tpu.pipeline_mode<synchronous>, transform_indices = @transform_3, window_bounds = array<i64: 128, 128>}, {pipeline_mode = #tpu.pipeline_mode<synchronous>, transform_indices = @transform_4, window_bounds = array<i64: 1, 128>}, {pipeline_mode = #tpu.pipeline_mode<synchronous>, transform_indices = @transform_5, window_bounds = array<i64: 128, 128>}, {pipeline_mode = #tpu.pipeline_mode<synchronous>, transform_indices = @transform_6, window_bounds = array<i64: 1, 128>}, {transform_indices = @transform_7, window_bounds = array<i64: 128, 128>}]} {
    %c0 = arith.constant 0 : index
    %c0_0 = arith.constant 0 : index
    %0 = vector.load %arg3[%c0, %c0_0] : memref<64x128xbf16, #tpu.memory_space<vmem>>, vector<64x128xbf16>
    %c0_1 = arith.constant 0 : index
    %c0_2 = arith.constant 0 : index
    %1 = vector.load %arg4[%c0_1, %c0_2] : memref<128x128xbf16, #tpu.memory_space<vmem>>, vector<128x128xbf16>
    %c0_3 = arith.constant 0 : index
    %c0_4 = arith.constant 0 : index
    %2 = vector.load %arg5[%c0_3, %c0_4] : memref<1x128xf32, #tpu.memory_space<vmem>>, vector<1x128xf32>
    %c0_5 = arith.constant 0 : index
    %c0_6 = arith.constant 0 : index
    %3 = vector.load %arg2[%c0_5, %c0_6] : memref<128x1xi32, #tpu.memory_space<vmem>>, vector<128x1xi32>
    %4 = tpu.iota {dimensions = array<i32: 1>} : vector<128x8xi32>
    %5 = vector.broadcast %3 : vector<128x1xi32> to vector<128x8xi32>
    %6 = arith.cmpi sgt, %5, %4 : vector<128x8xi32>
    %cst = arith.constant 0.000000e+00 : bf16
    %7 = vector.broadcast %cst : bf16 to vector<128x128xbf16>
    %c0_7 = arith.constant 0 : index
    %c0_8 = arith.constant 0 : index
    %c0_9 = arith.constant 0 : index
    %8 = vector.load %arg1[%c0_7, %c0_8, %c0_9] : memref<8x128x64xbf16, #tpu.memory_space<vmem>>, vector<1x128x64xbf16>
    %9 = vector.shape_cast %8 : vector<1x128x64xbf16> to vector<128x64xbf16>
    %cst_10 = arith.constant dense<0.000000e+00> : vector<128x128xf32>
    %10 = tpu.matmul %9, %0, %cst_10 {dimension_numbers = #tpu.dot_dimension_numbers<[1], [0], [0], [1], [0, 0, 1, 1], [], []>} : vector<128x64xbf16>, vector<64x128xbf16>, vector<128x128xf32> -> vector<128x128xf32>
    %cst_11 = arith.constant dense<0.000000e+00> : vector<128x128xf32>
    %11 = tpu.matmul %7, %1, %cst_11 {dimension_numbers = #tpu.dot_dimension_numbers<[1], [0], [0], [1], [0, 0, 1, 1], [], []>} : vector<128x128xbf16>, vector<128x128xbf16>, vector<128x128xf32> -> vector<128x128xf32>
    %12 = arith.addf %10, %11 : vector<128x128xf32>
    %13 = vector.broadcast %2 : vector<1x128xf32> to vector<128x128xf32>
    %14 = arith.addf %12, %13 : vector<128x128xf32>
    %15 = math.tanh %14 : vector<128x128xf32>
    %16 = arith.truncf %15 : vector<128x128xf32> to vector<128x128xbf16>
    %17 = vector.extract_strided_slice %6 {offsets = [0, 0], sizes = [128, 1], strides = [1, 1]} : vector<128x8xi1> to vector<128x1xi1>
    %18 = vector.shape_cast %17 : vector<128x1xi1> to vector<128x1xi1>
    %19 = vector.broadcast %18 : vector<128x1xi1> to vector<128x128xi1>
    %20 = arith.select %19, %16, %7 : vector<128x128xi1>, vector<128x128xbf16>
    %c1 = arith.constant 1 : index
    %c0_12 = arith.constant 0 : index
    %c0_13 = arith.constant 0 : index
    %21 = vector.load %arg1[%c1, %c0_12, %c0_13] : memref<8x128x64xbf16, #tpu.memory_space<vmem>>, vector<1x128x64xbf16>
    %22 = vector.shape_cast %21 : vector<1x128x64xbf16> to vector<128x64xbf16>
    %cst_14 = arith.constant dense<0.000000e+00> : vector<128x128xf32>
    %23 = tpu.matmul %22, %0, %cst_14 {dimension_numbers = #tpu.dot_dimension_numbers<[1], [0], [0], [1], [0, 0, 1, 1], [], []>} : vector<128x64xbf16>, vector<64x128xbf16>, vector<128x128xf32> -> vector<128x128xf32>
    %cst_15 = arith.constant dense<0.000000e+00> : vector<128x128xf32>
    %24 = tpu.matmul %20, %1, %cst_15 {dimension_numbers = #tpu.dot_dimension_numbers<[1], [0], [0], [1], [0, 0, 1, 1], [], []>} : vector<128x128xbf16>, vector<128x128xbf16>, vector<128x128xf32> -> vector<128x128xf32>
    %25 = arith.addf %23, %24 : vector<128x128xf32>
    %26 = vector.broadcast %2 : vector<1x128xf32> to vector<128x128xf32>
    %27 = arith.addf %25, %26 : vector<128x128xf32>
    %28 = math.tanh %27 : vector<128x128xf32>
    %29 = arith.truncf %28 : vector<128x128xf32> to vector<128x128xbf16>
    %30 = vector.extract_strided_slice %6 {offsets = [0, 1], sizes = [128, 1], strides = [1, 1]} : vector<128x8xi1> to vector<128x1xi1>
    %31 = vector.shape_cast %30 : vector<128x1xi1> to vector<128x1xi1>
    %32 = vector.broadcast %31 : vector<128x1xi1> to vector<128x128xi1>
    %33 = arith.select %32, %29, %20 : vector<128x128xi1>, vector<128x128xbf16>
    %c2 = arith.constant 2 : index
    %c0_16 = arith.constant 0 : index
    %c0_17 = arith.constant 0 : index
    %34 = vector.load %arg1[%c2, %c0_16, %c0_17] : memref<8x128x64xbf16, #tpu.memory_space<vmem>>, vector<1x128x64xbf16>
    %35 = vector.shape_cast %34 : vector<1x128x64xbf16> to vector<128x64xbf16>
    %cst_18 = arith.constant dense<0.000000e+00> : vector<128x128xf32>
    %36 = tpu.matmul %35, %0, %cst_18 {dimension_numbers = #tpu.dot_dimension_numbers<[1], [0], [0], [1], [0, 0, 1, 1], [], []>} : vector<128x64xbf16>, vector<64x128xbf16>, vector<128x128xf32> -> vector<128x128xf32>
    %cst_19 = arith.constant dense<0.000000e+00> : vector<128x128xf32>
    %37 = tpu.matmul %33, %1, %cst_19 {dimension_numbers = #tpu.dot_dimension_numbers<[1], [0], [0], [1], [0, 0, 1, 1], [], []>} : vector<128x128xbf16>, vector<128x128xbf16>, vector<128x128xf32> -> vector<128x128xf32>
    %38 = arith.addf %36, %37 : vector<128x128xf32>
    %39 = vector.broadcast %2 : vector<1x128xf32> to vector<128x128xf32>
    %40 = arith.addf %38, %39 : vector<128x128xf32>
    %41 = math.tanh %40 : vector<128x128xf32>
    %42 = arith.truncf %41 : vector<128x128xf32> to vector<128x128xbf16>
    %43 = vector.extract_strided_slice %6 {offsets = [0, 2], sizes = [128, 1], strides = [1, 1]} : vector<128x8xi1> to vector<128x1xi1>
    %44 = vector.shape_cast %43 : vector<128x1xi1> to vector<128x1xi1>
    %45 = vector.broadcast %44 : vector<128x1xi1> to vector<128x128xi1>
    %46 = arith.select %45, %42, %33 : vector<128x128xi1>, vector<128x128xbf16>
    %c3 = arith.constant 3 : index
    %c0_20 = arith.constant 0 : index
    %c0_21 = arith.constant 0 : index
    %47 = vector.load %arg1[%c3, %c0_20, %c0_21] : memref<8x128x64xbf16, #tpu.memory_space<vmem>>, vector<1x128x64xbf16>
    %48 = vector.shape_cast %47 : vector<1x128x64xbf16> to vector<128x64xbf16>
    %cst_22 = arith.constant dense<0.000000e+00> : vector<128x128xf32>
    %49 = tpu.matmul %48, %0, %cst_22 {dimension_numbers = #tpu.dot_dimension_numbers<[1], [0], [0], [1], [0, 0, 1, 1], [], []>} : vector<128x64xbf16>, vector<64x128xbf16>, vector<128x128xf32> -> vector<128x128xf32>
    %cst_23 = arith.constant dense<0.000000e+00> : vector<128x128xf32>
    %50 = tpu.matmul %46, %1, %cst_23 {dimension_numbers = #tpu.dot_dimension_numbers<[1], [0], [0], [1], [0, 0, 1, 1], [], []>} : vector<128x128xbf16>, vector<128x128xbf16>, vector<128x128xf32> -> vector<128x128xf32>
    %51 = arith.addf %49, %50 : vector<128x128xf32>
    %52 = vector.broadcast %2 : vector<1x128xf32> to vector<128x128xf32>
    %53 = arith.addf %51, %52 : vector<128x128xf32>
    %54 = math.tanh %53 : vector<128x128xf32>
    %55 = arith.truncf %54 : vector<128x128xf32> to vector<128x128xbf16>
    %56 = vector.extract_strided_slice %6 {offsets = [0, 3], sizes = [128, 1], strides = [1, 1]} : vector<128x8xi1> to vector<128x1xi1>
    %57 = vector.shape_cast %56 : vector<128x1xi1> to vector<128x1xi1>
    %58 = vector.broadcast %57 : vector<128x1xi1> to vector<128x128xi1>
    %59 = arith.select %58, %55, %46 : vector<128x128xi1>, vector<128x128xbf16>
    %c4 = arith.constant 4 : index
    %c0_24 = arith.constant 0 : index
    %c0_25 = arith.constant 0 : index
    %60 = vector.load %arg1[%c4, %c0_24, %c0_25] : memref<8x128x64xbf16, #tpu.memory_space<vmem>>, vector<1x128x64xbf16>
    %61 = vector.shape_cast %60 : vector<1x128x64xbf16> to vector<128x64xbf16>
    %cst_26 = arith.constant dense<0.000000e+00> : vector<128x128xf32>
    %62 = tpu.matmul %61, %0, %cst_26 {dimension_numbers = #tpu.dot_dimension_numbers<[1], [0], [0], [1], [0, 0, 1, 1], [], []>} : vector<128x64xbf16>, vector<64x128xbf16>, vector<128x128xf32> -> vector<128x128xf32>
    %cst_27 = arith.constant dense<0.000000e+00> : vector<128x128xf32>
    %63 = tpu.matmul %59, %1, %cst_27 {dimension_numbers = #tpu.dot_dimension_numbers<[1], [0], [0], [1], [0, 0, 1, 1], [], []>} : vector<128x128xbf16>, vector<128x128xbf16>, vector<128x128xf32> -> vector<128x128xf32>
    %64 = arith.addf %62, %63 : vector<128x128xf32>
    %65 = vector.broadcast %2 : vector<1x128xf32> to vector<128x128xf32>
    %66 = arith.addf %64, %65 : vector<128x128xf32>
    %67 = math.tanh %66 : vector<128x128xf32>
    %68 = arith.truncf %67 : vector<128x128xf32> to vector<128x128xbf16>
    %69 = vector.extract_strided_slice %6 {offsets = [0, 4], sizes = [128, 1], strides = [1, 1]} : vector<128x8xi1> to vector<128x1xi1>
    %70 = vector.shape_cast %69 : vector<128x1xi1> to vector<128x1xi1>
    %71 = vector.broadcast %70 : vector<128x1xi1> to vector<128x128xi1>
    %72 = arith.select %71, %68, %59 : vector<128x128xi1>, vector<128x128xbf16>
    %c5 = arith.constant 5 : index
    %c0_28 = arith.constant 0 : index
    %c0_29 = arith.constant 0 : index
    %73 = vector.load %arg1[%c5, %c0_28, %c0_29] : memref<8x128x64xbf16, #tpu.memory_space<vmem>>, vector<1x128x64xbf16>
    %74 = vector.shape_cast %73 : vector<1x128x64xbf16> to vector<128x64xbf16>
    %cst_30 = arith.constant dense<0.000000e+00> : vector<128x128xf32>
    %75 = tpu.matmul %74, %0, %cst_30 {dimension_numbers = #tpu.dot_dimension_numbers<[1], [0], [0], [1], [0, 0, 1, 1], [], []>} : vector<128x64xbf16>, vector<64x128xbf16>, vector<128x128xf32> -> vector<128x128xf32>
    %cst_31 = arith.constant dense<0.000000e+00> : vector<128x128xf32>
    %76 = tpu.matmul %72, %1, %cst_31 {dimension_numbers = #tpu.dot_dimension_numbers<[1], [0], [0], [1], [0, 0, 1, 1], [], []>} : vector<128x128xbf16>, vector<128x128xbf16>, vector<128x128xf32> -> vector<128x128xf32>
    %77 = arith.addf %75, %76 : vector<128x128xf32>
    %78 = vector.broadcast %2 : vector<1x128xf32> to vector<128x128xf32>
    %79 = arith.addf %77, %78 : vector<128x128xf32>
    %80 = math.tanh %79 : vector<128x128xf32>
    %81 = arith.truncf %80 : vector<128x128xf32> to vector<128x128xbf16>
    %82 = vector.extract_strided_slice %6 {offsets = [0, 5], sizes = [128, 1], strides = [1, 1]} : vector<128x8xi1> to vector<128x1xi1>
    %83 = vector.shape_cast %82 : vector<128x1xi1> to vector<128x1xi1>
    %84 = vector.broadcast %83 : vector<128x1xi1> to vector<128x128xi1>
    %85 = arith.select %84, %81, %72 : vector<128x128xi1>, vector<128x128xbf16>
    %c6 = arith.constant 6 : index
    %c0_32 = arith.constant 0 : index
    %c0_33 = arith.constant 0 : index
    %86 = vector.load %arg1[%c6, %c0_32, %c0_33] : memref<8x128x64xbf16, #tpu.memory_space<vmem>>, vector<1x128x64xbf16>
    %87 = vector.shape_cast %86 : vector<1x128x64xbf16> to vector<128x64xbf16>
    %cst_34 = arith.constant dense<0.000000e+00> : vector<128x128xf32>
    %88 = tpu.matmul %87, %0, %cst_34 {dimension_numbers = #tpu.dot_dimension_numbers<[1], [0], [0], [1], [0, 0, 1, 1], [], []>} : vector<128x64xbf16>, vector<64x128xbf16>, vector<128x128xf32> -> vector<128x128xf32>
    %cst_35 = arith.constant dense<0.000000e+00> : vector<128x128xf32>
    %89 = tpu.matmul %85, %1, %cst_35 {dimension_numbers = #tpu.dot_dimension_numbers<[1], [0], [0], [1], [0, 0, 1, 1], [], []>} : vector<128x128xbf16>, vector<128x128xbf16>, vector<128x128xf32> -> vector<128x128xf32>
    %90 = arith.addf %88, %89 : vector<128x128xf32>
    %91 = vector.broadcast %2 : vector<1x128xf32> to vector<128x128xf32>
    %92 = arith.addf %90, %91 : vector<128x128xf32>
    %93 = math.tanh %92 : vector<128x128xf32>
    %94 = arith.truncf %93 : vector<128x128xf32> to vector<128x128xbf16>
    %95 = vector.extract_strided_slice %6 {offsets = [0, 6], sizes = [128, 1], strides = [1, 1]} : vector<128x8xi1> to vector<128x1xi1>
    %96 = vector.shape_cast %95 : vector<128x1xi1> to vector<128x1xi1>
    %97 = vector.broadcast %96 : vector<128x1xi1> to vector<128x128xi1>
    %98 = arith.select %97, %94, %85 : vector<128x128xi1>, vector<128x128xbf16>
    %c7 = arith.constant 7 : index
    %c0_36 = arith.constant 0 : index
    %c0_37 = arith.constant 0 : index
    %99 = vector.load %arg1[%c7, %c0_36, %c0_37] : memref<8x128x64xbf16, #tpu.memory_space<vmem>>, vector<1x128x64xbf16>
    %100 = vector.shape_cast %99 : vector<1x128x64xbf16> to vector<128x64xbf16>
    %cst_38 = arith.constant dense<0.000000e+00> : vector<128x128xf32>
    %101 = tpu.matmul %100, %0, %cst_38 {dimension_numbers = #tpu.dot_dimension_numbers<[1], [0], [0], [1], [0, 0, 1, 1], [], []>} : vector<128x64xbf16>, vector<64x128xbf16>, vector<128x128xf32> -> vector<128x128xf32>
    %cst_39 = arith.constant dense<0.000000e+00> : vector<128x128xf32>
    %102 = tpu.matmul %98, %1, %cst_39 {dimension_numbers = #tpu.dot_dimension_numbers<[1], [0], [0], [1], [0, 0, 1, 1], [], []>} : vector<128x128xbf16>, vector<128x128xbf16>, vector<128x128xf32> -> vector<128x128xf32>
    %103 = arith.addf %101, %102 : vector<128x128xf32>
    %104 = vector.broadcast %2 : vector<1x128xf32> to vector<128x128xf32>
    %105 = arith.addf %103, %104 : vector<128x128xf32>
    %106 = math.tanh %105 : vector<128x128xf32>
    %107 = arith.truncf %106 : vector<128x128xf32> to vector<128x128xbf16>
    %108 = vector.extract_strided_slice %6 {offsets = [0, 7], sizes = [128, 1], strides = [1, 1]} : vector<128x8xi1> to vector<128x1xi1>
    %109 = vector.shape_cast %108 : vector<128x1xi1> to vector<128x1xi1>
    %110 = vector.broadcast %109 : vector<128x1xi1> to vector<128x128xi1>
    %111 = arith.select %110, %107, %98 : vector<128x128xi1>, vector<128x128xbf16>
    %c0_40 = arith.constant 0 : index
    %c0_41 = arith.constant 0 : index
    %112 = vector.load %arg6[%c0_40, %c0_41] : memref<128x128xbf16, #tpu.memory_space<vmem>>, vector<128x128xbf16>
    %cst_42 = arith.constant dense<0.000000e+00> : vector<128x128xf32>
    %113 = tpu.matmul %111, %112, %cst_42 {dimension_numbers = #tpu.dot_dimension_numbers<[1], [0], [0], [1], [0, 0, 1, 1], [], []>} : vector<128x128xbf16>, vector<128x128xbf16>, vector<128x128xf32> -> vector<128x128xf32>
    %c0_43 = arith.constant 0 : index
    %c0_44 = arith.constant 0 : index
    %114 = vector.load %arg7[%c0_43, %c0_44] : memref<1x128xf32, #tpu.memory_space<vmem>>, vector<1x128xf32>
    %115 = vector.broadcast %114 : vector<1x128xf32> to vector<128x128xf32>
    %116 = arith.addf %113, %115 : vector<128x128xf32>
    %c0_45 = arith.constant 0 : index
    %c0_46 = arith.constant 0 : index
    %117 = vector.load %arg8[%c0_45, %c0_46] : memref<128x128xf32, #tpu.memory_space<vmem>>, vector<128x128xf32>
    tpu.vector_store %arg8[%c0_45, %c0_46], %116 {strides = array<i32>} : memref<128x128xf32, #tpu.memory_space<vmem>>, vector<128x128xf32>,
    return
  }
  func.func @transform_0(%arg0: i32) -> (i32, i32, i32) {
    %c0_i32 = arith.constant 0 : i32
    %c0_i32_0 = arith.constant 0 : i32
    %c0_i32_1 = arith.constant 0 : i32
    return %c0_i32, %arg0, %c0_i32_0 : i32, i32, i32
  }
  func.func @transform_1(%arg0: i32) -> (i32, i32) {
    %c0_i32 = arith.constant 0 : i32
    %c0_i32_0 = arith.constant 0 : i32
    return %arg0, %c0_i32 : i32, i32
  }
  func.func @transform_2(%arg0: i32) -> (i32, i32) {
    %c0_i32 = arith.constant 0 : i32
    %c0_i32_0 = arith.constant 0 : i32
    %c0_i32_1 = arith.constant 0 : i32
    return %c0_i32, %c0_i32_0 : i32, i32
  }
  func.func @transform_3(%arg0: i32) -> (i32, i32) {
    %c0_i32 = arith.constant 0 : i32
    %c0_i32_0 = arith.constant 0 : i32
    %c0_i32_1 = arith.constant 0 : i32
    return %c0_i32, %c0_i32_0 : i32, i32
  }
  func.func @transform_4(%arg0: i32) -> (i32, i32) {
    %c0_i32 = arith.constant 0 : i32
    %c0_i32_0 = arith.constant 0 : i32
    %c0_i32_1 = arith.constant 0 : i32
    return %c0_i32, %c0_i32_0 : i32, i32
  }
  func.func @transform_5(%arg0: i32) -> (i32, i32) {
    %c0_i32 = arith.constant 0 : i32
    %c0_i32_0 = arith.constant 0 : i32
    %c0_i32_1 = arith.constant 0 : i32
    return %c0_i32, %c0_i32_0 : i32, i32
  }
  func.func @transform_6(%arg0: i32) -> (i32, i32) {
    %c0_i32 = arith.constant 0 : i32
    %c0_i32_0 = arith.constant 0 : i32
    %c0_i32_1 = arith.constant 0 : i32
    return %c0_i32, %c0_i32_0 : i32, i32
  }
  func.func @transform_7(%arg0: i32) -> (i32, i32) {
    %c0_i32 = arith.constant 0 : i32
    %c0_i32_0 = arith.constant 0 : i32
    return %arg0, %c0_i32 : i32, i32
  }
}

</mosaic_0001>

<bundles_post_ra>
// kernel: tpu_custom_call.1
= control target key start
LH: loop header
LB: loop body
LE: loop exit
PB: predicated region body
PF: predicated region fallthrough
CT: control target
= control target key end

     0   :  { %v5643_v2 = vmov 0   ;;  %vm7613_vm0 = vcmask 523264   ;;  %s7605_s0 = inlined_call_operand.vmem [shape: bf16[8,128,64], index: 0, kind: input, shape index: {}]   ;;  %s7606_s1 = inlined_call_operand.vmem [shape: s32[128,1], index: 1, kind: input, shape index: {}]   ;;  %s7607_s2 = inlined_call_operand.vmem [shape: bf16[64,128], index: 2, kind: input, shape index: {}]   ;;  %s7608_s3 = inlined_call_operand.vmem [shape: bf16[128,128], index: 3, kind: input, shape index: {}]   ;;  %s7609_s4 = inlined_call_operand.vmem [shape: f32[1,128], index: 4, kind: input, shape index: {}]   ;;  %s7610_s5 = inlined_call_operand.vmem [shape: bf16[128,128], index: 5, kind: input, shape index: {}]   ;;  %s7611_s6 = inlined_call_operand.vmem [shape: f32[1,128], index: 6, kind: input, shape index: {}]   ;;  %s7612_s7 = inlined_call_operand.hbm [shape: f32[128,128], index: 7, kind: output, shape index: {}]  }
   0x1   :  { %v57_v0 = vld [vmem:[%s7606_s1 + $0x10] sm:$0xff]  ;;  %v55_v1 = vld [vmem:[%s7606_s1] sm:$0xff]  ;;  %5233 = vset.pattern.permute.xlu1 %v5643_v2  ;;  %5232 = vset.pattern.permute.xlu0 %v5643_v2  ;;  %v58_v3 = vld [vmem:[%s7606_s1 + $0x18] sm:$0xff] }
   0x2   :  { %80 = vperm.xlu1 %5233, %v57_v0   ;;  %74 = vperm.xlu0 %5232, %v55_v1   ;;  %v56_v4 = vld [vmem:[%s7606_s1 + $0x8] sm:$0xff]  ;;  %v5711_v5 = vld [vmem:[%s7608_s3] sm:$0xff]   ;;  %v5731_v9 = vld [vmem:[%s7608_s3 + $0x10] sm:$0xff]  }
   0x3   :  { %v5716_v6 = vld [vmem:[%s7608_s3 + $0x8] sm:$0xff]   ;;  %4629 = vmatprep.mubr.bf16.mxu0 %v5643_v2  ;;  %4613 = vmatprep.subr.bf16.mxu0 %v5711_v5  ;;  %v59_v8 = vld [vmem:[%s7606_s1 + $0x20] sm:$0xff]  ;;  %v62_v11 = vld [vmem:[%s7606_s1 + $0x38] sm:$0xff] }
   0x4   :  { %4614 = vmatpush3.bf16.msra.mxu0 %v5711_v5  ;;  %v60_v7 = vld [vmem:[%s7606_s1 + $0x28] sm:$0xff]  ;;  %v5737_v10 = vld [vmem:[%s7607_s2] sm:$0xff]   ;;  %v61_v12 = vld [vmem:[%s7606_s1 + $0x30] sm:$0xff] }
   0x5   :  { %4615 = vmatprep.subr.bf16.mxu0 %v5716_v6  ;;  %v5749_v13 = vld [vmem:[%s7608_s3 + $0x18] sm:$0xff]   ;;  %4645 = vmatprep.subr.bf16.mxu1 %v5737_v10  ;;  %v5255_v14 = vld [vmem:[%s7607_s2 + $0x8] sm:$0xff]   ;;  %v63_v16 = vld [vmem:[%s7606_s1 + $0x40] sm:$0xff] }
   0x6   :  { %83 = vperm.xlu1 %5233, %v58_v3   ;;  %77 = vperm.xlu0 %5232, %v56_v4   ;;  %v64_v15 = vld [vmem:[%s7606_s1 + $0x48] sm:$0xff]  ;;  %v5766_v17 = vld [vmem:[%s7608_s3 + $0x20] sm:$0xff]   ;;  %v5257_v18 = vld [vmem:[%s7607_s2 + $0x10] sm:$0xff]  }
   0x7   :  { %4646 = vmatpush3.bf16.msra.mxu1 %v5737_v10  ;;  %v66_v19 = vld [vmem:[%s7606_s1 + $0x58] sm:$0xff]  ;;  %v65_v20 = vld [vmem:[%s7606_s1 + $0x50] sm:$0xff]  ;;  %v5260_v22 = vld [vmem:[%s7605_s0] sm:$0xff]  }
   0x8   :  { %4616 = vmatpush3.bf16.msra.mxu0 %v5716_v6  ;;  %4647 = vmatprep.subr.bf16.mxu1 %v5255_v14  ;;  %v5259_v21 = vld [vmem:[%s7607_s2 + $0x18] sm:$0xff]   ;;  %v5789_v23 = vld [vmem:[%s7608_s3 + $0x28] sm:$0xff]   ;;  %v67_v25 = vld [vmem:[%s7606_s1 + $0x60] sm:$0xff] }
   0x9   :  { %4617 = vmatprep.subr.bf16.mxu0 %v5731_v9  ;;  %4653 = vmatprep.mubr.msk.bf16.mxu1 %vm7613_vm0, %v5260_v22  ;;  %v68_v24 = vld [vmem:[%s7606_s1 + $0x68] sm:$0xff]  ;;  %v5802_v26 = vld [vmem:[%s7608_s3 + $0x30] sm:$0xff]   ;;  %v70_v29 = vld [vmem:[%s7606_s1 + $0x78] sm:$0xff] }
   0xa   :  { %89 = vperm.xlu1 %5233, %v60_v7   ;;  %86 = vperm.xlu0 %5232, %v59_v8   ;;  %v5261_v27 = vld [vmem:[%s7605_s0 + $0x8] sm:$0xff]   ;;  %v5262_v28 = vld [vmem:[%s7605_s0 + $0x10] sm:$0xff]   ;;  %v5258_v31 = vld [vmem:[%s7608_s3 + $0x38] sm:$0xff]  }
   0xb   :  { %4648 = vmatpush3.bf16.msra.mxu1 %v5255_v14  ;;  %v69_v30 = vld [vmem:[%s7606_s1 + $0x70] sm:$0xff]  ;;  %v5263_v32 = vld [vmem:[%s7605_s0 + $0x18] sm:$0xff]   ;;  %v5264_v33 = vld [vmem:[%s7605_s0 + $0x20] sm:$0xff]  }
   0xc   :  { %4618 = vmatpush3.bf16.msra.mxu0 %v5731_v9  ;;  %4649 = vmatprep.subr.bf16.mxu1 %v5257_v18  ;;  %v5265_v34 = vld [vmem:[%s7605_s0 + $0x28] sm:$0xff]   ;;  %v5266_v35 = vld [vmem:[%s7605_s0 + $0x30] sm:$0xff]   ;;  %v5267_v36 = vld [vmem:[%s7605_s0 + $0x38] sm:$0xff]  }
   0xd   :  { %4619 = vmatprep.subr.bf16.mxu0 %v5749_v13 }
   0xe   :  { %95 = vperm.xlu1 %5233, %v62_v11   ;;  %92 = vperm.xlu0 %5232, %v61_v12  }
   0xf   :  { %4650 = vmatpush3.bf16.msra.mxu1 %v5257_v18 }
  0x10   :  { %4620 = vmatpush3.bf16.msra.mxu0 %v5749_v13  ;;  %4651 = vmatprep.subr.bf16.mxu1 %v5259_v21 }
  0x11   :  { %4621 = vmatprep.subr.bf16.mxu0 %v5766_v17 }
  0x12   :  { %101 = vperm.xlu1 %5233, %v64_v15   ;;  %98 = vperm.xlu0 %5232, %v63_v16  }
  0x13   :  { %4652 = vmatpush3.bf16.msra.mxu1 %v5259_v21 }
  0x14   :  { %4622 = vmatpush3.bf16.msra.mxu0 %v5766_v17  ;;  %4669 = vmatprep.subr.bf16.mxu1 %v5711_v5 }
  0x15   :  { %4623 = vmatprep.subr.bf16.mxu0 %v5789_v23 }
  0x16   :  { %107 = vperm.xlu1 %5233, %v66_v19   ;;  %104 = vperm.xlu0 %5232, %v65_v20  }
  0x17   :  { %4654 = vmatmul.mubr.msk.bf16.vlgmr.msra.gmra.mrb[0].mxu1 %vm7613_vm0, %v5261_v27 }
  0x18   :  { %4624 = vmatpush3.bf16.msra.mxu0 %v5789_v23  ;;  %4657 = vmatprep.mubr.msk.bf16.mxu1 %vm7613_vm0, %v5262_v28 }
  0x19   :  { %4625 = vmatprep.subr.bf16.mxu0 %v5802_v26  ;;  %4670 = vmatpush3.bf16.msra.mxu1 %v5711_v5 }
  0x1a   :  { %113 = vperm.xlu1 %5233, %v68_v24   ;;  %110 = vperm.xlu0 %5232, %v67_v25  }
  0x1b   :  { %4671 = vmatprep.subr.bf16.mxu1 %v5716_v6 }
  0x1c   :  { %4626 = vmatpush3.bf16.msra.mxu0 %v5802_v26 }
  0x1d   :  { %4627 = vmatprep.subr.bf16.mxu0 %v5258_v31  ;;  %4672 = vmatpush3.bf16.msra.mxu1 %v5716_v6 }
  0x1e   :  { %119 = vperm.xlu1 %5233, %v70_v29   ;;  %116 = vperm.xlu0 %5232, %v69_v30  }
  0x1f   :  { %4673 = vmatprep.subr.bf16.mxu1 %v5731_v9  ;;  %4658 = vmatmul.mubr.msk.bf16.gmra.mrb[4].mxu1 %vm7613_vm0, %v5263_v32 }
  0x20   :  { %4628 = vmatpush3.bf16.msra.mxu0 %v5258_v31  ;;  %4661 = vmatprep.mubr.msk.bf16.mxu1 %vm7613_vm0, %v5264_v33 }
  0x21   :  { %4725 = vmatprep.subr.bf16.mxu0 %v5711_v5  ;;  %4674 = vmatpush3.bf16.msra.mxu1 %v5731_v9 }
  0x22   :  { %4675 = vmatprep.subr.bf16.mxu1 %v5749_v13 }
  0x23   :  { %4630 = vmatmul.mubr.bf16.vlgmr.msra.gmra.mrb[0].mxu0 %v5643_v2 }
  0x24   :  { %4633 = vmatprep.mubr.bf16.mxu0 %v5643_v2  ;;  %4726 = vmatpush3.bf16.msra.mxu0 %v5711_v5 }
  0x25   :  { %4727 = vmatprep.subr.bf16.mxu0 %v5716_v6  ;;  %4676 = vmatpush3.bf16.msra.mxu1 %v5749_v13 }
  0x26   :  { %4677 = vmatprep.subr.bf16.mxu1 %v5766_v17 }
  0x27   :  { %4662 = vmatmul.mubr.msk.bf16.gmra.mrb[8].mxu1 %vm7613_vm0, %v5265_v34 }
  0x28   :  { %4728 = vmatpush3.bf16.msra.mxu0 %v5716_v6  ;;  %4665 = vmatprep.mubr.msk.bf16.mxu1 %vm7613_vm0, %v5266_v35 }
  0x29   :  { %4729 = vmatprep.subr.bf16.mxu0 %v5731_v9  ;;  %4678 = vmatpush3.bf16.msra.mxu1 %v5766_v17 }
  0x2a   :  { %4679 = vmatprep.subr.bf16.mxu1 %v5789_v23 }
  0x2b   :  { %4634 = vmatmul.mubr.bf16.gmra.mrb[4].mxu0 %v5643_v2 }
  0x2c   :  { %4637 = vmatprep.mubr.bf16.mxu0 %v5643_v2  ;;  %4730 = vmatpush3.bf16.msra.mxu0 %v5731_v9 }
  0x2d   :  { %4731 = vmatprep.subr.bf16.mxu0 %v5749_v13  ;;  %4680 = vmatpush3.bf16.msra.mxu1 %v5789_v23 }
  0x2e   :  { %4681 = vmatprep.subr.bf16.mxu1 %v5802_v26 }
  0x2f   :  { %4666 = vmatmul.mubr.msk.bf16.gmra.mrb[12].mxu1 %vm7613_vm0, %v5267_v36 }
  0x30   :  { %4732 = vmatpush3.bf16.msra.mxu0 %v5749_v13 }
  0x31   :  { %4733 = vmatprep.subr.bf16.mxu0 %v5766_v17  ;;  %4682 = vmatpush3.bf16.msra.mxu1 %v5802_v26 }
  0x32   :  { %4683 = vmatprep.subr.bf16.mxu1 %v5258_v31 }
  0x33   :  { %4638 = vmatmul.mubr.bf16.gmra.mrb[8].mxu0 %v5643_v2 }
  0x34   :  { %4641 = vmatprep.mubr.bf16.mxu0 %v5643_v2  ;;  %4734 = vmatpush3.bf16.msra.mxu0 %v5766_v17 }
  0x35   :  { %4735 = vmatprep.subr.bf16.mxu0 %v5789_v23  ;;  %4684 = vmatpush3.bf16.msra.mxu1 %v5258_v31 }
  0x36   :  { %4701 = vmatprep.subr.bf16.mxu1 %v5737_v10 }
  0x38   :  { %4736 = vmatpush3.bf16.msra.mxu0 %v5789_v23 }
  0x39   :  { %4737 = vmatprep.subr.bf16.mxu0 %v5802_v26 }
  0x3b   :  { %4642 = vmatmul.mubr.bf16.gmra.mrb[12].mxu0 %v5643_v2 }
  0x3c   :  { %4738 = vmatpush3.bf16.msra.mxu0 %v5802_v26 }
  0x3d   :  { %4739 = vmatprep.subr.bf16.mxu0 %v5258_v31 }
  0x40   :  { %4740 = vmatpush3.bf16.msra.mxu0 %v5258_v31 }
  0x41   :  { %4757 = vmatprep.subr.bf16.mxu0 %v5737_v10 }
  0x42   :  { %12 = vsyncpa [#allocation3], 0  ;;  %v71_v37 = vlaneseq  ;;  %v5644_v8 = vmov 1   ;;  %v5645_v9 = vmov 2   ;;  %v5646_v10 = vmov 3  }
  0x43   :  { %v6008_v17 = vld [vmem:[%s7609_s4] ss:$0 sm:$0xff] }
  0x44   :  { %v5882_v38 = vand.u32 127, %v71_v37 }
  0x81   :  { %v81_v39 = vpop.permute.xlu1 %80  ;;  %v75_v40 = vpop.permute.xlu0 %74 }
  0x82   :  { %vm123_vm1 = vcmp.gt.s32.totalorder %v81_v39, %v5882_v38  ;;  %vm121_vm2 = vcmp.gt.s32.totalorder %v75_v40, %v5882_v38 }
  0x83   :  { %v5887_v41 = vsel %vm121_vm2, 1, %v5643_v2  ;;  %v5891_v42 = vsel %vm123_vm1, 1, %v5643_v2 }
  0x84   :  { %547 = vperm.xlu0 %5232, %v5887_v41  }
  0x85   :  { %v84_v43 = vpop.permute.xlu1 %83  ;;  %v78_v44 = vpop.permute.xlu0 %77 }
  0x86   :  { %vm122_vm3 = vcmp.gt.s32.totalorder %v78_v44, %v5882_v38  ;;  %vm124_vm4 = vcmp.gt.s32.totalorder %v84_v43, %v5882_v38 }
  0x87   :  { %v5895_v45 = vsel %vm122_vm3, 1, %v5643_v2  ;;  %v5902_v48 = vsel %vm124_vm4, 1, %v5643_v2 }
  0x88   :  { %553 = vperm.xlu0 %5232, %v5891_v42   ;;  %550 = vperm.xlu1 %5233, %v5895_v45  }
  0x89   :  { %v90_v46 = vpop.permute.xlu1 %89  ;;  %v87_v47 = vpop.permute.xlu0 %86 }
  0x8a   :  { %vm125_vm5 = vcmp.gt.s32.totalorder %v87_v47, %v5882_v38  ;;  %vm126_vm6 = vcmp.gt.s32.totalorder %v90_v46, %v5882_v38 }
  0x8b   :  { %v5905_v49 = vsel %vm125_vm5, 1, %v5643_v2  ;;  %v5912_v52 = vsel %vm126_vm6, 1, %v5643_v2 }
  0x8c   :  { %556 = vperm.xlu1 %5233, %v5902_v48   ;;  %559 = vperm.xlu0 %5232, %v5905_v49  }
  0x8d   :  { %v96_v50 = vpop.permute.xlu1 %95  ;;  %v93_v51 = vpop.permute.xlu0 %92 }
  0x8e   :  { %vm127_vm7 = vcmp.gt.s32.totalorder %v93_v51, %v5882_v38  ;;  %vm128_vm8 = vcmp.gt.s32.totalorder %v96_v50, %v5882_v38  ;;  %v5647_v50 = vmov 4  }
  0x8f   :  { %v5915_v53 = vsel %vm127_vm7, 1, %v5643_v2  ;;  %v5922_v56 = vsel %vm128_vm8, 1, %v5643_v2 }
  0x90   :  { %562 = vperm.xlu1 %5233, %v5912_v52   ;;  %565 = vperm.xlu0 %5232, %v5915_v53  }
  0x91   :  { %v102_v54 = vpop.permute.xlu1 %101  ;;  %v99_v55 = vpop.permute.xlu0 %98 }
  0x92   :  { %vm129_vm9 = vcmp.gt.s32.totalorder %v99_v55, %v5882_v38  ;;  %vm130_vm10 = vcmp.gt.s32.totalorder %v102_v54, %v5882_v38 }
  0x93   :  { %v5925_v57 = vsel %vm129_vm9, 1, %v5643_v2  ;;  %v5932_v60 = vsel %vm130_vm10, 1, %v5643_v2 }
  0x94   :  { %568 = vperm.xlu1 %5233, %v5922_v56   ;;  %571 = vperm.xlu0 %5232, %v5925_v57  }
  0x95   :  { %v108_v58 = vpop.permute.xlu1 %107  ;;  %v105_v59 = vpop.permute.xlu0 %104 }
  0x96   :  { %vm131_vm11 = vcmp.gt.s32.totalorder %v105_v59, %v5882_v38  ;;  %vm132_vm12 = vcmp.gt.s32.totalorder %v108_v58, %v5882_v38 }
  0x97   :  { %v5935_v61 = vsel %vm131_vm11, 1, %v5643_v2  ;;  %v5942_v0 = vsel %vm132_vm12, 1, %v5643_v2 }
  0x98   :  { %574 = vperm.xlu1 %5233, %v5932_v60   ;;  %577 = vperm.xlu0 %5232, %v5935_v61  }
  0x99   :  { %v114_v62 = vpop.permute.xlu1 %113  ;;  %v111_v63 = vpop.permute.xlu0 %110 }
  0x9a   :  { %vm133_vm13 = vcmp.gt.s32.totalorder %v111_v63, %v5882_v38  ;;  %vm134_vm14 = vcmp.gt.s32.totalorder %v114_v62, %v5882_v38 }
  0x9b   :  { %v5945_v1 = vsel %vm133_vm13, 1, %v5643_v2  ;;  %v5952_v5 = vsel %vm134_vm14, 1, %v5643_v2 }
  0x9c   :  { %580 = vperm.xlu1 %5233, %v5942_v0   ;;  %583 = vperm.xlu0 %5232, %v5945_v1  }
  0x9d   :  { %v120_v3 = vpop.permute.xlu1 %119  ;;  %v117_v4 = vpop.permute.xlu0 %116 }
  0x9e   :  { %vm135_vm15 = vcmp.gt.s32.totalorder %v117_v4, %v5882_v38  ;;  %vm136_vm1 = vcmp.gt.s32.totalorder %v120_v3, %v5882_v38 }
  0x9f   :  { %v5955_v6 = vsel %vm135_vm15, 1, %v5643_v2  ;;  %v5961_v7 = vsel %vm136_vm1, 1, %v5643_v2 }
  0xa0   :  { %586 = vperm.xlu1 %5233, %v5952_v5   ;;  %589 = vperm.xlu0 %5232, %v5955_v6  }
  0xa4   :  { %592 = vperm.xlu1 %5233, %v5961_v7   ;;  %5234 = vset.pattern.permute.xlu0 %v5644_v8 }
  0xa5   :  { %998 = vperm.xlu0 %5234, %v5887_v41  }
  0xa8   :  { %5235 = vset.pattern.permute.xlu1 %v5644_v8 }
  0xa9   :  { %1001 = vperm.xlu1 %5235, %v5895_v45   ;;  %1007 = vperm.xlu0 %5234, %v5902_v48  }
  0xad   :  { %1004 = vperm.xlu1 %5235, %v5891_v42   ;;  %1013 = vperm.xlu0 %5234, %v5912_v52  }
  0xb1   :  { %1010 = vperm.xlu1 %5235, %v5905_v49   ;;  %1019 = vperm.xlu0 %5234, %v5922_v56  }
  0xb5   :  { %1016 = vperm.xlu1 %5235, %v5915_v53   ;;  %1025 = vperm.xlu0 %5234, %v5932_v60  }
  0xb9   :  { %1022 = vperm.xlu1 %5235, %v5925_v57   ;;  %1031 = vperm.xlu0 %5234, %v5942_v0  }
  0xbd   :  { %1028 = vperm.xlu1 %5235, %v5935_v61   ;;  %1037 = vperm.xlu0 %5234, %v5952_v5  }
  0xc1   :  { %1034 = vperm.xlu1 %5235, %v5945_v1   ;;  %1043 = vperm.xlu0 %5234, %v5961_v7  }
  0xc5   :  { %1040 = vperm.xlu1 %5235, %v5955_v6   ;;  %5237 = vset.pattern.permute.xlu0 %v5645_v9 }
  0xc6   :  { %1452 = vperm.xlu0 %5237, %v5895_v45  }
  0xc9   :  { %5236 = vset.pattern.permute.xlu1 %v5645_v9 }
  0xca   :  { %1449 = vperm.xlu1 %5236, %v5887_v41   ;;  %1461 = vperm.xlu0 %5237, %v5905_v49  }
  0xce   :  { %1455 = vperm.xlu1 %5236, %v5891_v42   ;;  %1467 = vperm.xlu0 %5237, %v5915_v53  }
  0xd2   :  { %1458 = vperm.xlu1 %5236, %v5902_v48   ;;  %1473 = vperm.xlu0 %5237, %v5925_v57  }
  0xd6   :  { %1464 = vperm.xlu1 %5236, %v5912_v52   ;;  %1479 = vperm.xlu0 %5237, %v5935_v61  }
  0xda   :  { %1470 = vperm.xlu1 %5236, %v5922_v56   ;;  %1485 = vperm.xlu0 %5237, %v5945_v1  }
  0xde   :  { %1476 = vperm.xlu1 %5236, %v5932_v60   ;;  %1491 = vperm.xlu0 %5237, %v5955_v6  }
  0xe2   :  { %1482 = vperm.xlu1 %5236, %v5942_v0   ;;  %5238 = vset.pattern.permute.xlu0 %v5646_v10 }
  0xe3   :  { %1900 = vperm.xlu0 %5238, %v5887_v41  }
  0xe6   :  { %1488 = vperm.xlu1 %5236, %v5952_v5  }
  0xe7   :  { %1909 = vperm.xlu0 %5238, %v5902_v48  }
  0xea   :  { %1494 = vperm.xlu1 %5236, %v5961_v7   ;;  %v4655_v11 = vpop.f32.mrb[0].mxu1 }
  0xeb   :  { %1915 = vperm.xlu0 %5238, %v5912_v52   ;;  %v421_v12 = vpop.f32.mrb[1].mxu1 }
  0xec   :  { %v4656_v13 = vpop.f32.mrb[2].mxu1 }
  0xed   :  { %v424_v14 = vpop.f32.mrb[3].mxu1 }
  0xee   :  { %5239 = vset.pattern.permute.xlu1 %v5646_v10 }
  0xef   :  { %1903 = vperm.xlu1 %5239, %v5895_v45   ;;  %1921 = vperm.xlu0 %5238, %v5922_v56  }
  0xf2   :  { %v4659_v15 = vpop.f32.mrb[4].mxu1 }
  0xf3   :  { %1906 = vperm.xlu1 %5239, %v5891_v42   ;;  %1927 = vperm.xlu0 %5238, %v5932_v60   ;;  %v437_v18 = vpop.f32.mrb[5].mxu1 }
  0xf4   :  { %v4660_v21 = vpop.f32.mrb[6].mxu1 }
  0xf5   :  { %v440_v24 = vpop.f32.mrb[7].mxu1 }
  0xf6   :  { %v4631_v16 = vpop.f32.mrb[0].mxu0 }
  0xf7   :  { %1912 = vperm.xlu1 %5239, %v5905_v49   ;;  %1933 = vperm.xlu0 %5238, %v5942_v0   ;;  %v430_v19 = vadd.f32 %v4655_v11, %v4631_v16  ;;  %v235_v20 = vpop.f32.mrb[1].mxu0 }
  0xf8   :  { %v422_v22 = vadd.f32 %v421_v12, %v235_v20  ;;  %v4632_v23 = vpop.f32.mrb[2].mxu0 }
  0xf9   :  { %v492_v25 = vadd.f32 %v6008_v17, %v430_v19  ;;  %v433_v26 = vadd.f32 %v4656_v13, %v4632_v23  ;;  %v238_v27 = vpop.f32.mrb[3].mxu0 }
  0xfa   :  { %v490_v28 = vadd.f32 %v6008_v17, %v422_v22  ;;  %v425_v29 = vadd.f32 %v424_v14, %v238_v27  ;;  %v4663_v32 = vpop.f32.mrb[8].mxu1 }
  0xfb   :  { %1918 = vperm.xlu1 %5239, %v5915_v53   ;;  %1939 = vperm.xlu0 %5238, %v5952_v5   ;;  %5332 = vtanh.f32 %v492_v25  ;;  %v493_v30 = vadd.f32 %v6008_v17, %v433_v26  ;;  %v453_v34 = vpop.f32.mrb[9].mxu1 }
  0xfc   :  { %5334 = vtanh.f32 %v490_v28  ;;  %v491_v31 = vadd.f32 %v6008_v17, %v425_v29  ;;  %v4664_v37 = vpop.f32.mrb[10].mxu1 }
  0xfd   :  { %5336 = vtanh.f32 %v493_v30  ;;  %v456_v40 = vpop.f32.mrb[11].mxu1 }
  0xfe   :  { %5338 = vtanh.f32 %v491_v31  ;;  %v4635_v33 = vpop.f32.mrb[4].mxu0 }
  0xff   :  { %1924 = vperm.xlu1 %5239, %v5925_v57   ;;  %1945 = vperm.xlu0 %5238, %v5961_v7   ;;  %v446_v35 = vadd.f32 %v4659_v15, %v4635_v33  ;;  %v251_v36 = vpop.f32.mrb[5].mxu0 }
 0x100   :  { %v438_v38 = vadd.f32 %v437_v18, %v251_v36  ;;  %v4636_v39 = vpop.f32.mrb[6].mxu0 }
 0x101   :  { %v496_v43 = vadd.f32 %v6008_v17, %v446_v35  ;;  %v449_v44 = vadd.f32 %v4660_v21, %v4636_v39  ;;  %v254_v46 = vpop.f32.mrb[7].mxu0 }
 0x102   :  { %v494_v47 = vadd.f32 %v6008_v17, %v438_v38  ;;  %v441_v54 = vadd.f32 %v440_v24, %v254_v46  ;;  %v6025_v62 = vpop.f32.mrb[12].mxu1 }
 0x103   :  { %1930 = vperm.xlu1 %5239, %v5935_v61   ;;  %5241 = vset.pattern.permute.xlu0 %v5647_v50  ;;  %v548_v51 = vpop.permute.xlu0 %547  ;;  %5340 = vtanh.f32 %v496_v43  ;;  %v497_v55 = vadd.f32 %v6008_v17, %v449_v44  ;;  %v469_v11 = vpop.f32.mrb[13].mxu1 }
 0x104   :  { %vm594_vm2 = vcmp.eq.s32.totalorder %v548_v51, 1  ;;  %2354 = vperm.xlu0 %5241, %v5895_v45   ;;  %5342 = vtanh.f32 %v494_v47  ;;  %v495_v58 = vadd.f32 %v6008_v17, %v441_v54  ;;  %v6035_v16 = vpop.f32.mrb[14].mxu1 }
 0x105   :  { %v5333_v59 = vpop.eup %5332  ;;  %5344 = vtanh.f32 %v497_v55  ;;  %vm6027_vm3 = vmpackc.low %vm594_vm2, %vm594_vm2  ;;  %v6043_v23 = vpop.f32.mrb[15].mxu1 }
 0x106   :  { %v5335_v63 = vpop.eup %5334  ;;  %5346 = vtanh.f32 %v495_v58  ;;  %v4639_v10 = vpop.f32.mrb[8].mxu0  ;;  %v626_v18 = vsel %vm6027_vm3, 65537, %v5643_v2 }
 0x107   :  { %v551_v4 = vpop.permute.xlu1 %550  ;;  %1936 = vperm.xlu1 %5239, %v5945_v1   ;;  %v554_v8 = vpop.permute.xlu0 %553  ;;  %v462_v13 = vadd.f32 %v4663_v32, %v4639_v10 }
 0x108   :  { %v5337_v9 = vpop.eup %5336  ;;  %vm595_vm4 = vcmp.eq.s32.totalorder %v551_v4, 1  ;;  %vm596_vm5 = vcmp.eq.s32.totalorder %v554_v8, 1  ;;  %2363 = vperm.xlu0 %5241, %v5905_v49   ;;  %v267_v14 = vpop.f32.mrb[9].mxu0 }
 0x109   :  { %v5339_v12 = vpop.eup %5338  ;;  %vm611_vm6 = vmpackc.low %vm595_vm4, %vm595_vm4  ;;  %v6033_v15 = vpack.c.bf16 %v5337_v9, %v5333_v59  ;;  %v454_v20 = vadd.f32 %v453_v34, %v267_v14  ;;  %v4640_v21 = vpop.f32.mrb[10].mxu0  ;;  %v500_v25 = vadd.f32 %v6008_v17, %v462_v13  ;;  %v6101_v13 = vld [vmem:[%s7607_s2] sm:$0xff]  }
 0x10a   :  { %v627_v19 = vsel %vm611_vm6, 65537, %v5643_v2  ;;  %v6041_v22 = vpack.c.bf16 %v5339_v12, %v5335_v63  ;;  %vm6047_vm7 = vmpackc.low %vm596_vm5, %vm596_vm5  ;;  %v465_v28 = vadd.f32 %v4664_v37, %v4640_v21  ;;  %v270_v31 = vpop.f32.mrb[11].mxu0 }
 0x10b   :  { %v557_v26 = vpop.permute.xlu1 %556  ;;  %1942 = vperm.xlu1 %5239, %v5955_v6   ;;  %v560_v27 = vpop.permute.xlu0 %559  ;;  %v4068_v29 = vcombine.low %v626_v18, %v627_v19  ;;  %v498_v30 = vadd.f32 %v6008_v17, %v454_v20  ;;  %5348 = vtanh.f32 %v500_v25  ;;  %v457_v33 = vadd.f32 %v456_v40, %v270_v31 }
 0x10c   :  { %vm597_vm8 = vcmp.eq.s32.totalorder %v557_v26, 1  ;;  %vm598_vm9 = vcmp.eq.s32.totalorder %v560_v27, 1  ;;  %2369 = vperm.xlu0 %5241, %v5915_v53   ;;  %v501_v32 = vadd.f32 %v6008_v17, %v465_v28  ;;  %v628_v36 = vsel %vm6047_vm7, 65537, %v5643_v2 }
 0x10d   :  { %vm613_vm10 = vmpackc.low %vm597_vm8, %vm597_vm8  ;;  %vm6056_vm11 = vcmp.ne.s16.totalorder %v4068_v29, 0  ;;  %v5341_v35 = vpop.eup %5340  ;;  %5350 = vtanh.f32 %v498_v30  ;;  %v499_v43 = vadd.f32 %v6008_v17, %v457_v33 }
 0x10e   :  { %v629_v37 = vsel %vm613_vm10, 65537, %v5643_v2  ;;  %vm614_vm12 = vmpackc.low %vm598_vm9, %vm598_vm9  ;;  %4685 = vmatprep.mubr.msk.bf16.mxu1 %vm6056_vm11, %v6041_v22  ;;  %v674_v38 = vsel %vm6056_vm11, %v6041_v22, 0  ;;  %v5343_v39 = vpop.eup %5342  ;;  %5352 = vtanh.f32 %v501_v32  ;;  %v4643_v54 = vpop.f32.mrb[12].mxu0 }
 0x10f   :  { %v4069_v40 = vcombine.low %v628_v36, %v629_v37  ;;  %v563_v44 = vpop.permute.xlu1 %562  ;;  %5240 = vset.pattern.permute.xlu1 %v5647_v50  ;;  %v566_v46 = vpop.permute.xlu0 %565  ;;  %v630_v51 = vsel %vm614_vm12, 65537, %v5643_v2  ;;  %5354 = vtanh.f32 %v499_v43  ;;  %v478_v50 = vadd.f32 %v6025_v62, %v4643_v54 }
 0x110   :  { %v5345_v47 = vpop.eup %5344  ;;  %vm599_vm13 = vcmp.eq.s32.totalorder %v563_v44, 1  ;;  %vm600_vm14 = vcmp.eq.s32.totalorder %v566_v46, 1  ;;  %2351 = vperm.xlu1 %5240, %v5887_v41   ;;  %2375 = vperm.xlu0 %5241, %v5925_v57   ;;  %v283_v59 = vpop.f32.mrb[13].mxu0 }
 0x111   :  { %v5347_v55 = vpop.eup %5346  ;;  %vm6075_vm15 = vcmp.ne.s16.totalorder %v4069_v40, 0  ;;  %vm615_vm1 = vmpackc.low %vm599_vm13, %vm599_vm13  ;;  %v6080_v63 = vpack.c.bf16 %v5345_v47, %v5341_v35  ;;  %v470_v8 = vadd.f32 %v469_v11, %v283_v59  ;;  %v4644_v9 = vpop.f32.mrb[14].mxu0  ;;  %v504_v12 = vadd.f32 %v6008_v17, %v478_v50  ;;  %v6147_v40 = vld [vmem:[%s7607_s2 + $0x10] sm:$0xff]  }
 0x112   :  { %v675_v3 = vsel %vm6075_vm15, %v6033_v15, 0  ;;  %v631_v4 = vsel %vm615_vm1, 65537, %v5643_v2  ;;  %4686 = vmatmul.mubr.msk.bf16.vlgmr.msra.gmra.mrb[16].mxu1 %vm6075_vm15, %v6033_v15  ;;  %v6089_v10 = vpack.c.bf16 %v5347_v55, %v5343_v39  ;;  %vm6093_vm2 = vmpackc.low %vm600_vm14, %vm600_vm14  ;;  %v481_v18 = vadd.f32 %v6035_v16, %v4644_v9  ;;  %v286_v21 = vpop.f32.mrb[15].mxu0  ;;  %v6117_v16 = vld [vmem:[%s7607_s2 + $0x8] sm:$0xff]  }
 0x113   :  { %4702 = vmatpush3.bf16.msra.mxu1 %v6101_v13  ;;  %v569_v11 = vpop.permute.xlu1 %568  ;;  %v572_v14 = vpop.permute.xlu0 %571  ;;  %v4070_v19 = vcombine.low %v630_v51, %v631_v4  ;;  %v502_v20 = vadd.f32 %v6008_v17, %v470_v8  ;;  %5356 = vtanh.f32 %v504_v12  ;;  %v473_v25 = vadd.f32 %v6043_v23, %v286_v21  ;;  %v6174_v8 = vld [vmem:[%s7607_s2 + $0x18] sm:$0xff]  }
 0x114   :  { %vm601_vm3 = vcmp.eq.s32.totalorder %v569_v11, 1  ;;  %vm602_vm4 = vcmp.eq.s32.totalorder %v572_v14, 1  ;;  %2357 = vperm.xlu1 %5240, %v5891_v42   ;;  %2381 = vperm.xlu0 %5241, %v5935_v61   ;;  %v505_v24 = vadd.f32 %v6008_v17, %v481_v18  ;;  %v632_v27 = vsel %vm6093_vm2, 65537, %v5643_v2  ;;  %v5270_v14 = vld [vmem:[%s7605_s0 + $0x50] sm:$0xff]  }
 0x115   :  { %vm617_vm5 = vmpackc.low %vm601_vm3, %vm601_vm3  ;;  %vm6110_vm6 = vcmp.ne.s16.totalorder %v4070_v19, 0  ;;  %4703 = vmatprep.subr.bf16.mxu1 %v6117_v16  ;;  %5358 = vtanh.f32 %v502_v20  ;;  %v5349_v29 = vpop.eup %5348  ;;  %v503_v31 = vadd.f32 %v6008_v17, %v473_v25 }
 0x116   :  { %v633_v28 = vsel %vm617_vm5, 65537, %v5643_v2  ;;  %4689 = vmatprep.mubr.msk.bf16.mxu1 %vm6110_vm6, %v6089_v10  ;;  %v676_v23 = vsel %vm6110_vm6, %v6089_v10, 0  ;;  %vm6132_vm7 = vmpackc.low %vm602_vm4, %vm602_vm4  ;;  %5360 = vtanh.f32 %v505_v24  ;;  %v5648_v24 = vmov 5  }
 0x117   :  { %v575_v32 = vpop.permute.xlu1 %574  ;;  %v578_v33 = vpop.permute.xlu0 %577  ;;  %v4071_v35 = vcombine.low %v632_v27, %v633_v28  ;;  %4704 = vmatpush3.bf16.msra.mxu1 %v6117_v16  ;;  %5362 = vtanh.f32 %v503_v31  ;;  %v634_v43 = vsel %vm6132_vm7, 65537, %v5643_v2  ;;  %v6199_v28 = vld [vmem:[%s7608_s3] sm:$0xff]  }
 0x118   :  { %v5351_v36 = vpop.eup %5350  ;;  %vm603_vm8 = vcmp.eq.s32.totalorder %v575_v32, 1  ;;  %vm604_vm9 = vcmp.eq.s32.totalorder %v578_v33, 1  ;;  %2360 = vperm.xlu1 %5240, %v5902_v48   ;;  %2387 = vperm.xlu0 %5241, %v5945_v1  }
 0x119   :  { %v5353_v37 = vpop.eup %5352  ;;  %vm619_vm10 = vmpackc.low %vm603_vm8, %vm603_vm8  ;;  %vm6140_vm12 = vcmp.ne.s16.totalorder %v4071_v35, 0  ;;  %4705 = vmatprep.subr.bf16.mxu1 %v6147_v40 }
 0x11a   :  { %v635_v44 = vsel %vm619_vm10, 65537, %v5643_v2  ;;  %4690 = vmatmul.mubr.msk.bf16.gmra.mrb[20].mxu1 %vm6140_vm12, %v6080_v63  ;;  %v6157_v46 = vpack.c.bf16 %v5353_v37, %v5349_v29  ;;  %v677_v47 = vsel %vm6140_vm12, %v6080_v63, 0  ;;  %v5355_v51 = vpop.eup %5354  ;;  %vm620_vm13 = vmpackc.low %vm604_vm9, %vm604_vm9 }
 0x11b   :  { %v581_v54 = vpop.permute.xlu1 %580  ;;  %v584_v55 = vpop.permute.xlu0 %583  ;;  %v4072_v50 = vcombine.low %v634_v43, %v635_v44  ;;  %4706 = vmatpush3.bf16.msra.mxu1 %v6147_v40  ;;  %v6165_v59 = vpack.c.bf16 %v5355_v51, %v5351_v36  ;;  %v636_v9 = vsel %vm620_vm13, 65537, %v5643_v2  ;;  %v5280_v43 = vld [vmem:[%s7605_s0 + $0xa0] sm:$0xff]  }
 0x11c   :  { %vm605_vm14 = vcmp.eq.s32.totalorder %v581_v54, 1  ;;  %vm606_vm1 = vcmp.eq.s32.totalorder %v584_v55, 1  ;;  %2366 = vperm.xlu1 %5240, %v5912_v52   ;;  %2393 = vperm.xlu0 %5241, %v5955_v6  }
 0x11d   :  { %vm621_vm2 = vmpackc.low %vm605_vm14, %vm605_vm14  ;;  %vm6167_vm3 = vcmp.ne.s16.totalorder %v4072_v50, 0  ;;  %4707 = vmatprep.subr.bf16.mxu1 %v6174_v8  ;;  %v5357_v11 = vpop.eup %5356  ;;  %v5268_v50 = vld [vmem:[%s7605_s0 + $0x40] sm:$0xff]  }
 0x11e   :  { %v637_v62 = vsel %vm621_vm2, 65537, %v5643_v2  ;;  %4693 = vmatprep.mubr.msk.bf16.mxu1 %vm6167_vm3, %v6165_v59  ;;  %v678_v12 = vsel %vm6167_vm3, %v6165_v59, 0  ;;  %vm6185_vm4 = vmpackc.low %vm606_vm1, %vm606_vm1 }
 0x11f   :  { %v587_v18 = vpop.permute.xlu1 %586  ;;  %v590_v19 = vpop.permute.xlu0 %589  ;;  %v4073_v20 = vcombine.low %v636_v9, %v637_v62  ;;  %4708 = vmatpush3.bf16.msra.mxu1 %v6174_v8  ;;  %v638_v29 = vsel %vm6185_vm4, 65537, %v5643_v2  ;;  %v5278_v9 = vld [vmem:[%s7605_s0 + $0x90] sm:$0xff]  }
 0x120   :  { %v5359_v21 = vpop.eup %5358  ;;  %vm607_vm5 = vcmp.eq.s32.totalorder %v587_v18, 1  ;;  %vm608_vm7 = vcmp.eq.s32.totalorder %v590_v19, 1  ;;  %2372 = vperm.xlu1 %5240, %v5922_v56   ;;  %5242 = vset.pattern.permute.xlu0 %v5648_v24  ;;  %v6264_v18 = vld [vmem:[%s7608_s3 + $0x8] sm:$0xff]   ;;  %v5271_v19 = vld [vmem:[%s7605_s0 + $0x58] sm:$0xff]  }
 0x121   :  { %v5361_v25 = vpop.eup %5360  ;;  %vm623_vm8 = vmpackc.low %vm607_vm5, %vm607_vm5  ;;  %2802 = vperm.xlu0 %5242, %v5887_v41   ;;  %vm6192_vm9 = vcmp.ne.s16.totalorder %v4073_v20, 0  ;;  %4781 = vmatprep.subr.bf16.mxu1 %v6199_v28  ;;  %v5272_v20 = vld [vmem:[%s7605_s0 + $0x60] sm:$0xff]  }
 0x122   :  { %v639_v30 = vsel %vm623_vm8, 65537, %v5643_v2  ;;  %4694 = vmatmul.mubr.msk.bf16.gmra.mrb[24].mxu1 %vm6192_vm9, %v6157_v46  ;;  %v6209_v31 = vpack.c.bf16 %v5361_v25, %v5357_v11  ;;  %v679_v32 = vsel %vm6192_vm9, %v6157_v46, 0  ;;  %v5363_v33 = vpop.eup %5362  ;;  %vm624_vm10 = vmpackc.low %vm608_vm7, %vm608_vm7  ;;  %v5269_v11 = vld [vmem:[%s7605_s0 + $0x48] sm:$0xff]  }
 0x123   :  { %v593_v35 = vpop.permute.xlu1 %592  ;;  %v4074_v36 = vcombine.low %v638_v29, %v639_v30  ;;  %v6217_v37 = vpack.c.bf16 %v5363_v33, %v5359_v21  ;;  %v640_v44 = vsel %vm624_vm10, 65537, %v5643_v2  ;;  %v6279_v21 = vld [vmem:[%s7608_s3 + $0x10] sm:$0xff]   ;;  %v5273_v25 = vld [vmem:[%s7605_s0 + $0x68] sm:$0xff]   ;;  %v6305_v30 = vld [vmem:[%s7608_s3 + $0x20] sm:$0xff]   ;;  %v5649_v33 = vmov 6  }
 0x124   :  { %vm609_vm13 = vcmp.eq.s32.totalorder %v593_v35, 1  ;;  %2378 = vperm.xlu1 %5240, %v5932_v60   ;;  %v5274_v29 = vld [vmem:[%s7605_s0 + $0x70] sm:$0xff]   ;;  %v6316_v35 = vld [vmem:[%s7608_s3 + $0x28] sm:$0xff]  }
 0x125   :  { %vm625_vm14 = vmpackc.low %vm609_vm13, %vm609_vm13  ;;  %2811 = vperm.xlu0 %5242, %v5902_v48   ;;  %vm6220_vm1 = vcmp.ne.s16.totalorder %v4074_v36, 0  ;;  %v5275_v36 = vld [vmem:[%s7605_s0 + $0x78] sm:$0xff]  }
 0x126   :  { %v641_v51 = vsel %vm625_vm14, 65537, %v5643_v2  ;;  %4697 = vmatprep.mubr.msk.bf16.mxu1 %vm6220_vm1, %v6217_v37  ;;  %v680_v54 = vsel %vm6220_vm1, %v6217_v37, 0  ;;  %v5279_v37 = vld [vmem:[%s7605_s0 + $0x98] sm:$0xff]  }
 0x127   :  { %v4075_v55 = vcombine.low %v640_v44, %v641_v51  ;;  %v6328_v44 = vld [vmem:[%s7608_s3 + $0x30] sm:$0xff]   ;;  %v6338_v51 = vld [vmem:[%s7608_s3 + $0x38] sm:$0xff]  }
 0x128   :  { %2384 = vperm.xlu1 %5240, %v5942_v0  }
 0x129   :  { %2817 = vperm.xlu0 %5242, %v5912_v52   ;;  %vm6237_vm2 = vcmp.ne.s16.totalorder %v4075_v55, 0  ;;  %v5650_v55 = vmov 7  }
 0x12a   :  { %4698 = vmatmul.mubr.msk.bf16.gmra.mrb[28].mxu1 %vm6237_vm2, %v6209_v31  ;;  %v681_v62 = vsel %vm6237_vm2, %v6209_v31, 0  ;;  %v5277_v31 = vld [vmem:[%s7605_s0 + $0x88] sm:$0xff]  }
 0x12b   :  { %4709 = vmatprep.mubr.msk.bf16.mxu1 %vm7613_vm0, %v5268_v50  ;;  %v1002_v50 = vpop.permute.xlu1 %1001 }
 0x12c   :  { %2390 = vperm.xlu1 %5240, %v5952_v5   ;;  %vm1046_vm5 = vcmp.eq.s32.totalorder %v1002_v50, 1 }
 0x12d   :  { %2823 = vperm.xlu0 %5242, %v5922_v56   ;;  %vm1062_vm13 = vmpackc.low %vm1046_vm5, %vm1046_vm5 }
 0x12e   :  { %v1078_v50 = vsel %vm1062_vm13, 65537, %v5643_v2 }
 0x130   :  { %2396 = vperm.xlu1 %5240, %v5961_v7  }
 0x131   :  { %2829 = vperm.xlu0 %5242, %v5932_v60  }
 0x132   :  { %4710 = vmatmul.mubr.msk.bf16.vlgmr.msra.gmra.mrb[16].mxu1 %vm7613_vm0, %v5269_v11  ;;  %v1005_v11 = vpop.permute.xlu1 %1004 }
 0x133   :  { %4713 = vmatprep.mubr.msk.bf16.mxu1 %vm7613_vm0, %v5270_v14  ;;  %4782 = vmatpush3.bf16.msra.mxu1 %v6199_v28  ;;  %v999_v14 = vpop.permute.xlu0 %998  ;;  %vm1047_vm4 = vcmp.eq.s32.totalorder %v1005_v11, 1 }
 0x134   :  { %5243 = vset.pattern.permute.xlu1 %v5648_v24  ;;  %4783 = vmatprep.subr.bf16.mxu1 %v6264_v18  ;;  %v6290_v24 = vld [vmem:[%s7608_s3 + $0x18] sm:$0xff]   ;;  %vm1045_vm8 = vcmp.eq.s32.totalorder %v999_v14, 1  ;;  %vm1063_vm10 = vmpackc.low %vm1047_vm4, %vm1047_vm4 }
 0x135   :  { %2805 = vperm.xlu1 %5243, %v5895_v45   ;;  %2835 = vperm.xlu0 %5242, %v5942_v0   ;;  %v1079_v11 = vsel %vm1063_vm10, 65537, %v5643_v2 }
 0x137   :  { %4784 = vmatpush3.bf16.msra.mxu1 %v6264_v18 }
 0x138   :  { %4785 = vmatprep.subr.bf16.mxu1 %v6279_v21 }
 0x139   :  { %2808 = vperm.xlu1 %5243, %v5891_v42   ;;  %2841 = vperm.xlu0 %5242, %v5952_v5  }
 0x13a   :  { %4714 = vmatmul.mubr.msk.bf16.gmra.mrb[20].mxu1 %vm7613_vm0, %v5271_v19  ;;  %v6359_v19 = vpop.permute.xlu1 %1010 }
 0x13b   :  { %4717 = vmatprep.mubr.msk.bf16.mxu1 %vm7613_vm0, %v5272_v20  ;;  %4786 = vmatpush3.bf16.msra.mxu1 %v6279_v21  ;;  %vm1049_vm5 = vcmp.eq.s32.totalorder %v6359_v19, 1 }
 0x13c   :  { %4787 = vmatprep.subr.bf16.mxu1 %v6290_v24  ;;  %vm1065_vm13 = vmpackc.low %vm1049_vm5, %vm1049_vm5 }
 0x13d   :  { %2814 = vperm.xlu1 %5243, %v5905_v49   ;;  %2847 = vperm.xlu0 %5242, %v5961_v7  }
 0x13f   :  { %4788 = vmatpush3.bf16.msra.mxu1 %v6290_v24 }
 0x140   :  { %4789 = vmatprep.subr.bf16.mxu1 %v6305_v30 }
 0x141   :  { %2820 = vperm.xlu1 %5243, %v5915_v53   ;;  %5245 = vset.pattern.permute.xlu0 %v5649_v33 }
 0x142   :  { %3256 = vperm.xlu0 %5245, %v5895_v45   ;;  %4718 = vmatmul.mubr.msk.bf16.gmra.mrb[24].mxu1 %vm7613_vm0, %v5273_v25 }
 0x143   :  { %4721 = vmatprep.mubr.msk.bf16.mxu1 %vm7613_vm0, %v5274_v29  ;;  %4790 = vmatpush3.bf16.msra.mxu1 %v6305_v30 }
 0x144   :  { %4791 = vmatprep.subr.bf16.mxu1 %v6316_v35 }
 0x145   :  { %2826 = vperm.xlu1 %5243, %v5925_v57  }
 0x146   :  { %3265 = vperm.xlu0 %5245, %v5905_v49  }
 0x147   :  { %4792 = vmatpush3.bf16.msra.mxu1 %v6316_v35 }
 0x148   :  { %4793 = vmatprep.subr.bf16.mxu1 %v6328_v44 }
 0x149   :  { %2832 = vperm.xlu1 %5243, %v5935_v61  }
 0x14a   :  { %3271 = vperm.xlu0 %5245, %v5915_v53   ;;  %4722 = vmatmul.mubr.msk.bf16.gmra.mrb[28].mxu1 %vm7613_vm0, %v5275_v36  ;;  %vm1061_vm0 = vmpackc.low %vm1045_vm8, %vm1045_vm8 }
 0x14b   :  { %4794 = vmatpush3.bf16.msra.mxu1 %v6328_v44 }
 0x14c   :  { %4795 = vmatprep.subr.bf16.mxu1 %v6338_v51 }
 0x14d   :  { %2838 = vperm.xlu1 %5243, %v5945_v1  }
 0x14e   :  { %3277 = vperm.xlu0 %5245, %v5925_v57  }
 0x14f   :  { %4796 = vmatpush3.bf16.msra.mxu1 %v6338_v51 }
 0x150   :  { %4813 = vmatprep.subr.bf16.mxu1 %v6101_v13 }
 0x151   :  { %2844 = vperm.xlu1 %5243, %v5955_v6  }
 0x152   :  { %3283 = vperm.xlu0 %5245, %v5935_v61  }
 0x155   :  { %5244 = vset.pattern.permute.xlu1 %v5649_v33 }
 0x156   :  { %3253 = vperm.xlu1 %5244, %v5887_v41   ;;  %3289 = vperm.xlu0 %5245, %v5945_v1  }
 0x15a   :  { %3259 = vperm.xlu1 %5244, %v5891_v42   ;;  %3295 = vperm.xlu0 %5245, %v5955_v6  }
 0x15e   :  { %3262 = vperm.xlu1 %5244, %v5902_v48   ;;  %5246 = vset.pattern.permute.xlu0 %v5650_v55 }
 0x15f   :  { %3704 = vperm.xlu0 %5246, %v5887_v41   ;;  %v1008_v41 = vpop.permute.xlu0 %1007 }
 0x160   :  { %vm1048_vm7 = vcmp.eq.s32.totalorder %v1008_v41, 1 }
 0x161   :  { %vm1064_vm14 = vmpackc.low %vm1048_vm7, %vm1048_vm7 }
 0x162   :  { %3268 = vperm.xlu1 %5244, %v5912_v52  }
 0x163   :  { %3713 = vperm.xlu0 %5246, %v5902_v48   ;;  %v6364_v48 = vpop.permute.xlu1 %1016  ;;  %v6367_v20 = vpop.permute.xlu0 %1013 }
 0x164   :  { %vm1051_vm4 = vcmp.eq.s32.totalorder %v6364_v48, 1  ;;  %vm1050_vm8 = vcmp.eq.s32.totalorder %v6367_v20, 1 }
 0x165   :  { %vm1067_vm10 = vmpackc.low %vm1051_vm4, %vm1051_vm4 }
 0x166   :  { %3274 = vperm.xlu1 %5244, %v5922_v56   ;;  %vm6413_vm1 = vmpackc.low %vm1050_vm8, %vm1050_vm8 }
 0x167   :  { %3719 = vperm.xlu0 %5246, %v5912_v52   ;;  %v6371_v52 = vpop.permute.xlu1 %1022 }
 0x168   :  { %vm1053_vm15 = vcmp.eq.s32.totalorder %v6371_v52, 1 }
 0x169   :  { %vm1069_vm8 = vmpackc.low %vm1053_vm15, %vm1053_vm15 }
 0x16a   :  { %3280 = vperm.xlu1 %5244, %v5932_v60  }
 0x16b   :  { %3725 = vperm.xlu0 %5246, %v5922_v56   ;;  %v6373_v56 = vpop.permute.xlu0 %1019 }
 0x16c   :  { %vm1052_vm7 = vcmp.eq.s32.totalorder %v6373_v56, 1  ;;  %v1083_v56 = vsel %vm1067_vm10, 65537, %v5643_v2 }
 0x16e   :  { %3286 = vperm.xlu1 %5244, %v5942_v0  }
 0x16f   :  { %3731 = vperm.xlu0 %5246, %v5932_v60   ;;  %v6377_v60 = vpop.permute.xlu1 %1028 }
 0x170   :  { %vm1055_vm5 = vcmp.eq.s32.totalorder %v6377_v60, 1 }
 0x172   :  { %3292 = vperm.xlu1 %5244, %v5952_v5  }
 0x173   :  { %3737 = vperm.xlu0 %5246, %v5942_v0   ;;  %v6381_v0 = vpop.permute.xlu1 %1034 }
 0x174   :  { %vm1057_vm6 = vcmp.eq.s32.totalorder %v6381_v0, 1 }
 0x176   :  { %3298 = vperm.xlu1 %5244, %v5961_v7  }
 0x177   :  { %3743 = vperm.xlu0 %5246, %v5952_v5   ;;  %v6384_v5 = vpop.permute.xlu1 %1040 }
 0x178   :  { %vm1059_vm12 = vcmp.eq.s32.totalorder %v6384_v5, 1 }
 0x179   :  { %vm1075_vm15 = vmpackc.low %vm1059_vm12, %vm1059_vm12 }
 0x17a   :  { %5247 = vset.pattern.permute.xlu1 %v5650_v55 }
 0x17b   :  { %3707 = vperm.xlu1 %5247, %v5895_v45   ;;  %3749 = vperm.xlu0 %5246, %v5961_v7   ;;  %v6388_v25 = vpop.permute.xlu1 %1449 }
 0x17f   :  { %3710 = vperm.xlu1 %5247, %v5891_v42   ;;  %v6391_v45 = vpop.permute.xlu1 %1455 }
 0x183   :  { %3716 = vperm.xlu1 %5247, %v5905_v49  }
 0x187   :  { %3722 = vperm.xlu1 %5247, %v5915_v53  }
 0x18b   :  { %3728 = vperm.xlu1 %5247, %v5925_v57  }
 0x18f   :  { %3734 = vperm.xlu1 %5247, %v5935_v61  }
 0x193   :  { %3740 = vperm.xlu1 %5247, %v5945_v1  }
 0x197   :  { %3746 = vperm.xlu1 %5247, %v5955_v6   ;;  %v6398_v6 = vpop.permute.xlu0 %1025 }
 0x19b   :  { %v1032_v48 = vpop.permute.xlu0 %1031 }
 0x19c   :  { %vm1056_vm11 = vcmp.eq.s32.totalorder %v1032_v48, 1 }
 0x19d   :  { %vm6448_vm10 = vmpackc.low %vm1056_vm11, %vm1056_vm11 }
 0x19e   :  { %v1088_v63 = vsel %vm6448_vm10, 65537, %v5643_v2  ;;  %vm1073_vm11 = vmpackc.low %vm1057_vm6, %vm1057_vm6 }
 0x19f   :  { %v1038_v22 = vpop.permute.xlu0 %1037  ;;  %v1089_v5 = vsel %vm1073_vm11, 65537, %v5643_v2  ;;  %vm1496_vm11 = vcmp.eq.s32.totalorder %v6388_v25, 1 }
 0x205   :  { %v4711_v42 = vpop.f32.mrb[16].mxu1 }
 0x206   :  { %v959_v49 = vadd.f32 %v4711_v42, %v6008_v17  ;;  %v894_v7 = vpop.f32.mrb[17].mxu1 }
 0x207   :  { %v957_v53 = vadd.f32 %v6008_v17, %v894_v7  ;;  %v4712_v29 = vpop.f32.mrb[18].mxu1  ;;  %v1080_v7 = vsel %vm1064_vm14, 65537, %v5643_v2 }
 0x208   :  { %5364 = vtanh.f32 %v959_v49  ;;  %v960_v57 = vadd.f32 %v4712_v29, %v6008_v17  ;;  %v897_v33 = vpop.f32.mrb[19].mxu1 }
 0x209   :  { %5366 = vtanh.f32 %v957_v53  ;;  %v958_v61 = vadd.f32 %v6008_v17, %v897_v33  ;;  %v4117_v33 = vcombine.low %v1079_v11, %v1080_v7 }
 0x20a   :  { %5368 = vtanh.f32 %v960_v57  ;;  %v1077_v57 = vsel %vm1061_vm0, 65537, %v5643_v2  ;;  %vm1068_vm0 = vmpackc.low %vm1052_vm7, %vm1052_vm7  ;;  %vm1054_vm7 = vcmp.eq.s32.totalorder %v6398_v6, 1 }
 0x20b   :  { %5370 = vtanh.f32 %v958_v61  ;;  %vm1118_vm14 = vcmp.ne.s16.totalorder %v4117_v33, 0 }
 0x20d   :  { %v4715_v1 = vpop.f32.mrb[20].mxu1 }
 0x20e   :  { %v963_v36 = vadd.f32 %v4715_v1, %v6008_v17  ;;  %v910_v55 = vpop.f32.mrb[21].mxu1  ;;  %v4116_v1 = vcombine.low %v1077_v57, %v1078_v50 }
 0x20f   :  { %v961_v42 = vadd.f32 %v6008_v17, %v910_v55  ;;  %v4716_v49 = vpop.f32.mrb[22].mxu1 }
 0x210   :  { %5372 = vtanh.f32 %v963_v36  ;;  %v964_v14 = vadd.f32 %v4716_v49, %v6008_v17  ;;  %v913_v41 = vpop.f32.mrb[23].mxu1  ;;  %vm1117_vm4 = vcmp.ne.s16.totalorder %v4116_v1, 0 }
 0x211   :  { %5374 = vtanh.f32 %v961_v42  ;;  %v962_v53 = vadd.f32 %v6008_v17, %v913_v41 }
 0x212   :  { %v5365_v29 = vpop.eup %5364  ;;  %5376 = vtanh.f32 %v964_v14 }
 0x213   :  { %v5367_v61 = vpop.eup %5366  ;;  %5378 = vtanh.f32 %v962_v53  ;;  %v1081_v53 = vsel %vm1065_vm13, 65537, %v5643_v2 }
 0x214   :  { %v5369_v36 = vpop.eup %5368 }
 0x215   :  { %v5371_v55 = vpop.eup %5370  ;;  %v4719_v42 = vpop.f32.mrb[24].mxu1  ;;  %v990_v49 = vpack.c.bf16 %v5369_v36, %v5365_v29 }
 0x216   :  { %v967_v11 = vadd.f32 %v4719_v42, %v6008_v17  ;;  %v926_v19 = vpop.f32.mrb[25].mxu1  ;;  %v989_v14 = vpack.c.bf16 %v5371_v55, %v5367_v61  ;;  %v1084_v61 = vsel %vm1068_vm0, 65537, %v5643_v2 }
 0x217   :  { %v965_v20 = vadd.f32 %v6008_v17, %v926_v19  ;;  %v4720_v41 = vpop.f32.mrb[26].mxu1  ;;  %v6423_v7 = vsel %vm1118_vm14, %v990_v49, %v675_v3  ;;  %v1082_v3 = vsel %vm6413_vm1, 65537, %v5643_v2  ;;  %v4119_v1 = vcombine.low %v1083_v56, %v1084_v61  ;;  %vm1071_vm1 = vmpackc.low %vm1055_vm5, %vm1055_vm5 }
 0x218   :  { %5380 = vtanh.f32 %v967_v11  ;;  %v968_v29 = vadd.f32 %v4720_v41, %v6008_v17  ;;  %v929_v57 = vpop.f32.mrb[27].mxu1  ;;  %v6431_v33 = vsel %vm1117_vm4, %v989_v14, %v674_v38  ;;  %v4118_v38 = vcombine.low %v1081_v53, %v1082_v3  ;;  %vm6453_vm14 = vmpackc.low %vm1054_vm7, %vm1054_vm7  ;;  %v1044_v41 = vpop.permute.xlu0 %1043 }
 0x219   :  { %5382 = vtanh.f32 %v965_v20  ;;  %v966_v15 = vadd.f32 %v6008_v17, %v929_v57  ;;  %4741 = vmatprep.mubr.bf16.mxu0 %v6431_v33  ;;  %vm1120_vm13 = vcmp.ne.s16.totalorder %v4119_v1, 0  ;;  %v1087_v60 = vsel %vm1071_vm1, 65537, %v5643_v2 }
 0x21a   :  { %v5373_v58 = vpop.eup %5372  ;;  %5384 = vtanh.f32 %v968_v29  ;;  %4742 = vmatmul.mubr.bf16.vlgmr.msra.gmra.mrb[16].mxu0 %v6423_v7  ;;  %vm1119_vm0 = vcmp.ne.s16.totalorder %v4118_v38, 0  ;;  %v1085_v20 = vsel %vm1069_vm8, 65537, %v5643_v2  ;;  %v1086_v10 = vsel %vm6453_vm14, 65537, %v5643_v2 }
 0x21b   :  { %v5375_v34 = vpop.eup %5374  ;;  %5386 = vtanh.f32 %v966_v15  ;;  %4758 = vmatpush3.bf16.msra.mxu0 %v6101_v13  ;;  %v4121_v26 = vcombine.low %v1087_v60, %v1088_v63  ;;  %v4120_v61 = vcombine.low %v1085_v20, %v1086_v10  ;;  %vm1060_vm4 = vcmp.eq.s32.totalorder %v1044_v41, 1 }
 0x21c   :  { %v5377_v36 = vpop.eup %5376  ;;  %4759 = vmatprep.subr.bf16.mxu0 %v6117_v16  ;;  %vm1058_vm5 = vcmp.eq.s32.totalorder %v1038_v22, 1  ;;  %vm1076_vm7 = vmpackc.low %vm1060_vm4, %vm1060_vm4  ;;  %v1091_v3 = vsel %vm1075_vm15, 65537, %v5643_v2  ;;  %vm7648_vm14 = vcmask 523264  }
 0x21d   :  { %v5379_v52 = vpop.eup %5378  ;;  %v4723_v55 = vpop.f32.mrb[28].mxu1  ;;  %v992_v42 = vpack.c.bf16 %v5377_v36, %v5373_v58  ;;  %vm1122_vm1 = vcmp.ne.s16.totalorder %v4121_v26, 0  ;;  %vm1074_vm8 = vmpackc.low %vm1058_vm5, %vm1058_vm5  ;;  %vm1121_vm10 = vcmp.ne.s16.totalorder %v4120_v61, 0 }
 0x21e   :  { %v971_v48 = vadd.f32 %v4723_v55, %v6008_v17  ;;  %v942_v11 = vpop.f32.mrb[29].mxu1  ;;  %v991_v19 = vpack.c.bf16 %v5379_v52, %v5375_v34  ;;  %v1092_v34 = vsel %vm1076_vm7, 65537, %v5643_v2  ;;  %v1090_v46 = vsel %vm1074_vm8, 65537, %v5643_v2  ;;  %vm7649_vm2 = vmmov %vm7648_vm14 }
 0x21f   :  { %v969_v14 = vadd.f32 %v6008_v17, %v942_v11  ;;  %v4724_v50 = vpop.f32.mrb[30].mxu1  ;;  %v6463_v56 = vsel %vm1120_vm13, %v992_v42, %v677_v47  ;;  %4760 = vmatpush3.bf16.msra.mxu0 %v6117_v16  ;;  %v4122_v36 = vcombine.low %v1089_v5, %v1090_v46  ;;  %v5276_v42 = vld [vmem:[%s7605_s0 + $0x80] sm:$0xff]   ;;  %v1459_v11 = vpop.permute.xlu1 %1458  ;;  %vm1512_vm8 = vmpackc.low %vm1496_vm11, %vm1496_vm11 }
 0x220   :  { %5388 = vtanh.f32 %v971_v48  ;;  %v972_v53 = vadd.f32 %v4724_v50, %v6008_v17  ;;  %v945_v29 = vpop.f32.mrb[31].mxu1  ;;  %v6472_v57 = vsel %vm1119_vm0, %v991_v19, %v676_v23  ;;  %4761 = vmatprep.subr.bf16.mxu0 %v6147_v40  ;;  %vm7650_vm0 = vmmov %vm7649_vm2  ;;  %v5283_v48 = vld [vmem:[%s7605_s0 + $0xb8] sm:$0xff]   ;;  %v1453_v19 = vpop.permute.xlu0 %1452  ;;  %v6576_v50 = vld [vmem:[%s7609_s4] ss:$0 sm:$0xff]  ;;  %vm1499_vm7 = vcmp.eq.s32.totalorder %v1459_v11, 1 }
 0x221   :  { %5390 = vtanh.f32 %v969_v14  ;;  %v970_v39 = vadd.f32 %v6008_v17, %v945_v29  ;;  %4745 = vmatprep.mubr.bf16.mxu0 %v6472_v57  ;;  %vm1123_vm9 = vcmp.ne.s16.totalorder %v4122_v36, 0  ;;  %vm7651_vm12 = vmmov %vm7650_vm0 }
 0x222   :  { %v5381_v47 = vpop.eup %5380  ;;  %5392 = vtanh.f32 %v972_v53  ;;  %4746 = vmatmul.mubr.bf16.gmra.mrb[20].mxu0 %v6463_v56  ;;  %vm7652_vm6 = vmmov %vm7650_vm0 }
 0x223   :  { %v5383_v23 = vpop.eup %5382  ;;  %5394 = vtanh.f32 %v970_v39  ;;  %4762 = vmatpush3.bf16.msra.mxu0 %v6147_v40  ;;  %vm7653_vm4 = vmmov %vm7650_vm0  ;;  %v1465_v6 = vpop.permute.xlu1 %1464 }
 0x224   :  { %v5385_v17 = vpop.eup %5384  ;;  %4763 = vmatprep.subr.bf16.mxu0 %v6174_v8  ;;  %vm7654_vm5 = vmmov %vm7650_vm0  ;;  %v1462_v60 = vpop.permute.xlu0 %1461 }
 0x225   :  { %v5387_v15 = vpop.eup %5386  ;;  %v994_v0 = vpack.c.bf16 %v5385_v17, %v5381_v47  ;;  %vm7655_vm15 = vmmov %vm7650_vm0 }
 0x226   :  { %v993_v58 = vpack.c.bf16 %v5387_v15, %v5383_v23 }
 0x227   :  { %v6496_v1 = vsel %vm1122_vm1, %v994_v0, %v679_v32  ;;  %4764 = vmatpush3.bf16.msra.mxu0 %v6174_v8  ;;  %v4123_v32 = vcombine.low %v1091_v3, %v1092_v34  ;;  %v1471_v63 = vpop.permute.xlu1 %1470  ;;  %vm1497_vm1 = vcmp.eq.s32.totalorder %v1453_v19, 1  ;;  %v1528_v3 = vsel %vm1512_vm8, 65537, %v5643_v2 }
 0x228   :  { %v6504_v22 = vsel %vm1121_vm10, %v993_v58, %v678_v12  ;;  %4837 = vmatprep.subr.bf16.mxu0 %v6199_v28  ;;  %v1468_v26 = vpop.permute.xlu0 %1467  ;;  %vm1498_vm10 = vcmp.eq.s32.totalorder %v6391_v45, 1 }
 0x229   :  { %4749 = vmatprep.mubr.bf16.mxu0 %v6504_v22  ;;  %vm1124_vm3 = vcmp.ne.s16.totalorder %v4123_v32, 0  ;;  %vm1514_vm13 = vmpackc.low %vm1498_vm10, %vm1498_vm10 }
 0x22a   :  { %v5389_v27 = vpop.eup %5388  ;;  %4750 = vmatmul.mubr.bf16.gmra.mrb[24].mxu0 %v6496_v1  ;;  %v1530_v36 = vsel %vm1514_vm13, 65537, %v5643_v2 }
 0x22b   :  { %v5391_v38 = vpop.eup %5390  ;;  %v6588_v17 = vpop.permute.xlu1 %1476 }
 0x22c   :  { %v5393_v52 = vpop.eup %5392  ;;  %v6594_v45 = vpop.permute.xlu0 %1473 }
 0x22d   :  { %v5395_v4 = vpop.eup %5394  ;;  %v996_v55 = vpack.c.bf16 %v5393_v52, %v5389_v27  ;;  %vm1504_vm10 = vcmp.eq.s32.totalorder %v6594_v45, 1 }
 0x22e   :  { %v995_v59 = vpack.c.bf16 %v5395_v4, %v5391_v38 }
 0x22f   :  { %v6515_v12 = vsel %vm1124_vm3, %v996_v55, %v681_v62  ;;  %v5282_v62 = vld [vmem:[%s7605_s0 + $0xb0] sm:$0xff]   ;;  %vm1515_vm3 = vmpackc.low %vm1499_vm7, %vm1499_vm7 }
 0x230   :  { %v6524_v49 = vsel %vm1123_vm9, %v995_v59, %v680_v54  ;;  %v5281_v54 = vld [vmem:[%s7605_s0 + $0xa8] sm:$0xff]   ;;  %vm6584_vm9 = vmpackc.low %vm1497_vm1, %vm1497_vm1  ;;  %v1531_v5 = vsel %vm1515_vm3, 65537, %v5643_v2  ;;  %vm1505_vm1 = vcmp.eq.s32.totalorder %v6588_v17, 1 }
 0x231   :  { %4753 = vmatprep.mubr.bf16.mxu0 %v6524_v49  ;;  %v1529_v38 = vsel %vm6584_vm9, 65537, %v5643_v2  ;;  %v4157_v55 = vcombine.low %v1530_v36, %v1531_v5  ;;  %vm1521_vm9 = vmpackc.low %vm1505_vm1, %vm1505_vm1 }
 0x232   :  { %4754 = vmatmul.mubr.bf16.gmra.mrb[28].mxu0 %v6515_v12  ;;  %v4156_v4 = vcombine.low %v1528_v3, %v1529_v38  ;;  %v1537_v36 = vsel %vm1521_vm9, 65537, %v5643_v2 }
 0x233   :  { %4765 = vmatprep.mubr.msk.bf16.mxu0 %vm7648_vm14, %v5276_v42  ;;  %vm1501_vm14 = vcmp.eq.s32.totalorder %v1465_v6, 1  ;;  %v1483_v42 = vpop.permute.xlu1 %1482  ;;  %vm1569_vm11 = vcmp.ne.s16.totalorder %v4157_v55, 0 }
 0x234   :  { %vm1568_vm7 = vcmp.ne.s16.totalorder %v4156_v4, 0  ;;  %vm1507_vm8 = vcmp.eq.s32.totalorder %v1483_v42, 1 }
 0x235   :  { %vm6637_vm13 = vmpackc.low %vm1507_vm8, %vm1507_vm8 }
 0x23a   :  { %4766 = vmatmul.mubr.msk.bf16.vlgmr.msra.gmra.mrb[16].mxu0 %vm7649_vm2, %v5277_v31  ;;  %vm1503_vm2 = vcmp.eq.s32.totalorder %v1471_v63, 1 }
 0x23b   :  { %4769 = vmatprep.mubr.msk.bf16.mxu0 %vm7650_vm0, %v5278_v9  ;;  %4838 = vmatpush3.bf16.msra.mxu0 %v6199_v28  ;;  %vm1500_vm0 = vcmp.eq.s32.totalorder %v1462_v60, 1 }
 0x23c   :  { %4839 = vmatprep.subr.bf16.mxu0 %v6264_v18 }
 0x23f   :  { %4840 = vmatpush3.bf16.msra.mxu0 %v6264_v18 }
 0x240   :  { %4841 = vmatprep.subr.bf16.mxu0 %v6279_v21 }
 0x242   :  { %4770 = vmatmul.mubr.msk.bf16.gmra.mrb[20].mxu0 %vm7651_vm12, %v5279_v37  ;;  %vm1502_vm12 = vcmp.eq.s32.totalorder %v1468_v26, 1 }
 0x243   :  { %4773 = vmatprep.mubr.msk.bf16.mxu0 %vm7652_vm6, %v5280_v43  ;;  %4842 = vmatpush3.bf16.msra.mxu0 %v6279_v21  ;;  %vm1517_vm6 = vmpackc.low %vm1501_vm14, %vm1501_vm14 }
 0x244   :  { %4843 = vmatprep.subr.bf16.mxu0 %v6290_v24  ;;  %v1533_v6 = vsel %vm1517_vm6, 65537, %v5643_v2  ;;  %vm6642_vm14 = vmpackc.low %vm1504_vm10, %vm1504_vm10 }
 0x247   :  { %4844 = vmatpush3.bf16.msra.mxu0 %v6290_v24 }
 0x248   :  { %4845 = vmatprep.subr.bf16.mxu0 %v6305_v30 }
 0x24a   :  { %4774 = vmatmul.mubr.msk.bf16.gmra.mrb[24].mxu0 %vm7653_vm4, %v5281_v54  ;;  %vm1519_vm4 = vmpackc.low %vm1503_vm2, %vm1503_vm2  ;;  %v1480_v54 = vpop.permute.xlu0 %1479 }
 0x24b   :  { %4777 = vmatprep.mubr.msk.bf16.mxu0 %vm7654_vm5, %v5282_v62  ;;  %4846 = vmatpush3.bf16.msra.mxu0 %v6305_v30  ;;  %vm6602_vm5 = vmpackc.low %vm1500_vm0, %vm1500_vm0  ;;  %vm1506_vm3 = vcmp.eq.s32.totalorder %v1480_v54, 1 }
 0x24c   :  { %4847 = vmatprep.subr.bf16.mxu0 %v6316_v35 }
 0x24f   :  { %4848 = vmatpush3.bf16.msra.mxu0 %v6316_v35 }
 0x250   :  { %4849 = vmatprep.subr.bf16.mxu0 %v6328_v44 }
 0x252   :  { %4778 = vmatmul.mubr.msk.bf16.gmra.mrb[28].mxu0 %vm7655_vm15, %v5283_v48  ;;  %vm6607_vm15 = vmpackc.low %vm1502_vm12, %vm1502_vm12 }
 0x253   :  { %4850 = vmatpush3.bf16.msra.mxu0 %v6328_v44  ;;  %v1534_v26 = vsel %vm6607_vm15, 65537, %v5643_v2  ;;  %vm6652_vm12 = vmpackc.low %vm1506_vm3, %vm1506_vm3 }
 0x254   :  { %4851 = vmatprep.subr.bf16.mxu0 %v6338_v51  ;;  %v1538_v54 = vsel %vm6652_vm12, 65537, %v5643_v2 }
 0x257   :  { %4852 = vmatpush3.bf16.msra.mxu0 %v6338_v51 }
 0x258   :  { %4869 = vmatprep.subr.bf16.mxu0 %v6101_v13 }
 0x30d   :  { %v4767_v14 = vpop.f32.mrb[16].mxu0 }
 0x30e   :  { %v1410_v20 = vadd.f32 %v6576_v50, %v4767_v14  ;;  %v1345_v41 = vpop.f32.mrb[17].mxu0 }
 0x30f   :  { %v1408_v53 = vadd.f32 %v6576_v50, %v1345_v41  ;;  %v4768_v29 = vpop.f32.mrb[18].mxu0 }
 0x310   :  { %5396 = vtanh.f32 %v1410_v20  ;;  %v1411_v39 = vadd.f32 %v6576_v50, %v4768_v29  ;;  %v1348_v47 = vpop.f32.mrb[19].mxu0  ;;  %v1535_v20 = vsel %vm1519_vm4, 65537, %v5643_v2 }
 0x311   :  { %5398 = vtanh.f32 %v1408_v53  ;;  %v1409_v10 = vadd.f32 %v6576_v50, %v1348_v47 }
 0x312   :  { %5400 = vtanh.f32 %v1411_v39 }
 0x313   :  { %5402 = vtanh.f32 %v1409_v10  ;;  %v1532_v10 = vsel %vm6602_vm5, 65537, %v5643_v2 }
 0x314   :  { %v4158_v61 = vcombine.low %v1532_v10, %v1533_v6 }
 0x315   :  { %v4771_v23 = vpop.f32.mrb[20].mxu0 }
 0x316   :  { %v1414_v25 = vadd.f32 %v6576_v50, %v4771_v23  ;;  %v1361_v15 = vpop.f32.mrb[21].mxu0  ;;  %vm1570_vm2 = vcmp.ne.s16.totalorder %v4158_v61, 0 }
 0x317   :  { %v1412_v0 = vadd.f32 %v6576_v50, %v1361_v15  ;;  %v4772_v58 = vpop.f32.mrb[22].mxu0  ;;  %v1486_v15 = vpop.permute.xlu0 %1485 }
 0x318   :  { %5404 = vtanh.f32 %v1414_v25  ;;  %v1415_v34 = vadd.f32 %v6576_v50, %v4772_v58  ;;  %v1364_v27 = vpop.f32.mrb[23].mxu0  ;;  %v4159_v25 = vcombine.low %v1534_v26, %v1535_v20  ;;  %vm1508_vm5 = vcmp.eq.s32.totalorder %v1486_v15, 1  ;;  %v5286_v15 = vld [vmem:[%s7605_s0 + $0xd0] sm:$0xff]  }
 0x319   :  { %5406 = vtanh.f32 %v1412_v0  ;;  %v1413_v46 = vadd.f32 %v6576_v50, %v1364_v27  ;;  %vm1524_vm1 = vmpackc.low %vm1508_vm5, %vm1508_vm5 }
 0x31a   :  { %v5397_v32 = vpop.eup %5396  ;;  %5408 = vtanh.f32 %v1415_v34  ;;  %vm6646_vm0 = vcmp.ne.s16.totalorder %v4159_v25, 0 }
 0x31b   :  { %v5399_v52 = vpop.eup %5398  ;;  %5410 = vtanh.f32 %v1413_v46 }
 0x31c   :  { %v5401_v59 = vpop.eup %5400 }
 0x31d   :  { %v5403_v31 = vpop.eup %5402  ;;  %v4775_v9 = vpop.f32.mrb[24].mxu0  ;;  %v1441_v37 = vpack.c.bf16 %v5401_v59, %v5397_v32 }
 0x31e   :  { %v1418_v62 = vadd.f32 %v6576_v50, %v4775_v9  ;;  %v1377_v48 = vpop.f32.mrb[25].mxu0  ;;  %v1440_v11 = vpack.c.bf16 %v5403_v31, %v5399_v52 }
 0x31f   :  { %v1416_v60 = vadd.f32 %v6576_v50, %v1377_v48  ;;  %v4776_v14 = vpop.f32.mrb[26].mxu0  ;;  %v6621_v39 = vsel %vm1569_vm11, %v1441_v37, %v6423_v7  ;;  %v1492_v37 = vpop.permute.xlu0 %1491 }
 0x320   :  { %5412 = vtanh.f32 %v1418_v62  ;;  %v1419_v41 = vadd.f32 %v6576_v50, %v4776_v14  ;;  %v1380_v53 = vpop.f32.mrb[27].mxu0  ;;  %v6616_v29 = vsel %vm1568_vm7, %v1440_v11, %v6431_v33  ;;  %v1489_v33 = vpop.permute.xlu1 %1488  ;;  %vm1510_vm15 = vcmp.eq.s32.totalorder %v1492_v37, 1 }
 0x321   :  { %5414 = vtanh.f32 %v1416_v60  ;;  %v1417_v63 = vadd.f32 %v6576_v50, %v1380_v53  ;;  %4797 = vmatprep.mubr.bf16.mxu1 %v6616_v29  ;;  %vm1509_vm6 = vcmp.eq.s32.totalorder %v1489_v33, 1  ;;  %vm1526_vm10 = vmpackc.low %vm1510_vm15, %vm1510_vm15  ;;  %v1540_v53 = vsel %vm1524_vm1, 65537, %v5643_v2 }
 0x322   :  { %v5405_v47 = vpop.eup %5404  ;;  %5416 = vtanh.f32 %v1419_v41  ;;  %4798 = vmatmul.mubr.bf16.vlgmr.msra.gmra.mrb[32].mxu1 %v6621_v39  ;;  %vm1525_vm11 = vmpackc.low %vm1509_vm6, %vm1509_vm6 }
 0x323   :  { %v5407_v23 = vpop.eup %5406  ;;  %5418 = vtanh.f32 %v1417_v63  ;;  %4814 = vmatpush3.bf16.msra.mxu1 %v6101_v13  ;;  %v1541_v60 = vsel %vm1525_vm11, 65537, %v5643_v2  ;;  %v1542_v63 = vsel %vm1526_vm10, 65537, %v5643_v2 }
 0x324   :  { %v5409_v7 = vpop.eup %5408  ;;  %4815 = vmatprep.subr.bf16.mxu1 %v6117_v16  ;;  %v1495_v52 = vpop.permute.xlu1 %1494 }
 0x325   :  { %v5411_v0 = vpop.eup %5410  ;;  %v4779_v58 = vpop.f32.mrb[28].mxu0  ;;  %v1443_v3 = vpack.c.bf16 %v5409_v7, %v5405_v47  ;;  %vm1511_vm4 = vcmp.eq.s32.totalorder %v1495_v52, 1  ;;  %v4162_v47 = vcombine.low %v1540_v53, %v1541_v60  ;;  %v5285_v7 = vld [vmem:[%s7605_s0 + $0xc8] sm:$0xff]  }
 0x326   :  { %v1422_v13 = vadd.f32 %v6576_v50, %v4779_v58  ;;  %v1393_v34 = vpop.f32.mrb[29].mxu0  ;;  %v1442_v27 = vpack.c.bf16 %v5411_v0, %v5407_v23  ;;  %vm1527_vm7 = vmpackc.low %vm1511_vm4, %vm1511_vm4  ;;  %v5290_v0 = vld [vmem:[%s7605_s0 + $0xf0] sm:$0xff]  }
 0x327   :  { %v1420_v17 = vadd.f32 %v6576_v50, %v1393_v34  ;;  %v4780_v32 = vpop.f32.mrb[30].mxu0  ;;  %4816 = vmatpush3.bf16.msra.mxu1 %v6117_v16  ;;  %v1539_v16 = vsel %vm6637_vm13, 65537, %v5643_v2  ;;  %v6670_v31 = vsel %vm6646_vm0, %v1443_v3, %v6463_v56  ;;  %v1543_v14 = vsel %vm1527_vm7, 65537, %v5643_v2 }
 0x328   :  { %5420 = vtanh.f32 %v1422_v13  ;;  %v1423_v4 = vadd.f32 %v6576_v50, %v4780_v32  ;;  %v1396_v55 = vpop.f32.mrb[31].mxu0  ;;  %v6659_v59 = vsel %vm1570_vm2, %v1442_v27, %v6472_v57  ;;  %4817 = vmatprep.subr.bf16.mxu1 %v6147_v40  ;;  %v1536_v57 = vsel %vm6642_vm14, 65537, %v5643_v2 }
 0x329   :  { %5422 = vtanh.f32 %v1420_v17  ;;  %v1421_v42 = vadd.f32 %v6576_v50, %v1396_v55  ;;  %4801 = vmatprep.mubr.bf16.mxu1 %v6659_v59  ;;  %v4160_v62 = vcombine.low %v1536_v57, %v1537_v36  ;;  %v4161_v48 = vcombine.low %v1538_v54, %v1539_v16 }
 0x32a   :  { %v5413_v9 = vpop.eup %5412  ;;  %5424 = vtanh.f32 %v1423_v4  ;;  %4802 = vmatmul.mubr.bf16.gmra.mrb[36].mxu1 %v6670_v31  ;;  %v4163_v10 = vcombine.low %v1542_v63, %v1543_v14  ;;  %vm1574_vm9 = vcmp.ne.s16.totalorder %v4162_v47, 0  ;;  %vm7670_vm14 = vcmask 523264  }
 0x32b   :  { %v5415_v43 = vpop.eup %5414  ;;  %5426 = vtanh.f32 %v1421_v42  ;;  %4818 = vmatpush3.bf16.msra.mxu1 %v6147_v40  ;;  %vm1572_vm8 = vcmp.ne.s16.totalorder %v4160_v62, 0  ;;  %vm1573_vm3 = vcmp.ne.s16.totalorder %v4161_v48, 0  ;;  %vm7671_vm2 = vmmov %vm7670_vm14 }
 0x32c   :  { %v5417_v56 = vpop.eup %5416  ;;  %4819 = vmatprep.subr.bf16.mxu1 %v6174_v8  ;;  %vm1575_vm13 = vcmp.ne.s16.totalorder %v4163_v10, 0  ;;  %vm7672_vm0 = vmmov %vm7671_vm2 }
 0x32d   :  { %v5419_v11 = vpop.eup %5418  ;;  %v1445_v19 = vpack.c.bf16 %v5417_v56, %v5413_v9  ;;  %vm7673_vm12 = vmmov %vm7672_vm0 }
 0x32e   :  { %v1444_v6 = vpack.c.bf16 %v5419_v11, %v5415_v43  ;;  %vm7674_vm6 = vmmov %vm7672_vm0 }
 0x32f   :  { %4820 = vmatpush3.bf16.msra.mxu1 %v6174_v8  ;;  %v6690_v20 = vsel %vm1573_vm3, %v1445_v19, %v6496_v1  ;;  %v5284_v1 = vld [vmem:[%s7605_s0 + $0xc0] sm:$0xff]   ;;  %vm7675_vm4 = vmmov %vm7672_vm0 }
 0x330   :  { %v6684_v40 = vsel %vm1572_vm8, %v1444_v6, %v6504_v22  ;;  %4893 = vmatprep.subr.bf16.mxu1 %v6199_v28  ;;  %vm7676_vm5 = vmmov %vm7672_vm0 }
 0x331   :  { %4805 = vmatprep.mubr.bf16.mxu1 %v6684_v40  ;;  %vm7677_vm15 = vmmov %vm7672_vm0 }
 0x332   :  { %v5421_v41 = vpop.eup %5420  ;;  %4806 = vmatmul.mubr.bf16.gmra.mrb[40].mxu1 %v6690_v20 }
 0x333   :  { %v5423_v8 = vpop.eup %5422 }
 0x334   :  { %v5425_v22 = vpop.eup %5424 }
 0x335   :  { %v5427_v26 = vpop.eup %5426  ;;  %v1447_v33 = vpack.c.bf16 %v5425_v22, %v5421_v41 }
 0x336   :  { %v1446_v23 = vpack.c.bf16 %v5427_v26, %v5423_v8 }
 0x337   :  { %v6703_v25 = vsel %vm1575_vm13, %v1447_v33, %v6515_v12  ;;  %v5287_v12 = vld [vmem:[%s7605_s0 + $0xd8] sm:$0xff]  }
 0x338   :  { %v6699_v61 = vsel %vm1574_vm9, %v1446_v23, %v6524_v49  ;;  %v5288_v49 = vld [vmem:[%s7605_s0 + $0xe0] sm:$0xff]  }
 0x339   :  { %4809 = vmatprep.mubr.bf16.mxu1 %v6699_v61 }
 0x33a   :  { %4810 = vmatmul.mubr.bf16.gmra.mrb[44].mxu1 %v6703_v25 }
 0x33b   :  { %4821 = vmatprep.mubr.msk.bf16.mxu1 %vm7670_vm14, %v5284_v1 }
 0x342   :  { %4822 = vmatmul.mubr.msk.bf16.vlgmr.msra.gmra.mrb[32].mxu1 %vm7671_vm2, %v5285_v7 }
 0x343   :  { %4825 = vmatprep.mubr.msk.bf16.mxu1 %vm7672_vm0, %v5286_v15  ;;  %4894 = vmatpush3.bf16.msra.mxu1 %v6199_v28  ;;  %v5289_v28 = vld [vmem:[%s7605_s0 + $0xe8] sm:$0xff]  }
 0x344   :  { %4895 = vmatprep.subr.bf16.mxu1 %v6264_v18 }
 0x347   :  { %4896 = vmatpush3.bf16.msra.mxu1 %v6264_v18  ;;  %v5291_v18 = vld [vmem:[%s7605_s0 + $0xf8] sm:$0xff]  }
 0x348   :  { %4897 = vmatprep.subr.bf16.mxu1 %v6279_v21 }
 0x34a   :  { %4826 = vmatmul.mubr.msk.bf16.gmra.mrb[36].mxu1 %vm7673_vm12, %v5287_v12 }
 0x34b   :  { %4829 = vmatprep.mubr.msk.bf16.mxu1 %vm7674_vm6, %v5288_v49  ;;  %4898 = vmatpush3.bf16.msra.mxu1 %v6279_v21  ;;  %v6753_v21 = vld [vmem:[%s7607_s2] sm:$0xff]  }
 0x34c   :  { %4899 = vmatprep.subr.bf16.mxu1 %v6290_v24 }
 0x34f   :  { %4900 = vmatpush3.bf16.msra.mxu1 %v6290_v24  ;;  %v1904_v24 = vpop.permute.xlu1 %1903 }
 0x350   :  { %4901 = vmatprep.subr.bf16.mxu1 %v6305_v30  ;;  %vm1948_vm11 = vcmp.eq.s32.totalorder %v1904_v24, 1 }
 0x351   :  { %vm1964_vm10 = vmpackc.low %vm1948_vm11, %vm1948_vm11 }
 0x352   :  { %4830 = vmatmul.mubr.msk.bf16.gmra.mrb[40].mxu1 %vm7675_vm4, %v5289_v28  ;;  %v1980_v57 = vsel %vm1964_vm10, 65537, %v5643_v2 }
 0x353   :  { %4833 = vmatprep.mubr.msk.bf16.mxu1 %vm7676_vm5, %v5290_v0  ;;  %4902 = vmatpush3.bf16.msra.mxu1 %v6305_v30  ;;  %v1901_v30 = vpop.permute.xlu0 %1900 }
 0x354   :  { %4903 = vmatprep.subr.bf16.mxu1 %v6316_v35  ;;  %vm1947_vm1 = vcmp.eq.s32.totalorder %v1901_v30, 1 }
 0x355   :  { %vm6760_vm9 = vmpackc.low %vm1947_vm1, %vm1947_vm1 }
 0x356   :  { %v1979_v11 = vsel %vm6760_vm9, 65537, %v5643_v2 }
 0x357   :  { %4904 = vmatpush3.bf16.msra.mxu1 %v6316_v35  ;;  %v1907_v35 = vpop.permute.xlu1 %1906  ;;  %v1910_v58 = vpop.permute.xlu0 %1909  ;;  %v4196_v60 = vcombine.low %v1979_v11, %v1980_v57 }
 0x358   :  { %4905 = vmatprep.subr.bf16.mxu1 %v6328_v44  ;;  %vm1949_vm7 = vcmp.eq.s32.totalorder %v1907_v35, 1  ;;  %vm1950_vm8 = vcmp.eq.s32.totalorder %v1910_v58, 1 }
 0x359   :  { %vm1965_vm3 = vmpackc.low %vm1949_vm7, %vm1949_vm7 }
 0x35a   :  { %4834 = vmatmul.mubr.msk.bf16.gmra.mrb[44].mxu1 %vm7677_vm15, %v5291_v18  ;;  %vm1966_vm13 = vmpackc.low %vm1950_vm8, %vm1950_vm8  ;;  %v1981_v37 = vsel %vm1965_vm3, 65537, %v5643_v2  ;;  %vm2019_vm15 = vcmp.ne.s16.totalorder %v4196_v60, 0 }
 0x35b   :  { %4906 = vmatpush3.bf16.msra.mxu1 %v6328_v44  ;;  %v1913_v3 = vpop.permute.xlu1 %1912  ;;  %v1916_v5 = vpop.permute.xlu0 %1915  ;;  %v1982_v19 = vsel %vm1966_vm13, 65537, %v5643_v2 }
 0x35c   :  { %4907 = vmatprep.subr.bf16.mxu1 %v6338_v51  ;;  %vm1951_vm14 = vcmp.eq.s32.totalorder %v1913_v3, 1  ;;  %vm1952_vm0 = vcmp.eq.s32.totalorder %v1916_v5, 1  ;;  %v4197_v14 = vcombine.low %v1981_v37, %v1982_v19 }
 0x35d   :  { %vm1967_vm6 = vmpackc.low %vm1951_vm14, %vm1951_vm14 }
 0x35e   :  { %vm6778_vm5 = vmpackc.low %vm1952_vm0, %vm1952_vm0  ;;  %vm2020_vm7 = vcmp.ne.s16.totalorder %v4197_v14, 0  ;;  %v1983_v7 = vsel %vm1967_vm6, 65537, %v5643_v2 }
 0x35f   :  { %4908 = vmatpush3.bf16.msra.mxu1 %v6338_v51  ;;  %v1919_v45 = vpop.permute.xlu1 %1918  ;;  %v1922_v38 = vpop.permute.xlu0 %1921  ;;  %v1984_v58 = vsel %vm6778_vm5, 65537, %v5643_v2 }
 0x360   :  { %4925 = vmatprep.subr.bf16.mxu1 %v6753_v21  ;;  %vm1953_vm2 = vcmp.eq.s32.totalorder %v1919_v45, 1  ;;  %vm1954_vm12 = vcmp.eq.s32.totalorder %v1922_v38, 1 }
 0x361   :  { %vm1969_vm4 = vmpackc.low %vm1953_vm2, %vm1953_vm2 }
 0x362   :  { %vm6783_vm11 = vmpackc.low %vm1954_vm12, %vm1954_vm12  ;;  %v1985_v49 = vsel %vm1969_vm4, 65537, %v5643_v2 }
 0x363   :  { %v6764_v4 = vpop.permute.xlu1 %1924  ;;  %v6770_v43 = vpop.permute.xlu0 %1927  ;;  %v1986_v3 = vsel %vm6783_vm11, 65537, %v5643_v2 }
 0x364   :  { %vm1955_vm1 = vcmp.eq.s32.totalorder %v6764_v4, 1  ;;  %vm1956_vm10 = vcmp.eq.s32.totalorder %v6770_v43, 1 }
 0x365   :  { %vm1971_vm9 = vmpackc.low %vm1955_vm1, %vm1955_vm1 }
 0x366   :  { %vm6823_vm14 = vmpackc.low %vm1956_vm10, %vm1956_vm10 }
 0x367   :  { %v1931_v53 = vpop.permute.xlu1 %1930  ;;  %v1934_v10 = vpop.permute.xlu0 %1933  ;;  %v1988_v19 = vsel %vm6823_vm14, 65537, %v5643_v2  ;;  %vm7692_vm14 = vcmask 523264  }
 0x368   :  { %vm1957_vm8 = vcmp.eq.s32.totalorder %v1931_v53, 1  ;;  %vm1958_vm3 = vcmp.eq.s32.totalorder %v1934_v10, 1 }
 0x369   :  { %vm6818_vm13 = vmpackc.low %vm1957_vm8, %vm1957_vm8 }
 0x36a   :  { %vm6833_vm12 = vmpackc.low %vm1958_vm3, %vm1958_vm3 }
 0x36b   :  { %v1990_v14 = vsel %vm6833_vm12, 65537, %v5643_v2 }
 0x415   :  { %v4823_v13 = vpop.f32.mrb[32].mxu1 }
 0x416   :  { %v1861_v44 = vadd.f32 %v6576_v50, %v4823_v13  ;;  %v1796_v34 = vpop.f32.mrb[33].mxu1  ;;  %v4198_v13 = vcombine.low %v1983_v7, %v1984_v58 }
 0x417   :  { %v1859_v27 = vadd.f32 %v6576_v50, %v1796_v34  ;;  %v4824_v51 = vpop.f32.mrb[34].mxu1  ;;  %v1940_v34 = vpop.permute.xlu0 %1939 }
 0x418   :  { %5428 = vtanh.f32 %v1861_v44  ;;  %v1862_v46 = vadd.f32 %v6576_v50, %v4824_v51  ;;  %v1799_v17 = vpop.f32.mrb[35].mxu1  ;;  %v4199_v44 = vcombine.low %v1985_v49, %v1986_v3  ;;  %vm2021_vm2 = vcmp.ne.s16.totalorder %v4198_v13, 0  ;;  %v5294_v13 = vld [vmem:[%s7605_s0 + $0x110] sm:$0xff]  }
 0x419   :  { %5430 = vtanh.f32 %v1859_v27  ;;  %v1860_v32 = vadd.f32 %v6576_v50, %v1799_v17  ;;  %v6812_v27 = vld [vmem:[%s7607_s2 + $0x8] sm:$0xff]   ;;  %vm1960_vm5 = vcmp.eq.s32.totalorder %v1940_v34, 1  ;;  %v6939_v34 = vld [vmem:[%s7608_s3 + $0x18] sm:$0xff]  }
 0x41a   :  { %5432 = vtanh.f32 %v1862_v46  ;;  %vm6827_vm0 = vcmp.ne.s16.totalorder %v4199_v44, 0  ;;  %vm1976_vm1 = vmpackc.low %vm1960_vm5, %vm1960_vm5  ;;  %v5296_v44 = vld [vmem:[%s7605_s0 + $0x120] sm:$0xff]   ;;  %v6961_v17 = vld [vmem:[%s7608_s3 + $0x28] sm:$0xff]  }
 0x41b   :  { %5434 = vtanh.f32 %v1860_v32 }
 0x41d   :  { %v4827_v36 = vpop.f32.mrb[36].mxu1 }
 0x41e   :  { %v1865_v55 = vadd.f32 %v6576_v50, %v4827_v36  ;;  %v1812_v16 = vpop.f32.mrb[37].mxu1 }
 0x41f   :  { %v1863_v42 = vadd.f32 %v6576_v50, %v1812_v16  ;;  %v4828_v9 = vpop.f32.mrb[38].mxu1 }
 0x420   :  { %5436 = vtanh.f32 %v1865_v55  ;;  %v1866_v54 = vadd.f32 %v6576_v50, %v4828_v9  ;;  %v1815_v62 = vpop.f32.mrb[39].mxu1  ;;  %v1987_v9 = vsel %vm1971_vm9, 65537, %v5643_v2 }
 0x421   :  { %5438 = vtanh.f32 %v1863_v42  ;;  %v1864_v56 = vadd.f32 %v6576_v50, %v1815_v62  ;;  %v6845_v62 = vld [vmem:[%s7607_s2 + $0x10] sm:$0xff]  }
 0x422   :  { %v5429_v48 = vpop.eup %5428  ;;  %5440 = vtanh.f32 %v1866_v54 }
 0x423   :  { %v5431_v6 = vpop.eup %5430  ;;  %5442 = vtanh.f32 %v1864_v56  ;;  %v1989_v56 = vsel %vm6818_vm13, 65537, %v5643_v2 }
 0x424   :  { %v5433_v41 = vpop.eup %5432  ;;  %v4201_v53 = vcombine.low %v1989_v56, %v1990_v14 }
 0x425   :  { %v5435_v8 = vpop.eup %5434  ;;  %v4831_v63 = vpop.f32.mrb[40].mxu1  ;;  %v1892_v47 = vpack.c.bf16 %v5433_v41, %v5429_v48  ;;  %v4200_v41 = vcombine.low %v1987_v9, %v1988_v19 }
 0x426   :  { %v1869_v26 = vadd.f32 %v6576_v50, %v4831_v63  ;;  %v1828_v33 = vpop.f32.mrb[41].mxu1  ;;  %v1891_v23 = vpack.c.bf16 %v5435_v8, %v5431_v6  ;;  %v1946_v6 = vpop.permute.xlu0 %1945  ;;  %v6869_v8 = vld [vmem:[%s7607_s2 + $0x18] sm:$0xff]   ;;  %vm2024_vm3 = vcmp.ne.s16.totalorder %v4201_v53, 0 }
 0x427   :  { %v1867_v15 = vadd.f32 %v6576_v50, %v1828_v33  ;;  %v4832_v12 = vpop.f32.mrb[42].mxu1  ;;  %v6797_v30 = vsel %vm2020_vm7, %v1892_v47, %v6621_v39  ;;  %vm2023_vm8 = vcmp.ne.s16.totalorder %v4200_v41, 0  ;;  %v6882_v33 = vld [vmem:[%s7608_s3] sm:$0xff]  }
 0x428   :  { %5444 = vtanh.f32 %v1869_v26  ;;  %v1870_v28 = vadd.f32 %v6576_v50, %v4832_v12  ;;  %v1831_v0 = vpop.f32.mrb[43].mxu1  ;;  %v6792_v18 = vsel %vm2019_vm15, %v1891_v23, %v6616_v29  ;;  %v1937_v29 = vpop.permute.xlu1 %1936  ;;  %vm1962_vm15 = vcmp.eq.s32.totalorder %v1946_v6, 1 }
 0x429   :  { %5446 = vtanh.f32 %v1867_v15  ;;  %v1868_v24 = vadd.f32 %v6576_v50, %v1831_v0  ;;  %4853 = vmatprep.mubr.bf16.mxu0 %v6792_v18  ;;  %vm1959_vm6 = vcmp.eq.s32.totalorder %v1937_v29, 1  ;;  %vm1978_vm10 = vmpackc.low %vm1962_vm15, %vm1962_vm15  ;;  %v1992_v15 = vsel %vm1976_vm1, 65537, %v5643_v2 }
 0x42a   :  { %v5437_v35 = vpop.eup %5436  ;;  %5448 = vtanh.f32 %v1870_v28  ;;  %4854 = vmatmul.mubr.bf16.vlgmr.msra.gmra.mrb[32].mxu0 %v6797_v30  ;;  %vm1975_vm11 = vmpackc.low %vm1959_vm6, %vm1959_vm6  ;;  %v1994_v12 = vsel %vm1978_vm10, 65537, %v5643_v2 }
 0x42b   :  { %v5439_v5 = vpop.eup %5438  ;;  %5450 = vtanh.f32 %v1868_v24  ;;  %4870 = vmatpush3.bf16.msra.mxu0 %v6753_v21  ;;  %v1991_v10 = vsel %vm1975_vm11, 65537, %v5643_v2 }
 0x42c   :  { %v5441_v39 = vpop.eup %5440  ;;  %4871 = vmatprep.subr.bf16.mxu0 %v6812_v27  ;;  %v1943_v57 = vpop.permute.xlu1 %1942  ;;  %v4202_v49 = vcombine.low %v1991_v10, %v1992_v15 }
 0x42d   :  { %v5443_v51 = vpop.eup %5442  ;;  %v4835_v45 = vpop.f32.mrb[44].mxu1  ;;  %v1894_v46 = vpack.c.bf16 %v5441_v39, %v5437_v35  ;;  %vm1961_vm4 = vcmp.eq.s32.totalorder %v1943_v57, 1  ;;  %v6930_v39 = vld [vmem:[%s7608_s3 + $0x10] sm:$0xff]  }
 0x42e   :  { %v1873_v32 = vadd.f32 %v6576_v50, %v4835_v45  ;;  %v1844_v38 = vpop.f32.mrb[45].mxu1  ;;  %v1893_v36 = vpack.c.bf16 %v5443_v51, %v5439_v5  ;;  %vm1977_vm7 = vmpackc.low %vm1961_vm4, %vm1961_vm4  ;;  %vm2025_vm9 = vcmp.ne.s16.totalorder %v4202_v49, 0  ;;  %v5293_v5 = vld [vmem:[%s7605_s0 + $0x108] sm:$0xff]   ;;  %v5298_v45 = vld [vmem:[%s7605_s0 + $0x130] sm:$0xff]  }
 0x42f   :  { %v1871_v4 = vadd.f32 %v6576_v50, %v1844_v38  ;;  %v4836_v16 = vpop.f32.mrb[46].mxu1  ;;  %4872 = vmatpush3.bf16.msra.mxu0 %v6812_v27  ;;  %v1993_v23 = vsel %vm1977_vm7, 65537, %v5643_v2  ;;  %v5297_v51 = vld [vmem:[%s7605_s0 + $0x128] sm:$0xff]   ;;  %v6971_v38 = vld [vmem:[%s7608_s3 + $0x30] sm:$0xff]  }
 0x430   :  { %5452 = vtanh.f32 %v1873_v32  ;;  %v1874_v37 = vadd.f32 %v6576_v50, %v4836_v16  ;;  %v1847_v43 = vpop.f32.mrb[47].mxu1  ;;  %v6840_v54 = vsel %vm2021_vm2, %v1893_v36, %v6659_v59  ;;  %4873 = vmatprep.subr.bf16.mxu0 %v6845_v62  ;;  %v6856_v59 = vsel %vm6827_vm0, %v1894_v46, %v6670_v31  ;;  %vm7693_vm2 = vmmov %vm7692_vm14  ;;  %v6952_v46 = vld [vmem:[%s7608_s3 + $0x20] sm:$0xff]   ;;  %v5299_v32 = vld [vmem:[%s7605_s0 + $0x138] sm:$0xff]   ;;  %v2352_v52 = vpop.permute.xlu1 %2351 }
 0x431   :  { %5454 = vtanh.f32 %v1871_v4  ;;  %v1872_v48 = vadd.f32 %v6576_v50, %v1847_v43  ;;  %4857 = vmatprep.mubr.bf16.mxu0 %v6840_v54  ;;  %v4203_v0 = vcombine.low %v1993_v23, %v1994_v12  ;;  %vm7694_vm0 = vmmov %vm7693_vm2  ;;  %v6979_v36 = vld [vmem:[%s7608_s3 + $0x38] sm:$0xff]   ;;  %v2355_v16 = vpop.permute.xlu0 %2354  ;;  %vm2398_vm11 = vcmp.eq.s32.totalorder %v2352_v52, 1 }
 0x432   :  { %v5445_v11 = vpop.eup %5444  ;;  %5456 = vtanh.f32 %v1874_v37  ;;  %4858 = vmatmul.mubr.bf16.gmra.mrb[36].mxu0 %v6856_v59  ;;  %vm7695_vm12 = vmmov %vm7694_vm0  ;;  %vm2399_vm1 = vcmp.eq.s32.totalorder %v2355_v16, 1 }
 0x433   :  { %v5447_v60 = vpop.eup %5446  ;;  %5458 = vtanh.f32 %v1872_v48  ;;  %4874 = vmatpush3.bf16.msra.mxu0 %v6845_v62  ;;  %vm2026_vm13 = vcmp.ne.s16.totalorder %v4203_v0, 0  ;;  %vm7696_vm6 = vmmov %vm7694_vm0 }
 0x434   :  { %v5449_v31 = vpop.eup %5448  ;;  %4875 = vmatprep.subr.bf16.mxu0 %v6869_v8  ;;  %vm7697_vm4 = vmmov %vm7694_vm0  ;;  %v2358_v55 = vpop.permute.xlu1 %2357 }
 0x435   :  { %v5451_v63 = vpop.eup %5450  ;;  %v1896_v47 = vpack.c.bf16 %v5449_v31, %v5445_v11  ;;  %vm7698_vm5 = vmmov %vm7694_vm0  ;;  %v2364_v9 = vpop.permute.xlu0 %2363  ;;  %vm2400_vm10 = vcmp.eq.s32.totalorder %v2358_v55, 1 }
 0x436   :  { %v1895_v22 = vpack.c.bf16 %v5451_v63, %v5447_v60  ;;  %vm7699_vm15 = vmmov %vm7694_vm0 }
 0x437   :  { %4876 = vmatpush3.bf16.msra.mxu0 %v6869_v8  ;;  %v6888_v1 = vsel %vm2024_vm3, %v1896_v47, %v6690_v20  ;;  %v5292_v20 = vld [vmem:[%s7605_s0 + $0x100] sm:$0xff]  }
 0x438   :  { %v6877_v26 = vsel %vm2023_vm8, %v1895_v22, %v6684_v40  ;;  %4949 = vmatprep.subr.bf16.mxu0 %v6882_v33  ;;  %v2361_v4 = vpop.permute.xlu1 %2360  ;;  %vm2414_vm8 = vmpackc.low %vm2398_vm11, %vm2398_vm11 }
 0x439   :  { %4861 = vmatprep.mubr.bf16.mxu0 %v6877_v26  ;;  %v2370_v14 = vpop.permute.xlu0 %2369  ;;  %vm2401_vm7 = vcmp.eq.s32.totalorder %v2361_v4, 1  ;;  %v2430_v23 = vsel %vm2414_vm8, 65537, %v5643_v2 }
 0x43a   :  { %v5453_v7 = vpop.eup %5452  ;;  %4862 = vmatmul.mubr.bf16.gmra.mrb[40].mxu0 %v6888_v1  ;;  %vm2417_vm3 = vmpackc.low %vm2401_vm7, %vm2401_vm7 }
 0x43b   :  { %v5455_v40 = vpop.eup %5454  ;;  %v2433_v15 = vsel %vm2417_vm3, 65537, %v5643_v2 }
 0x43c   :  { %v5457_v28 = vpop.eup %5456  ;;  %v2367_v42 = vpop.permute.xlu1 %2366 }
 0x43d   :  { %v5459_v24 = vpop.eup %5458  ;;  %v1898_v35 = vpack.c.bf16 %v5457_v28, %v5453_v7  ;;  %v6997_v7 = vpop.permute.xlu0 %2375 }
 0x43e   :  { %v1897_v58 = vpack.c.bf16 %v5459_v24, %v5455_v40 }
 0x43f   :  { %v6901_v29 = vsel %vm2026_vm13, %v1898_v35, %v6703_v25  ;;  %v5295_v25 = vld [vmem:[%s7605_s0 + $0x118] sm:$0xff]   ;;  %vm2416_vm13 = vmpackc.low %vm2400_vm10, %vm2400_vm10  ;;  %vm2406_vm10 = vcmp.eq.s32.totalorder %v6997_v7, 1 }
 0x440   :  { %v6897_v3 = vsel %vm2025_vm9, %v1897_v58, %v6699_v61  ;;  %v6917_v61 = vld [vmem:[%s7608_s3 + $0x8] sm:$0xff]   ;;  %v2373_v11 = vpop.permute.xlu1 %2372  ;;  %vm6988_vm9 = vmpackc.low %vm2399_vm1, %vm2399_vm1  ;;  %v2432_v24 = vsel %vm2416_vm13, 65537, %v5643_v2 }
 0x441   :  { %4865 = vmatprep.mubr.bf16.mxu0 %v6897_v3  ;;  %v2431_v0 = vsel %vm6988_vm9, 65537, %v5643_v2 }
 0x442   :  { %4866 = vmatmul.mubr.bf16.gmra.mrb[44].mxu0 %v6901_v29  ;;  %v4236_v58 = vcombine.low %v2430_v23, %v2431_v0  ;;  %v5302_v23 = vld [vmem:[%s7605_s0 + $0x150] sm:$0xff]  }
 0x443   :  { %4877 = vmatprep.mubr.msk.bf16.mxu0 %vm7692_vm14, %v5292_v20  ;;  %vm2403_vm14 = vcmp.eq.s32.totalorder %v2367_v42, 1  ;;  %v4237_v20 = vcombine.low %v2432_v24, %v2433_v15  ;;  %v7048_v15 = vld [vmem:[%s7609_s4] ss:$0 sm:$0xff] }
 0x444   :  { %v6992_v53 = vpop.permute.xlu1 %2378  ;;  %vm2470_vm11 = vcmp.ne.s16.totalorder %v4236_v58, 0 }
 0x445   :  { %vm2471_vm7 = vcmp.ne.s16.totalorder %v4237_v20, 0  ;;  %vm2407_vm1 = vcmp.eq.s32.totalorder %v6992_v53, 1 }
 0x446   :  { %vm2423_vm9 = vmpackc.low %vm2407_vm1, %vm2407_vm1 }
 0x44a   :  { %4878 = vmatmul.mubr.msk.bf16.vlgmr.msra.gmra.mrb[32].mxu0 %vm7693_vm2, %v5293_v5  ;;  %vm2405_vm2 = vcmp.eq.s32.totalorder %v2373_v11, 1 }
 0x44b   :  { %4881 = vmatprep.mubr.msk.bf16.mxu0 %vm7694_vm0, %v5294_v13  ;;  %4950 = vmatpush3.bf16.msra.mxu0 %v6882_v33  ;;  %vm2402_vm0 = vcmp.eq.s32.totalorder %v2364_v9, 1  ;;  %v2385_v13 = vpop.permute.xlu1 %2384 }
 0x44c   :  { %4951 = vmatprep.subr.bf16.mxu0 %v6917_v61  ;;  %vm2409_vm8 = vcmp.eq.s32.totalorder %v2385_v13, 1 }
 0x44d   :  { %vm7041_vm13 = vmpackc.low %vm2409_vm8, %vm2409_vm8 }
 0x44f   :  { %4952 = vmatpush3.bf16.msra.mxu0 %v6917_v61 }
 0x450   :  { %4953 = vmatprep.subr.bf16.mxu0 %v6930_v39 }
 0x452   :  { %4882 = vmatmul.mubr.msk.bf16.gmra.mrb[36].mxu0 %vm7695_vm12, %v5295_v25  ;;  %vm2404_vm12 = vcmp.eq.s32.totalorder %v2370_v14, 1 }
 0x453   :  { %4885 = vmatprep.mubr.msk.bf16.mxu0 %vm7696_vm6, %v5296_v44  ;;  %4954 = vmatpush3.bf16.msra.mxu0 %v6930_v39  ;;  %vm2419_vm6 = vmpackc.low %vm2403_vm14, %vm2403_vm14 }
 0x454   :  { %4955 = vmatprep.subr.bf16.mxu0 %v6939_v34  ;;  %v2435_v42 = vsel %vm2419_vm6, 65537, %v5643_v2  ;;  %vm7051_vm14 = vmpackc.low %vm2406_vm10, %vm2406_vm10 }
 0x457   :  { %4956 = vmatpush3.bf16.msra.mxu0 %v6939_v34 }
 0x458   :  { %4957 = vmatprep.subr.bf16.mxu0 %v6952_v46 }
 0x45a   :  { %4886 = vmatmul.mubr.msk.bf16.gmra.mrb[40].mxu0 %vm7697_vm4, %v5297_v51  ;;  %vm2421_vm4 = vmpackc.low %vm2405_vm2, %vm2405_vm2 }
 0x45b   :  { %4889 = vmatprep.mubr.msk.bf16.mxu0 %vm7698_vm5, %v5298_v45  ;;  %4958 = vmatpush3.bf16.msra.mxu0 %v6952_v46  ;;  %vm7006_vm5 = vmpackc.low %vm2402_vm0, %vm2402_vm0 }
 0x45c   :  { %4959 = vmatprep.subr.bf16.mxu0 %v6961_v17 }
 0x45f   :  { %4960 = vmatpush3.bf16.msra.mxu0 %v6961_v17 }
 0x460   :  { %4961 = vmatprep.subr.bf16.mxu0 %v6971_v38 }
 0x462   :  { %4890 = vmatmul.mubr.msk.bf16.gmra.mrb[44].mxu0 %vm7699_vm15, %v5299_v32  ;;  %v2382_v32 = vpop.permute.xlu0 %2381  ;;  %vm7011_vm15 = vmpackc.low %vm2404_vm12, %vm2404_vm12 }
 0x463   :  { %4962 = vmatpush3.bf16.msra.mxu0 %v6971_v38  ;;  %v2436_v14 = vsel %vm7011_vm15, 65537, %v5643_v2  ;;  %vm2408_vm3 = vcmp.eq.s32.totalorder %v2382_v32, 1 }
 0x464   :  { %4963 = vmatprep.subr.bf16.mxu0 %v6979_v36  ;;  %vm7061_vm12 = vmpackc.low %vm2408_vm3, %vm2408_vm3 }
 0x467   :  { %4964 = vmatpush3.bf16.msra.mxu0 %v6979_v36 }
 0x468   :  { %4981 = vmatprep.subr.bf16.mxu0 %v6753_v21 }
 0x51d   :  { %v4879_v57 = vpop.f32.mrb[32].mxu0 }
 0x51e   :  { %v2312_v37 = vadd.f32 %v6576_v50, %v4879_v57  ;;  %v2247_v43 = vpop.f32.mrb[33].mxu0 }
 0x51f   :  { %v2310_v56 = vadd.f32 %v6576_v50, %v2247_v43  ;;  %v4880_v48 = vpop.f32.mrb[34].mxu0 }
 0x520   :  { %5460 = vtanh.f32 %v2312_v37  ;;  %v2313_v19 = vadd.f32 %v6576_v50, %v4880_v48  ;;  %v2250_v6 = vpop.f32.mrb[35].mxu0  ;;  %v2437_v37 = vsel %vm2421_vm4, 65537, %v5643_v2 }
 0x521   :  { %5462 = vtanh.f32 %v2310_v56  ;;  %v2311_v60 = vadd.f32 %v6576_v50, %v2250_v6  ;;  %v4239_v31 = vcombine.low %v2436_v14, %v2437_v37 }
 0x522   :  { %5464 = vtanh.f32 %v2313_v19 }
 0x523   :  { %5466 = vtanh.f32 %v2311_v60  ;;  %v2434_v60 = vsel %vm7006_vm5, 65537, %v5643_v2  ;;  %vm7055_vm0 = vcmp.ne.s16.totalorder %v4239_v31, 0 }
 0x525   :  { %v4883_v41 = vpop.f32.mrb[36].mxu0 }
 0x526   :  { %v2316_v63 = vadd.f32 %v6576_v50, %v4883_v41  ;;  %v2263_v47 = vpop.f32.mrb[37].mxu0  ;;  %v4238_v41 = vcombine.low %v2434_v60, %v2435_v42 }
 0x527   :  { %v2314_v22 = vadd.f32 %v6576_v50, %v2263_v47  ;;  %v4884_v10 = vpop.f32.mrb[38].mxu0 }
 0x528   :  { %5468 = vtanh.f32 %v2316_v63  ;;  %v2317_v40 = vadd.f32 %v6576_v50, %v4884_v10  ;;  %v2266_v12 = vpop.f32.mrb[39].mxu0  ;;  %v2388_v63 = vpop.permute.xlu0 %2387  ;;  %vm2472_vm2 = vcmp.ne.s16.totalorder %v4238_v41, 0 }
 0x529   :  { %5470 = vtanh.f32 %v2314_v22  ;;  %v2315_v49 = vadd.f32 %v6576_v50, %v2266_v12  ;;  %vm2410_vm5 = vcmp.eq.s32.totalorder %v2388_v63, 1 }
 0x52a   :  { %v5461_v28 = vpop.eup %5460  ;;  %5472 = vtanh.f32 %v2317_v40  ;;  %vm2426_vm1 = vmpackc.low %vm2410_vm5, %vm2410_vm5 }
 0x52b   :  { %v5463_v35 = vpop.eup %5462  ;;  %5474 = vtanh.f32 %v2315_v49  ;;  %v2442_v60 = vsel %vm2426_vm1, 65537, %v5643_v2 }
 0x52c   :  { %v5465_v5 = vpop.eup %5464  ;;  %v2394_v32 = vpop.permute.xlu0 %2393 }
 0x52d   :  { %v5467_v25 = vpop.eup %5466  ;;  %v4887_v44 = vpop.f32.mrb[40].mxu0  ;;  %v2343_v51 = vpack.c.bf16 %v5465_v5, %v5461_v28  ;;  %vm2412_vm15 = vcmp.eq.s32.totalorder %v2394_v32, 1 }
 0x52e   :  { %v2320_v52 = vadd.f32 %v6576_v50, %v4887_v44  ;;  %v2279_v55 = vpop.f32.mrb[41].mxu0  ;;  %v2342_v4 = vpack.c.bf16 %v5467_v25, %v5463_v35  ;;  %v2439_v35 = vsel %vm2423_vm9, 65537, %v5643_v2  ;;  %v2441_v25 = vsel %vm7041_vm13, 65537, %v5643_v2  ;;  %vm2428_vm10 = vmpackc.low %vm2412_vm15, %vm2412_vm15 }
 0x52f   :  { %v2318_v9 = vadd.f32 %v6576_v50, %v2279_v55  ;;  %v4888_v57 = vpop.f32.mrb[42].mxu0  ;;  %v7025_v19 = vsel %vm2471_vm7, %v2343_v51, %v6797_v30  ;;  %v2440_v55 = vsel %vm7061_vm12, 65537, %v5643_v2 }
 0x530   :  { %5476 = vtanh.f32 %v2320_v52  ;;  %v2321_v43 = vadd.f32 %v6576_v50, %v4888_v57  ;;  %v2282_v56 = vpop.f32.mrb[43].mxu0  ;;  %v7020_v48 = vsel %vm2470_vm11, %v2342_v4, %v6792_v18  ;;  %v2391_v18 = vpop.permute.xlu1 %2390  ;;  %v4241_v16 = vcombine.low %v2440_v55, %v2441_v25 }
 0x531   :  { %5478 = vtanh.f32 %v2318_v9  ;;  %v2319_v11 = vadd.f32 %v6576_v50, %v2282_v56  ;;  %4909 = vmatprep.mubr.bf16.mxu1 %v7020_v48  ;;  %vm2411_vm6 = vcmp.eq.s32.totalorder %v2391_v18, 1  ;;  %v2444_v18 = vsel %vm2428_vm10, 65537, %v5643_v2 }
 0x532   :  { %v5469_v6 = vpop.eup %5468  ;;  %5480 = vtanh.f32 %v2321_v43  ;;  %4910 = vmatmul.mubr.bf16.vlgmr.msra.gmra.mrb[48].mxu1 %v7025_v19  ;;  %vm2427_vm11 = vmpackc.low %vm2411_vm6, %vm2411_vm6  ;;  %vm2475_vm3 = vcmp.ne.s16.totalorder %v4241_v16, 0 }
 0x533   :  { %v5471_v50 = vpop.eup %5470  ;;  %5482 = vtanh.f32 %v2319_v11  ;;  %4926 = vmatpush3.bf16.msra.mxu1 %v6753_v21  ;;  %v2443_v37 = vsel %vm2427_vm11, 65537, %v5643_v2 }
 0x534   :  { %v5473_v30 = vpop.eup %5472  ;;  %4927 = vmatprep.subr.bf16.mxu1 %v6812_v27  ;;  %v2397_v58 = vpop.permute.xlu1 %2396 }
 0x535   :  { %v5475_v47 = vpop.eup %5474  ;;  %v4891_v22 = vpop.f32.mrb[44].mxu0  ;;  %v2345_v10 = vpack.c.bf16 %v5473_v30, %v5469_v6  ;;  %vm2413_vm4 = vcmp.eq.s32.totalorder %v2397_v58, 1 }
 0x536   :  { %v2324_v7 = vadd.f32 %v7048_v15, %v4891_v22  ;;  %v2295_v40 = vpop.f32.mrb[45].mxu0  ;;  %v2344_v12 = vpack.c.bf16 %v5475_v47, %v5471_v50  ;;  %vm2429_vm7 = vmpackc.low %vm2413_vm4, %vm2413_vm4  ;;  %v4242_v50 = vcombine.low %v2442_v60, %v2443_v37 }
 0x537   :  { %v2322_v28 = vadd.f32 %v7048_v15, %v2295_v40  ;;  %v4892_v0 = vpop.f32.mrb[46].mxu0  ;;  %4928 = vmatpush3.bf16.msra.mxu1 %v6812_v27  ;;  %v7079_v51 = vsel %vm7055_vm0, %v2345_v10, %v6856_v59  ;;  %v2445_v56 = vsel %vm2429_vm7, 65537, %v5643_v2  ;;  %v5301_v10 = vld [vmem:[%s7605_s0 + $0x148] sm:$0xff]  }
 0x538   :  { %5484 = vtanh.f32 %v2324_v7  ;;  %v2325_v20 = vadd.f32 %v7048_v15, %v4892_v0  ;;  %v2298_v5 = vpop.f32.mrb[47].mxu0  ;;  %v7068_v13 = vsel %vm2472_vm2, %v2344_v12, %v6840_v54  ;;  %4929 = vmatprep.subr.bf16.mxu1 %v6845_v62  ;;  %v2438_v54 = vsel %vm7051_vm14, 65537, %v5643_v2  ;;  %v5306_v7 = vld [vmem:[%s7605_s0 + $0x170] sm:$0xff]  }
 0x539   :  { %5486 = vtanh.f32 %v2322_v28  ;;  %v2323_v44 = vadd.f32 %v7048_v15, %v2298_v5  ;;  %4913 = vmatprep.mubr.bf16.mxu1 %v7068_v13  ;;  %v4240_v4 = vcombine.low %v2438_v54, %v2439_v35  ;;  %v4243_v41 = vcombine.low %v2444_v18, %v2445_v56 }
 0x53a   :  { %v5477_v45 = vpop.eup %5476  ;;  %5488 = vtanh.f32 %v2325_v20  ;;  %4914 = vmatmul.mubr.bf16.gmra.mrb[52].mxu1 %v7079_v51  ;;  %vm2476_vm9 = vcmp.ne.s16.totalorder %v4242_v50, 0  ;;  %vm7714_vm14 = vcmask 523264  }
 0x53b   :  { %v5479_v52 = vpop.eup %5478  ;;  %5490 = vtanh.f32 %v2323_v44  ;;  %4930 = vmatpush3.bf16.msra.mxu1 %v6845_v62  ;;  %vm2474_vm8 = vcmp.ne.s16.totalorder %v4240_v4, 0  ;;  %vm2477_vm13 = vcmp.ne.s16.totalorder %v4243_v41, 0  ;;  %vm7715_vm2 = vmmov %vm7714_vm14 }
 0x53c   :  { %v5481_v59 = vpop.eup %5480  ;;  %4931 = vmatprep.subr.bf16.mxu1 %v6869_v8  ;;  %vm7716_vm0 = vmmov %vm7715_vm2 }
 0x53d   :  { %v5483_v42 = vpop.eup %5482  ;;  %v2347_v9 = vpack.c.bf16 %v5481_v59, %v5477_v45  ;;  %vm7717_vm12 = vmmov %vm7716_vm0 }
 0x53e   :  { %v2346_v57 = vpack.c.bf16 %v5483_v42, %v5479_v52  ;;  %vm7718_vm6 = vmmov %vm7716_vm0 }
 0x53f   :  { %4932 = vmatpush3.bf16.msra.mxu1 %v6869_v8  ;;  %v7099_v11 = vsel %vm2475_vm3, %v2347_v9, %v6888_v1  ;;  %v5300_v1 = vld [vmem:[%s7605_s0 + $0x140] sm:$0xff]   ;;  %vm7719_vm4 = vmmov %vm7716_vm0 }
 0x540   :  { %v7093_v43 = vsel %vm2474_vm8, %v2346_v57, %v6877_v26  ;;  %5005 = vmatprep.subr.bf16.mxu1 %v6882_v33  ;;  %vm7720_vm5 = vmmov %vm7716_vm0 }
 0x541   :  { %4917 = vmatprep.mubr.bf16.mxu1 %v7093_v43  ;;  %vm7721_vm15 = vmmov %vm7716_vm0 }
 0x542   :  { %v5485_v6 = vpop.eup %5484  ;;  %4918 = vmatmul.mubr.bf16.gmra.mrb[56].mxu1 %v7099_v11 }
 0x543   :  { %v5487_v14 = vpop.eup %5486 }
 0x544   :  { %v5489_v26 = vpop.eup %5488 }
 0x545   :  { %v5491_v31 = vpop.eup %5490  ;;  %v2349_v30 = vpack.c.bf16 %v5489_v26, %v5485_v6 }
 0x546   :  { %v2348_v63 = vpack.c.bf16 %v5491_v31, %v5487_v14 }
 0x547   :  { %v7112_v22 = vsel %vm2477_vm13, %v2349_v30, %v6901_v29  ;;  %v5304_v29 = vld [vmem:[%s7605_s0 + $0x160] sm:$0xff]  }
 0x548   :  { %v7108_v47 = vsel %vm2476_vm9, %v2348_v63, %v6897_v3  ;;  %v5303_v3 = vld [vmem:[%s7605_s0 + $0x158] sm:$0xff]  }
 0x549   :  { %4921 = vmatprep.mubr.bf16.mxu1 %v7108_v47 }
 0x54a   :  { %4922 = vmatmul.mubr.bf16.gmra.mrb[60].mxu1 %v7112_v22 }
 0x54b   :  { %4933 = vmatprep.mubr.msk.bf16.mxu1 %vm7714_vm14, %v5300_v1 }
 0x552   :  { %4934 = vmatmul.mubr.msk.bf16.vlgmr.msra.gmra.mrb[48].mxu1 %vm7715_vm2, %v5301_v10 }
 0x553   :  { %4937 = vmatprep.mubr.msk.bf16.mxu1 %vm7716_vm0, %v5302_v23  ;;  %5006 = vmatpush3.bf16.msra.mxu1 %v6882_v33  ;;  %v5305_v33 = vld [vmem:[%s7605_s0 + $0x168] sm:$0xff]  }
 0x554   :  { %5007 = vmatprep.subr.bf16.mxu1 %v6917_v61 }
 0x557   :  { %5008 = vmatpush3.bf16.msra.mxu1 %v6917_v61  ;;  %v5307_v61 = vld [vmem:[%s7605_s0 + $0x178] sm:$0xff]  }
 0x558   :  { %5009 = vmatprep.subr.bf16.mxu1 %v6930_v39 }
 0x55a   :  { %4938 = vmatmul.mubr.msk.bf16.gmra.mrb[52].mxu1 %vm7717_vm12, %v5303_v3 }
 0x55b   :  { %4941 = vmatprep.mubr.msk.bf16.mxu1 %vm7718_vm6, %v5304_v29  ;;  %5010 = vmatpush3.bf16.msra.mxu1 %v6930_v39  ;;  %v2806_v39 = vpop.permute.xlu1 %2805 }
 0x55c   :  { %5011 = vmatprep.subr.bf16.mxu1 %v6939_v34  ;;  %vm2850_vm11 = vcmp.eq.s32.totalorder %v2806_v39, 1 }
 0x55d   :  { %vm2866_vm10 = vmpackc.low %vm2850_vm11, %vm2850_vm11 }
 0x55e   :  { %v2882_v4 = vsel %vm2866_vm10, 65537, %v5643_v2 }
 0x55f   :  { %5012 = vmatpush3.bf16.msra.mxu1 %v6939_v34  ;;  %v2803_v34 = vpop.permute.xlu0 %2802 }
 0x560   :  { %5013 = vmatprep.subr.bf16.mxu1 %v6952_v46  ;;  %vm2849_vm1 = vcmp.eq.s32.totalorder %v2803_v34, 1 }
 0x561   :  { %vm7164_vm9 = vmpackc.low %vm2849_vm1, %vm2849_vm1 }
 0x562   :  { %4942 = vmatmul.mubr.msk.bf16.gmra.mrb[56].mxu1 %vm7719_vm4, %v5305_v33  ;;  %v2881_v37 = vsel %vm7164_vm9, 65537, %v5643_v2 }
 0x563   :  { %4945 = vmatprep.mubr.msk.bf16.mxu1 %vm7720_vm5, %v5306_v7  ;;  %5014 = vmatpush3.bf16.msra.mxu1 %v6952_v46  ;;  %v2809_v46 = vpop.permute.xlu1 %2808  ;;  %v2812_v40 = vpop.permute.xlu0 %2811  ;;  %v4276_v60 = vcombine.low %v2881_v37, %v2882_v4 }
 0x564   :  { %5015 = vmatprep.subr.bf16.mxu1 %v6961_v17  ;;  %vm2851_vm7 = vcmp.eq.s32.totalorder %v2809_v46, 1  ;;  %vm2852_vm8 = vcmp.eq.s32.totalorder %v2812_v40, 1 }
 0x565   :  { %vm2867_vm3 = vmpackc.low %vm2851_vm7, %vm2851_vm7  ;;  %vm2921_vm11 = vcmp.ne.s16.totalorder %v4276_v60, 0 }
 0x566   :  { %vm2868_vm13 = vmpackc.low %vm2852_vm8, %vm2852_vm8  ;;  %v2883_v59 = vsel %vm2867_vm3, 65537, %v5643_v2 }
 0x567   :  { %5016 = vmatpush3.bf16.msra.mxu1 %v6961_v17  ;;  %v2815_v12 = vpop.permute.xlu1 %2814  ;;  %v2818_v49 = vpop.permute.xlu0 %2817  ;;  %v2884_v56 = vsel %vm2868_vm13, 65537, %v5643_v2 }
 0x568   :  { %5017 = vmatprep.subr.bf16.mxu1 %v6971_v38  ;;  %vm2853_vm14 = vcmp.eq.s32.totalorder %v2815_v12, 1  ;;  %vm2854_vm0 = vcmp.eq.s32.totalorder %v2818_v49, 1  ;;  %v4277_v14 = vcombine.low %v2883_v59, %v2884_v56 }
 0x569   :  { %vm2869_vm6 = vmpackc.low %vm2853_vm14, %vm2853_vm14 }
 0x56a   :  { %4946 = vmatmul.mubr.msk.bf16.gmra.mrb[60].mxu1 %vm7721_vm15, %v5307_v61  ;;  %vm7182_vm5 = vmpackc.low %vm2854_vm0, %vm2854_vm0  ;;  %vm2922_vm7 = vcmp.ne.s16.totalorder %v4277_v14, 0  ;;  %v2885_v29 = vsel %vm2869_vm6, 65537, %v5643_v2 }
 0x56b   :  { %5018 = vmatpush3.bf16.msra.mxu1 %v6971_v38  ;;  %v2821_v38 = vpop.permute.xlu1 %2820  ;;  %v2824_v20 = vpop.permute.xlu0 %2823 }
 0x56c   :  { %5019 = vmatprep.subr.bf16.mxu1 %v6979_v36  ;;  %vm2855_vm2 = vcmp.eq.s32.totalorder %v2821_v38, 1  ;;  %vm2856_vm12 = vcmp.eq.s32.totalorder %v2824_v20, 1 }
 0x56d   :  { %vm2871_vm4 = vmpackc.low %vm2855_vm2, %vm2855_vm2 }
 0x56e   :  { %vm7187_vm15 = vmpackc.low %vm2856_vm12, %vm2856_vm12  ;;  %v2887_v61 = vsel %vm2871_vm4, 65537, %v5643_v2 }
 0x56f   :  { %5020 = vmatpush3.bf16.msra.mxu1 %v6979_v36  ;;  %v7168_v44 = vpop.permute.xlu1 %2826  ;;  %v7172_v55 = vpop.permute.xlu0 %2829 }
 0x570   :  { %5037 = vmatprep.subr.bf16.mxu1 %v6753_v21  ;;  %vm2857_vm1 = vcmp.eq.s32.totalorder %v7168_v44, 1  ;;  %vm2858_vm10 = vcmp.eq.s32.totalorder %v7172_v55, 1 }
 0x571   :  { %vm2873_vm9 = vmpackc.low %vm2857_vm1, %vm2857_vm1 }
 0x572   :  { %vm7222_vm14 = vmpackc.low %vm2858_vm10, %vm2858_vm10  ;;  %v2889_v55 = vsel %vm2873_vm9, 65537, %v5643_v2 }
 0x573   :  { %v2833_v50 = vpop.permute.xlu1 %2832  ;;  %v2836_v63 = vpop.permute.xlu0 %2835 }
 0x574   :  { %vm2859_vm8 = vcmp.eq.s32.totalorder %v2833_v50, 1  ;;  %vm2860_vm3 = vcmp.eq.s32.totalorder %v2836_v63, 1 }
 0x575   :  { %vm7217_vm13 = vmpackc.low %vm2859_vm8, %vm2859_vm8 }
 0x576   :  { %vm7232_vm12 = vmpackc.low %vm2860_vm3, %vm2860_vm3 }
 0x577   :  { %v2842_v38 = vpop.permute.xlu0 %2841  ;;  %v2892_v60 = vsel %vm7232_vm12, 65537, %v5643_v2 }
 0x57b   :  { %v2848_v56 = vpop.permute.xlu0 %2847 }
 0x625   :  { %v4935_v53 = vpop.f32.mrb[48].mxu1 }
 0x626   :  { %v2763_v17 = vadd.f32 %v7048_v15, %v4935_v53  ;;  %v2698_v28 = vpop.f32.mrb[49].mxu1  ;;  %v2886_v53 = vsel %vm7182_vm5, 65537, %v5643_v2  ;;  %vm2862_vm5 = vcmp.eq.s32.totalorder %v2842_v38, 1 }
 0x627   :  { %v2761_v0 = vadd.f32 %v7048_v15, %v2698_v28  ;;  %v4936_v24 = vpop.f32.mrb[50].mxu1  ;;  %vm2878_vm1 = vmpackc.low %vm2862_vm5, %vm2862_vm5 }
 0x628   :  { %5492 = vtanh.f32 %v2763_v17  ;;  %v2764_v35 = vadd.f32 %v7048_v15, %v4936_v24  ;;  %v2701_v36 = vpop.f32.mrb[51].mxu1  ;;  %v2888_v17 = vsel %vm7187_vm15, 65537, %v5643_v2  ;;  %vm2864_vm15 = vcmp.eq.s32.totalorder %v2848_v56, 1 }
 0x629   :  { %5494 = vtanh.f32 %v2761_v0  ;;  %v2762_v58 = vadd.f32 %v7048_v15, %v2701_v36  ;;  %v4278_v0 = vcombine.low %v2885_v29, %v2886_v53  ;;  %v4279_v24 = vcombine.low %v2887_v61, %v2888_v17  ;;  %vm2880_vm10 = vmpackc.low %vm2864_vm15, %vm2864_vm15  ;;  %v5313_v53 = vld [vmem:[%s7605_s0 + $0x1a8] sm:$0xff]   ;;  %v5314_v17 = vld [vmem:[%s7605_s0 + $0x1b0] sm:$0xff]  }
 0x62a   :  { %5496 = vtanh.f32 %v2764_v35 }
 0x62b   :  { %5498 = vtanh.f32 %v2762_v58  ;;  %vm2923_vm2 = vcmp.ne.s16.totalorder %v4278_v0, 0  ;;  %vm7226_vm0 = vcmp.ne.s16.totalorder %v4279_v24, 0  ;;  %v5325_v0 = vld [vmem:[%s7610_s5 + $0x8] sm:$0xff]   ;;  %v5326_v24 = vld [vmem:[%s7610_s5 + $0x10] sm:$0xff]  }
 0x62d   :  { %v4939_v5 = vpop.f32.mrb[52].mxu1 }
 0x62e   :  { %v2767_v45 = vadd.f32 %v7048_v15, %v4939_v5  ;;  %v2714_v54 = vpop.f32.mrb[53].mxu1 }
 0x62f   :  { %v2765_v32 = vadd.f32 %v7048_v15, %v2714_v54  ;;  %v4940_v52 = vpop.f32.mrb[54].mxu1 }
 0x630   :  { %5500 = vtanh.f32 %v2767_v45  ;;  %v2768_v16 = vadd.f32 %v7048_v15, %v4940_v52  ;;  %v2717_v42 = vpop.f32.mrb[55].mxu1 }
 0x631   :  { %5502 = vtanh.f32 %v2765_v32  ;;  %v2766_v9 = vadd.f32 %v7048_v15, %v2717_v42 }
 0x632   :  { %v5493_v57 = vpop.eup %5492  ;;  %5504 = vtanh.f32 %v2768_v16 }
 0x633   :  { %v5495_v6 = vpop.eup %5494  ;;  %5506 = vtanh.f32 %v2766_v9 }
 0x634   :  { %v5497_v18 = vpop.eup %5496 }
 0x635   :  { %v5499_v26 = vpop.eup %5498  ;;  %v4943_v41 = vpop.f32.mrb[56].mxu1  ;;  %v2794_v31 = vpack.c.bf16 %v5497_v18, %v5493_v57 }
 0x636   :  { %v2771_v1 = vadd.f32 %v7048_v15, %v4943_v41  ;;  %v2730_v10 = vpop.f32.mrb[57].mxu1  ;;  %v2793_v23 = vpack.c.bf16 %v5499_v26, %v5495_v6 }
 0x637   :  { %v2769_v33 = vadd.f32 %v7048_v15, %v2730_v10  ;;  %v4944_v7 = vpop.f32.mrb[58].mxu1  ;;  %v7201_v12 = vsel %vm2922_vm7, %v2794_v31, %v7025_v19  ;;  %v2894_v10 = vsel %vm2878_vm1, 65537, %v5643_v2 }
 0x638   :  { %5508 = vtanh.f32 %v2771_v1  ;;  %v2772_v39 = vadd.f32 %v7048_v15, %v4944_v7  ;;  %v2733_v34 = vpop.f32.mrb[59].mxu1  ;;  %v7196_v46 = vsel %vm2921_vm11, %v2793_v23, %v7020_v48  ;;  %v2839_v48 = vpop.permute.xlu1 %2838  ;;  %v2896_v23 = vsel %vm2880_vm10, 65537, %v5643_v2 }
 0x639   :  { %5510 = vtanh.f32 %v2769_v33  ;;  %v2770_v40 = vadd.f32 %v7048_v15, %v2733_v34  ;;  %4965 = vmatprep.mubr.bf16.mxu0 %v7196_v46  ;;  %vm2861_vm6 = vcmp.eq.s32.totalorder %v2839_v48, 1  ;;  %v5315_v48 = vld [vmem:[%s7605_s0 + $0x1b8] sm:$0xff]  }
 0x63a   :  { %v5501_v49 = vpop.eup %5500  ;;  %5512 = vtanh.f32 %v2772_v39  ;;  %4966 = vmatmul.mubr.bf16.vlgmr.msra.gmra.mrb[48].mxu0 %v7201_v12  ;;  %vm2877_vm11 = vmpackc.low %vm2861_vm6, %vm2861_vm6 }
 0x63b   :  { %v5503_v28 = vpop.eup %5502  ;;  %5514 = vtanh.f32 %v2770_v40  ;;  %4982 = vmatpush3.bf16.msra.mxu0 %v6753_v21  ;;  %v2893_v31 = vsel %vm2877_vm11, 65537, %v5643_v2  ;;  %v5309_v40 = vld [vmem:[%s7605_s0 + $0x188] sm:$0xff]  }
 0x63c   :  { %v5505_v19 = vpop.eup %5504  ;;  %4983 = vmatprep.subr.bf16.mxu0 %v6812_v27  ;;  %v2845_v4 = vpop.permute.xlu1 %2844  ;;  %v4282_v3 = vcombine.low %v2893_v31, %v2894_v10 }
 0x63d   :  { %v5507_v35 = vpop.eup %5506  ;;  %v4947_v36 = vpop.f32.mrb[60].mxu1  ;;  %v2796_v58 = vpack.c.bf16 %v5505_v19, %v5501_v49  ;;  %vm2863_vm4 = vcmp.eq.s32.totalorder %v2845_v4, 1  ;;  %v5310_v49 = vld [vmem:[%s7605_s0 + $0x190] sm:$0xff]  }
 0x63e   :  { %v2775_v21 = vadd.f32 %v7048_v15, %v4947_v36  ;;  %v2746_v5 = vpop.f32.mrb[61].mxu1  ;;  %v2795_v25 = vpack.c.bf16 %v5507_v35, %v5503_v28  ;;  %vm2879_vm7 = vmpackc.low %vm2863_vm4, %vm2863_vm4  ;;  %vm2927_vm9 = vcmp.ne.s16.totalorder %v4282_v3, 0  ;;  %v5324_v28 = vld [vmem:[%s7610_s5] sm:$0xff]   ;;  %v3257_v36 = vpop.permute.xlu0 %3256 }
 0x63f   :  { %v2773_v44 = vadd.f32 %v7048_v15, %v2746_v5  ;;  %v4948_v32 = vpop.f32.mrb[62].mxu1  ;;  %4984 = vmatpush3.bf16.msra.mxu0 %v6812_v27  ;;  %v2891_v27 = vsel %vm7217_vm13, 65537, %v5643_v2  ;;  %v7250_v57 = vsel %vm7226_vm0, %v2796_v58, %v7079_v51  ;;  %v2895_v30 = vsel %vm2879_vm7, 65537, %v5643_v2 }
 0x640   :  { %5516 = vtanh.f32 %v2775_v21  ;;  %v2776_v59 = vadd.f32 %v7048_v15, %v4948_v32  ;;  %v2749_v16 = vpop.f32.mrb[63].mxu1  ;;  %v7239_v42 = vsel %vm2923_vm2, %v2795_v25, %v7068_v13  ;;  %4985 = vmatprep.subr.bf16.mxu0 %v6845_v62  ;;  %v2890_v13 = vsel %vm7222_vm14, 65537, %v5643_v2  ;;  %v3254_v19 = vpop.permute.xlu1 %3253 }
 0x641   :  { %5518 = vtanh.f32 %v2773_v44  ;;  %v2774_v9 = vadd.f32 %v7048_v15, %v2749_v16  ;;  %4969 = vmatprep.mubr.bf16.mxu0 %v7239_v42  ;;  %v4280_v14 = vcombine.low %v2889_v55, %v2890_v13  ;;  %v4281_v18 = vcombine.low %v2891_v27, %v2892_v60 }
 0x642   :  { %v5509_v37 = vpop.eup %5508  ;;  %5520 = vtanh.f32 %v2776_v59  ;;  %4970 = vmatmul.mubr.bf16.gmra.mrb[52].mxu0 %v7250_v57  ;;  %v4283_v33 = vcombine.low %v2895_v30, %v2896_v23  ;;  %vm7736_vm14 = vcmask 523264   ;;  %v3266_v20 = vpop.permute.xlu0 %3265  ;;  %vm3300_vm11 = vcmp.eq.s32.totalorder %v3254_v19, 1 }
 0x643   :  { %v5511_v6 = vpop.eup %5510  ;;  %5522 = vtanh.f32 %v2774_v9  ;;  %4986 = vmatpush3.bf16.msra.mxu0 %v6845_v62  ;;  %vm2925_vm8 = vcmp.ne.s16.totalorder %v4280_v14, 0  ;;  %vm2926_vm3 = vcmp.ne.s16.totalorder %v4281_v18, 0  ;;  %vm7737_vm2 = vmmov %vm7736_vm14  ;;  %vm3301_vm1 = vcmp.eq.s32.totalorder %v3257_v36, 1 }
 0x644   :  { %v5513_v51 = vpop.eup %5512  ;;  %4987 = vmatprep.subr.bf16.mxu0 %v6869_v8  ;;  %vm2928_vm13 = vcmp.ne.s16.totalorder %v4283_v33, 0  ;;  %vm7738_vm0 = vmmov %vm7737_vm2  ;;  %v3260_v38 = vpop.permute.xlu1 %3259 }
 0x645   :  { %v5515_v50 = vpop.eup %5514  ;;  %v2798_v26 = vpack.c.bf16 %v5513_v51, %v5509_v37  ;;  %vm7739_vm12 = vmmov %vm7738_vm0  ;;  %vm3302_vm10 = vcmp.eq.s32.totalorder %v3260_v38, 1 }
 0x646   :  { %v2797_v41 = vpack.c.bf16 %v5515_v50, %v5511_v6  ;;  %vm7740_vm6 = vmmov %vm7738_vm0  ;;  %v3272_v4 = vpop.permute.xlu0 %3271 }
 0x647   :  { %4988 = vmatpush3.bf16.msra.mxu0 %v6869_v8  ;;  %v7269_v63 = vsel %vm2926_vm3, %v2798_v26, %v7099_v11  ;;  %v5308_v11 = vld [vmem:[%s7605_s0 + $0x180] sm:$0xff]   ;;  %vm7741_vm4 = vmmov %vm7738_vm0 }
 0x648   :  { %v7264_v62 = vsel %vm2925_vm8, %v2797_v41, %v7093_v43  ;;  %vm7742_vm5 = vmmov %vm7738_vm0  ;;  %5061 = vmatprep.subr.bf16.mxu0 %v5324_v28  ;;  %v3263_v35 = vpop.permute.xlu1 %3262 }
 0x649   :  { %4973 = vmatprep.mubr.bf16.mxu0 %v7264_v62  ;;  %vm7743_vm15 = vmmov %vm7738_vm0  ;;  %vm3303_vm7 = vcmp.eq.s32.totalorder %v3263_v35, 1 }
 0x64a   :  { %v5517_v1 = vpop.eup %5516  ;;  %4974 = vmatmul.mubr.bf16.gmra.mrb[56].mxu0 %v7269_v63  ;;  %vm3316_vm8 = vmpackc.low %vm3300_vm11, %vm3300_vm11  ;;  %v7335_v6 = vpop.permute.xlu0 %3277 }
 0x64b   :  { %v5519_v8 = vpop.eup %5518  ;;  %vm3319_vm3 = vmpackc.low %vm3303_vm7, %vm3303_vm7  ;;  %v3332_v60 = vsel %vm3316_vm8, 65537, %v5643_v2 }
 0x64c   :  { %v5521_v29 = vpop.eup %5520  ;;  %v3269_v58 = vpop.permute.xlu1 %3268  ;;  %v3335_v14 = vsel %vm3319_vm3, 65537, %v5643_v2 }
 0x64d   :  { %v5523_v43 = vpop.eup %5522  ;;  %v2800_v7 = vpack.c.bf16 %v5521_v29, %v5517_v1 }
 0x64e   :  { %v2799_v61 = vpack.c.bf16 %v5523_v43, %v5519_v8 }
 0x64f   :  { %v7282_v34 = vsel %vm2928_vm13, %v2800_v7, %v7112_v22  ;;  %v5312_v22 = vld [vmem:[%s7605_s0 + $0x1a0] sm:$0xff]   ;;  %vm3318_vm13 = vmpackc.low %vm3302_vm10, %vm3302_vm10  ;;  %v3284_v7 = vpop.permute.xlu0 %3283  ;;  %vm3308_vm10 = vcmp.eq.s32.totalorder %v7335_v6, 1 }
 0x650   :  { %v7278_v39 = vsel %vm2927_vm9, %v2799_v61, %v7108_v47  ;;  %v5311_v47 = vld [vmem:[%s7605_s0 + $0x198] sm:$0xff]   ;;  %v3275_v44 = vpop.permute.xlu1 %3274  ;;  %vm7327_vm9 = vmpackc.low %vm3301_vm1, %vm3301_vm1  ;;  %v3334_v31 = vsel %vm3318_vm13, 65537, %v5643_v2  ;;  %vm3310_vm3 = vcmp.eq.s32.totalorder %v3284_v7, 1 }
 0x651   :  { %4977 = vmatprep.mubr.bf16.mxu0 %v7278_v39  ;;  %v3333_v41 = vsel %vm7327_vm9, 65537, %v5643_v2  ;;  %v4317_v10 = vcombine.low %v3334_v31, %v3335_v14 }
 0x652   :  { %4978 = vmatmul.mubr.bf16.gmra.mrb[60].mxu0 %v7282_v34  ;;  %v4316_v1 = vcombine.low %v3332_v60, %v3333_v41 }
 0x653   :  { %4989 = vmatprep.mubr.msk.bf16.mxu0 %vm7736_vm14, %v5308_v11  ;;  %vm3305_vm14 = vcmp.eq.s32.totalorder %v3269_v58, 1  ;;  %vm3373_vm7 = vcmp.ne.s16.totalorder %v4317_v10, 0 }
 0x654   :  { %v7331_v27 = vpop.permute.xlu1 %3280  ;;  %vm3372_vm11 = vcmp.ne.s16.totalorder %v4316_v1, 0 }
 0x655   :  { %vm3309_vm1 = vcmp.eq.s32.totalorder %v7331_v27, 1 }
 0x656   :  { %vm3325_vm9 = vmpackc.low %vm3309_vm1, %vm3309_vm1 }
 0x658   :  { %v3287_v23 = vpop.permute.xlu1 %3286 }
 0x659   :  { %vm3311_vm8 = vcmp.eq.s32.totalorder %v3287_v23, 1  ;;  %v5617_v23 = vld [vmem:[%s7607_s2 + $0x18] sm:$0xff]  }
 0x65a   :  { %4990 = vmatmul.mubr.msk.bf16.vlgmr.msra.gmra.mrb[48].mxu0 %vm7737_vm2, %v5309_v40  ;;  %vm3307_vm2 = vcmp.eq.s32.totalorder %v3275_v44, 1  ;;  %vm7386_vm13 = vmpackc.low %vm3311_vm8, %vm3311_vm8 }
 0x65b   :  { %4993 = vmatprep.mubr.msk.bf16.mxu0 %vm7738_vm0, %v5310_v49  ;;  %5062 = vmatpush3.bf16.msra.mxu0 %v5324_v28  ;;  %vm3304_vm0 = vcmp.eq.s32.totalorder %v3266_v20, 1 }
 0x65c   :  { %5063 = vmatprep.subr.bf16.mxu0 %v5325_v0 }
 0x65f   :  { %5064 = vmatpush3.bf16.msra.mxu0 %v5325_v0 }
 0x660   :  { %5065 = vmatprep.subr.bf16.mxu0 %v5326_v24 }
 0x662   :  { %4994 = vmatmul.mubr.msk.bf16.gmra.mrb[52].mxu0 %vm7739_vm12, %v5311_v47  ;;  %vm3306_vm12 = vcmp.eq.s32.totalorder %v3272_v4, 1 }
 0x663   :  { %4997 = vmatprep.mubr.msk.bf16.mxu0 %vm7740_vm6, %v5312_v22  ;;  %5066 = vmatpush3.bf16.msra.mxu0 %v5326_v24  ;;  %vm3321_vm6 = vmpackc.low %vm3305_vm14, %vm3305_vm14 }
 0x664   :  { %v3337_v47 = vsel %vm3321_vm6, 65537, %v5643_v2  ;;  %vm7391_vm14 = vmpackc.low %vm3308_vm10, %vm3308_vm10 }
 0x665   :  { %v3340_v31 = vsel %vm7391_vm14, 65537, %v5643_v2  ;;  %vm7758_vm14 = vcmask 523264  }
 0x66a   :  { %4998 = vmatmul.mubr.msk.bf16.gmra.mrb[56].mxu0 %vm7741_vm4, %v5313_v53  ;;  %vm3323_vm4 = vmpackc.low %vm3307_vm2, %vm3307_vm2 }
 0x66b   :  { %5001 = vmatprep.mubr.msk.bf16.mxu0 %vm7742_vm5, %v5314_v17  ;;  %vm7345_vm5 = vmpackc.low %vm3304_vm0, %vm3304_vm0  ;;  %v3339_v17 = vsel %vm3323_vm4, 65537, %v5643_v2 }
 0x66c   :  { %v3336_v35 = vsel %vm7345_vm5, 65537, %v5643_v2 }
 0x66d   :  { %v4318_v20 = vcombine.low %v3336_v35, %v3337_v47 }
 0x66f   :  { %vm3374_vm2 = vcmp.ne.s16.totalorder %v4318_v20, 0  ;;  %v5322_v20 = vld [vmem:[%s7605_s0 + $0x1f0] sm:$0xff]  }
 0x672   :  { %5002 = vmatmul.mubr.msk.bf16.gmra.mrb[60].mxu0 %vm7743_vm15, %v5315_v48  ;;  %vm7350_vm15 = vmpackc.low %vm3306_vm12, %vm3306_vm12 }
 0x673   :  { %v3338_v36 = vsel %vm7350_vm15, 65537, %v5643_v2  ;;  %vm7400_vm12 = vmpackc.low %vm3310_vm3, %vm3310_vm3 }
 0x72d   :  { %v4991_v21 = vpop.f32.mrb[48].mxu0 }
 0x72e   :  { %v3214_v5 = vadd.f32 %v7048_v15, %v4991_v21  ;;  %v3149_v25 = vpop.f32.mrb[49].mxu0  ;;  %v5614_v21 = vld [vmem:[%s7607_s2] sm:$0xff]  }
 0x72f   :  { %v3212_v45 = vadd.f32 %v7048_v15, %v3149_v25  ;;  %v4992_v54 = vpop.f32.mrb[50].mxu0  ;;  %v3290_v25 = vpop.permute.xlu0 %3289 }
 0x730   :  { %5524 = vtanh.f32 %v3214_v5  ;;  %v3215_v32 = vadd.f32 %v7048_v15, %v4992_v54  ;;  %v3152_v52 = vpop.f32.mrb[51].mxu0  ;;  %vm3312_vm5 = vcmp.eq.s32.totalorder %v3290_v25, 1  ;;  %v5329_v25 = vld [vmem:[%s7610_s5 + $0x28] sm:$0xff]  }
 0x731   :  { %5526 = vtanh.f32 %v3212_v45  ;;  %v3213_v55 = vadd.f32 %v7048_v15, %v3152_v52  ;;  %v5615_v45 = vld [vmem:[%s7607_s2 + $0x8] sm:$0xff]   ;;  %vm3328_vm1 = vmpackc.low %vm3312_vm5, %vm3312_vm5 }
 0x732   :  { %5528 = vtanh.f32 %v3215_v32  ;;  %v3344_v49 = vsel %vm3328_vm1, 65537, %v5643_v2 }
 0x733   :  { %5530 = vtanh.f32 %v3213_v55 }
 0x735   :  { %v4995_v59 = vpop.f32.mrb[52].mxu0 }
 0x736   :  { %v3218_v9 = vadd.f32 %v7048_v15, %v4995_v59  ;;  %v3165_v37 = vpop.f32.mrb[53].mxu0 }
 0x737   :  { %v3216_v13 = vadd.f32 %v7048_v15, %v3165_v37  ;;  %v4996_v56 = vpop.f32.mrb[54].mxu0 }
 0x738   :  { %5532 = vtanh.f32 %v3218_v9  ;;  %v3219_v51 = vadd.f32 %v7048_v15, %v4996_v56  ;;  %v3168_v18 = vpop.f32.mrb[55].mxu0  ;;  %v3341_v56 = vsel %vm3325_vm9, 65537, %v5643_v2  ;;  %v7506_v9 = vld [vmem:[%s7609_s4] ss:$0 sm:$0xff] }
 0x739   :  { %5534 = vtanh.f32 %v3216_v13  ;;  %v3217_v50 = vadd.f32 %v7048_v15, %v3168_v18  ;;  %v5616_v18 = vld [vmem:[%s7607_s2 + $0x10] sm:$0xff]   ;;  %v4320_v10 = vcombine.low %v3340_v31, %v3341_v56 }
 0x73a   :  { %v5525_v26 = vpop.eup %5524  ;;  %5536 = vtanh.f32 %v3219_v51 }
 0x73b   :  { %v5527_v30 = vpop.eup %5526  ;;  %5538 = vtanh.f32 %v3217_v50  ;;  %v3343_v50 = vsel %vm7386_vm13, 65537, %v5643_v2  ;;  %vm3376_vm8 = vcmp.ne.s16.totalorder %v4320_v10, 0 }
 0x73c   :  { %v5529_v8 = vpop.eup %5528 }
 0x73d   :  { %v5531_v3 = vpop.eup %5530  ;;  %v4999_v29 = vpop.f32.mrb[56].mxu0  ;;  %v3245_v33 = vpack.c.bf16 %v5529_v8, %v5525_v26 }
 0x73e   :  { %v3222_v61 = vadd.f32 %v7048_v15, %v4999_v29  ;;  %v3181_v11 = vpop.f32.mrb[57].mxu0  ;;  %v3244_v40 = vpack.c.bf16 %v5531_v3, %v5527_v30  ;;  %v3296_v30 = vpop.permute.xlu0 %3295 }
 0x73f   :  { %v3220_v22 = vadd.f32 %v7048_v15, %v3181_v11  ;;  %v5000_v53 = vpop.f32.mrb[58].mxu0  ;;  %v7364_v19 = vsel %vm3373_vm7, %v3245_v33, %v7201_v12  ;;  %v4319_v12 = vcombine.low %v3338_v36, %v3339_v17  ;;  %vm3314_vm15 = vcmp.eq.s32.totalorder %v3296_v30, 1  ;;  %v5317_v36 = vld [vmem:[%s7605_s0 + $0x1c8] sm:$0xff]  }
 0x740   :  { %5540 = vtanh.f32 %v3222_v61  ;;  %v3223_v48 = vadd.f32 %v7048_v15, %v5000_v53  ;;  %v3184_v28 = vpop.f32.mrb[59].mxu0  ;;  %v7359_v0 = vsel %vm3372_vm11, %v3244_v40, %v7196_v46  ;;  %v7373_v46 = vpop.permute.xlu1 %3292  ;;  %vm3330_vm10 = vmpackc.low %vm3314_vm15, %vm3314_vm15 }
 0x741   :  { %5542 = vtanh.f32 %v3220_v22  ;;  %v3221_v24 = vadd.f32 %v7048_v15, %v3184_v28  ;;  %5021 = vmatprep.mubr.bf16.mxu1 %v7359_v0  ;;  %vm7395_vm0 = vcmp.ne.s16.totalorder %v4319_v12, 0  ;;  %vm3313_vm6 = vcmp.eq.s32.totalorder %v7373_v46, 1  ;;  %v5318_v46 = vld [vmem:[%s7605_s0 + $0x1d0] sm:$0xff]   ;;  %v5323_v12 = vld [vmem:[%s7605_s0 + $0x1f8] sm:$0xff]  }
 0x742   :  { %v5533_v38 = vpop.eup %5532  ;;  %5544 = vtanh.f32 %v3223_v48  ;;  %5022 = vmatmul.mubr.bf16.vlgmr.msra.gmra.mrb[64].mxu1 %v7364_v19  ;;  %vm3329_vm11 = vmpackc.low %vm3313_vm6, %vm3313_vm6  ;;  %v3346_v22 = vsel %vm3330_vm10, 65537, %v5643_v2 }
 0x743   :  { %v5535_v58 = vpop.eup %5534  ;;  %5546 = vtanh.f32 %v3221_v24  ;;  %5038 = vmatpush3.bf16.msra.mxu1 %v5614_v21  ;;  %v3345_v43 = vsel %vm3329_vm11, 65537, %v5643_v2  ;;  %v5327_v21 = vld [vmem:[%s7610_s5 + $0x18] sm:$0xff]  }
 0x744   :  { %v5537_v5 = vpop.eup %5536  ;;  %5039 = vmatprep.subr.bf16.mxu1 %v5615_v45  ;;  %v3299_v6 = vpop.permute.xlu1 %3298  ;;  %v4322_v53 = vcombine.low %v3344_v49, %v3345_v43  ;;  %5067 = vmatprep.subr.bf16.mxu0 %v5327_v21 }
 0x745   :  { %v5539_v54 = vpop.eup %5538  ;;  %v5003_v44 = vpop.f32.mrb[60].mxu0  ;;  %v3247_v32 = vpack.c.bf16 %v5537_v5, %v5533_v38  ;;  %vm3315_vm4 = vcmp.eq.s32.totalorder %v3299_v6, 1  ;;  %5068 = vmatpush3.bf16.msra.mxu0 %v5327_v21  ;;  %v5328_v5 = vld [vmem:[%s7610_s5 + $0x20] sm:$0xff]  }
 0x746   :  { %v3226_v55 = vadd.f32 %v7048_v15, %v5003_v44  ;;  %v3197_v4 = vpop.f32.mrb[61].mxu0  ;;  %v3246_v59 = vpack.c.bf16 %v5539_v54, %v5535_v58  ;;  %vm3331_vm7 = vmpackc.low %vm3315_vm4, %vm3315_vm4  ;;  %vm3378_vm9 = vcmp.ne.s16.totalorder %v4322_v53, 0  ;;  %v5321_v58 = vld [vmem:[%s7605_s0 + $0x1e8] sm:$0xff]   ;;  %5069 = vmatprep.subr.bf16.mxu0 %v5328_v5  ;;  %v5331_v54 = vld [vmem:[%s7610_s5 + $0x38] sm:$0xff]  }
 0x747   :  { %v3224_v27 = vadd.f32 %v7048_v15, %v3197_v4  ;;  %v5004_v37 = vpop.f32.mrb[62].mxu0  ;;  %5040 = vmatpush3.bf16.msra.mxu1 %v5615_v45  ;;  %v7420_v41 = vsel %vm7395_vm0, %v3247_v32, %v7250_v57  ;;  %v3347_v61 = vsel %vm3331_vm7, 65537, %v5643_v2  ;;  %v5330_v45 = vld [vmem:[%s7610_s5 + $0x30] sm:$0xff]   ;;  %v3705_v32 = vpop.permute.xlu0 %3704 }
 0x748   :  { %5548 = vtanh.f32 %v3226_v55  ;;  %v3227_v60 = vadd.f32 %v7048_v15, %v5004_v37  ;;  %v3200_v14 = vpop.f32.mrb[63].mxu0  ;;  %v7407_v51 = vsel %vm3374_vm2, %v3246_v59, %v7239_v42  ;;  %5041 = vmatprep.subr.bf16.mxu1 %v5616_v18  ;;  %v4323_v48 = vcombine.low %v3346_v22, %v3347_v61  ;;  %vm7759_vm2 = vmmov %vm7758_vm14  ;;  %v3708_v44 = vpop.permute.xlu1 %3707 }
 0x749   :  { %5550 = vtanh.f32 %v3224_v27  ;;  %v3225_v26 = vadd.f32 %v7048_v15, %v3200_v14  ;;  %5025 = vmatprep.mubr.bf16.mxu1 %v7407_v51  ;;  %v3342_v15 = vsel %vm7400_vm12, 65537, %v5643_v2  ;;  %vm7760_vm0 = vmmov %vm7759_vm2  ;;  %5070 = vmatpush3.bf16.msra.mxu0 %v5328_v5  ;;  %vm3752_vm11 = vcmp.eq.s32.totalorder %v3708_v44, 1 }
 0x74a   :  { %v5541_v42 = vpop.eup %5540  ;;  %5552 = vtanh.f32 %v3227_v60  ;;  %5026 = vmatmul.mubr.bf16.gmra.mrb[68].mxu1 %v7420_v41  ;;  %v4321_v8 = vcombine.low %v3342_v15, %v3343_v50  ;;  %vm3379_vm13 = vcmp.ne.s16.totalorder %v4323_v48, 0  ;;  %vm7761_vm12 = vmmov %vm7760_vm0  ;;  %5071 = vmatprep.subr.bf16.mxu0 %v5329_v25  ;;  %vm3751_vm1 = vcmp.eq.s32.totalorder %v3705_v32, 1 }
 0x74b   :  { %v5543_v1 = vpop.eup %5542  ;;  %5554 = vtanh.f32 %v3225_v26  ;;  %5042 = vmatpush3.bf16.msra.mxu1 %v5616_v18  ;;  %vm7762_vm6 = vmmov %vm7760_vm0  ;;  %v3714_v55 = vpop.permute.xlu0 %3713 }
 0x74c   :  { %v5545_v57 = vpop.eup %5544  ;;  %5043 = vmatprep.subr.bf16.mxu1 %v5617_v23  ;;  %vm3377_vm3 = vcmp.ne.s16.totalorder %v4321_v8, 0  ;;  %vm7763_vm4 = vmmov %vm7760_vm0  ;;  %v3711_v52 = vpop.permute.xlu1 %3710 }
 0x74d   :  { %v5547_v3 = vpop.eup %5546  ;;  %v3249_v29 = vpack.c.bf16 %v5545_v57, %v5541_v42  ;;  %vm7764_vm5 = vmmov %vm7760_vm0  ;;  %5072 = vmatpush3.bf16.msra.mxu0 %v5329_v25  ;;  %vm3753_vm7 = vcmp.eq.s32.totalorder %v3711_v52, 1 }
 0x74e   :  { %v3248_v33 = vpack.c.bf16 %v5547_v3, %v5543_v1  ;;  %vm7765_vm15 = vmmov %vm7760_vm0  ;;  %5073 = vmatprep.subr.bf16.mxu0 %v5330_v45 }
 0x74f   :  { %5044 = vmatpush3.bf16.msra.mxu1 %v5617_v23  ;;  %v7443_v11 = vsel %vm3377_vm3, %v3249_v29, %v7269_v63  ;;  %v5316_v63 = vld [vmem:[%s7605_s0 + $0x1c0] sm:$0xff]   ;;  %v3720_v59 = vpop.permute.xlu0 %3719  ;;  %vm3768_vm10 = vmpackc.low %vm3752_vm11, %vm3752_vm11 }
 0x750   :  { %v7438_v7 = vsel %vm3376_vm8, %v3248_v33, %v7264_v62  ;;  %v3717_v4 = vpop.permute.xlu1 %3716  ;;  %vm3754_vm8 = vcmp.eq.s32.totalorder %v3714_v55, 1  ;;  %vm3769_vm3 = vmpackc.low %vm3753_vm7, %vm3753_vm7  ;;  %v3784_v8 = vsel %vm3768_vm10, 65537, %v5643_v2 }
 0x751   :  { %5029 = vmatprep.mubr.bf16.mxu1 %v7438_v7  ;;  %5074 = vmatpush3.bf16.msra.mxu0 %v5330_v45  ;;  %v3785_v23 = vsel %vm3769_vm3, 65537, %v5643_v2 }
 0x752   :  { %v5549_v40 = vpop.eup %5548  ;;  %5030 = vmatmul.mubr.bf16.gmra.mrb[72].mxu1 %v7443_v11  ;;  %5075 = vmatprep.subr.bf16.mxu0 %v5331_v54 }
 0x753   :  { %v5551_v47 = vpop.eup %5550  ;;  %v3726_v50 = vpop.permute.xlu0 %3725 }
 0x754   :  { %v5553_v17 = vpop.eup %5552  ;;  %v3723_v6 = vpop.permute.xlu1 %3722 }
 0x755   :  { %v5555_v62 = vpop.eup %5554  ;;  %v3251_v28 = vpack.c.bf16 %v5553_v17, %v5549_v40  ;;  %5076 = vmatpush3.bf16.msra.mxu0 %v5331_v54 }
 0x756   :  { %v3250_v24 = vpack.c.bf16 %v5555_v62, %v5551_v47 }
 0x757   :  { %v7456_v35 = vsel %vm3379_vm13, %v3251_v28, %v7282_v34  ;;  %v5320_v34 = vld [vmem:[%s7605_s0 + $0x1e0] sm:$0xff]   ;;  %vm3770_vm13 = vmpackc.low %vm3754_vm8, %vm3754_vm8  ;;  %v7520_v57 = vpop.permute.xlu0 %3731 }
 0x758   :  { %v7452_v38 = vsel %vm3378_vm9, %v3250_v24, %v7278_v39  ;;  %v5319_v39 = vld [vmem:[%s7605_s0 + $0x1d8] sm:$0xff]   ;;  %vm7512_vm9 = vmpackc.low %vm3751_vm1, %vm3751_vm1  ;;  %v7516_v31 = vpop.permute.xlu1 %3728  ;;  %v3786_v40 = vsel %vm3770_vm13, 65537, %v5643_v2  ;;  %vm3760_vm10 = vcmp.eq.s32.totalorder %v7520_v57, 1 }
 0x759   :  { %5033 = vmatprep.mubr.bf16.mxu1 %v7452_v38  ;;  %v3783_v61 = vsel %vm7512_vm9, 65537, %v5643_v2  ;;  %v4357_v22 = vcombine.low %v3785_v23, %v3786_v40  ;;  %vm3759_vm1 = vcmp.eq.s32.totalorder %v7516_v31, 1 }
 0x75a   :  { %5034 = vmatmul.mubr.bf16.gmra.mrb[76].mxu1 %v7456_v35  ;;  %v4356_v47 = vcombine.low %v3783_v61, %v3784_v8  ;;  %vm3775_vm9 = vmpackc.low %vm3759_vm1, %vm3759_vm1 }
 0x75b   :  { %5045 = vmatprep.mubr.msk.bf16.mxu1 %vm7758_vm14, %v5316_v63  ;;  %vm3755_vm14 = vcmp.eq.s32.totalorder %v3717_v4, 1  ;;  %v3738_v63 = vpop.permute.xlu0 %3737  ;;  %vm3824_vm7 = vcmp.ne.s16.totalorder %v4357_v22, 0 }
 0x75c   :  { %v3735_v17 = vpop.permute.xlu1 %3734  ;;  %vm3823_vm11 = vcmp.ne.s16.totalorder %v4356_v47, 0  ;;  %vm3762_vm3 = vcmp.eq.s32.totalorder %v3738_v63, 1 }
 0x75d   :  { %vm3761_vm8 = vcmp.eq.s32.totalorder %v3735_v17, 1 }
 0x75e   :  { %vm7554_vm13 = vmpackc.low %vm3761_vm8, %vm3761_vm8 }
 0x75f   :  { %v3793_v8 = vsel %vm7554_vm13, 65537, %v5643_v2 }
 0x760   :  { %v3741_v4 = vpop.permute.xlu1 %3740 }
 0x762   :  { %5046 = vmatmul.mubr.msk.bf16.vlgmr.msra.gmra.mrb[64].mxu1 %vm7759_vm2, %v5317_v36  ;;  %vm3757_vm2 = vcmp.eq.s32.totalorder %v3723_v6, 1 }
 0x763   :  { %5049 = vmatprep.mubr.msk.bf16.mxu1 %vm7760_vm0, %v5318_v46  ;;  %vm3756_vm0 = vcmp.eq.s32.totalorder %v3720_v59, 1 }
 0x76a   :  { %5050 = vmatmul.mubr.msk.bf16.gmra.mrb[68].mxu1 %vm7761_vm12, %v5319_v39  ;;  %vm3758_vm12 = vcmp.eq.s32.totalorder %v3726_v50, 1 }
 0x76b   :  { %5053 = vmatprep.mubr.msk.bf16.mxu1 %vm7762_vm6, %v5320_v34  ;;  %vm3771_vm6 = vmpackc.low %vm3755_vm14, %vm3755_vm14 }
 0x76c   :  { %vm7559_vm14 = vmpackc.low %vm3760_vm10, %vm3760_vm10 }
 0x772   :  { %5054 = vmatmul.mubr.msk.bf16.gmra.mrb[72].mxu1 %vm7763_vm4, %v5321_v58  ;;  %vm3773_vm4 = vmpackc.low %vm3757_vm2, %vm3757_vm2  ;;  %v3787_v58 = vsel %vm3771_vm6, 65537, %v5643_v2  ;;  %vm3763_vm6 = vcmp.eq.s32.totalorder %v3741_v4, 1 }
 0x773   :  { %5057 = vmatprep.mubr.msk.bf16.mxu1 %vm7764_vm5, %v5322_v20  ;;  %vm7530_vm5 = vmpackc.low %vm3756_vm0, %vm3756_vm0  ;;  %v3789_v21 = vsel %vm3773_vm4, 65537, %v5643_v2 }
 0x774   :  { %v3788_v52 = vsel %vm7530_vm5, 65537, %v5643_v2 }
 0x775   :  { %v4358_v59 = vcombine.low %v3787_v58, %v3788_v52 }
 0x777   :  { %vm3825_vm2 = vcmp.ne.s16.totalorder %v4358_v59, 0 }
 0x77a   :  { %5058 = vmatmul.mubr.msk.bf16.gmra.mrb[76].mxu1 %vm7765_vm15, %v5323_v12  ;;  %vm7535_vm15 = vmpackc.low %vm3758_vm12, %vm3758_vm12 }
 0x77b   :  { %v3790_v55 = vsel %vm7535_vm15, 65537, %v5643_v2  ;;  %vm7564_vm12 = vmpackc.low %vm3762_vm3, %vm3762_vm3 }
 0x77c   :  { %v3794_v61 = vsel %vm7564_vm12, 65537, %v5643_v2 }
 0x835   :  { %v5047_v16 = vpop.f32.mrb[64].mxu1 }
 0x836   :  { %v3665_v27 = vadd.f32 %v7506_v9, %v5047_v16  ;;  %v3600_v37 = vpop.f32.mrb[65].mxu1  ;;  %v4359_v16 = vcombine.low %v3789_v21, %v3790_v55  ;;  %v4364_v21 = vld [vmem:[%s7611_s6] ss:$0 sm:$0xff]  ;;  %s5651_s6 = smov [#allocation2]  }
 0x837   :  { %v3663_v13 = vadd.f32 %v7506_v9, %v3600_v37  ;;  %v5048_v56 = vpop.f32.mrb[66].mxu1  ;;  %s4028_s20 = sshll.u32 %s5651_s6, 4  ;;  %s4029_s20 = int_to_ptr.vmem [resolvable:$true] %s4028_s20 }
 0x838   :  { %5556 = vtanh.f32 %v3665_v27  ;;  %v3666_v60 = vadd.f32 %v7506_v9, %v5048_v56  ;;  %v3603_v14 = vpop.f32.mrb[67].mxu1  ;;  %v3744_v27 = vpop.permute.xlu0 %3743  ;;  %vm3826_vm0 = vcmp.ne.s16.totalorder %v4359_v16, 0  ;;  %s5619_s21 = scalar_lea.vmem %s4029_s20, 2048  ;;  %p5624_p1 = scmp.lt.s32.totalorder %s4029_s20, %s4029_s20 }
 0x839   :  { %5558 = vtanh.f32 %v3663_v13  ;;  %v3664_v18 = vadd.f32 %v7506_v9, %v3603_v14  ;;  %vm3764_vm5 = vcmp.eq.s32.totalorder %v3744_v27, 1  ;;  %p5620_p0 = scmp.ne.s32.totalorder %s4029_s20, %s5619_s21  ;;  %p5625_p2 = scmp.lt.s32.totalorder %s5619_s21, %s5619_s21 }
 0x83a   :  { %5560 = vtanh.f32 %v3666_v60  ;;  %vm3780_vm1 = vmpackc.low %vm3764_vm5, %vm3764_vm5 }
 0x83b   :  { %5562 = vtanh.f32 %v3664_v18  ;;  %v3796_v24 = vsel %vm3780_vm1, 65537, %v5643_v2  ;;  %p5626_p3 = por %p5625_p2, %p5624_p1 }
 0x83d   :  { %v5051_v26 = vpop.f32.mrb[68].mxu1  ;;  %p5627_p4 = pnand %p5626_p3, %p5620_p0 }
 0x83e   :  { %v3669_v30 = vadd.f32 %v7506_v9, %v5051_v26  ;;  %v3616_v1 = vpop.f32.mrb[69].mxu1 }
 0x83f   :  { %v3667_v15 = vadd.f32 %v7506_v9, %v3616_v1  ;;  %v5052_v10 = vpop.f32.mrb[70].mxu1  ;;  %v3747_v1 = vpop.permute.xlu1 %3746 }
 0x840   :  { %5564 = vtanh.f32 %v3669_v30  ;;  %v3670_v3 = vadd.f32 %v7506_v9, %v5052_v10  ;;  %v3619_v29 = vpop.f32.mrb[71].mxu1  ;;  %v3791_v30 = vsel %vm3775_vm9, 65537, %v5643_v2  ;;  %vm3765_vm4 = vcmp.eq.s32.totalorder %v3747_v1, 1 }
 0x841   :  { %5566 = vtanh.f32 %v3667_v15  ;;  %v3668_v33 = vadd.f32 %v7506_v9, %v3619_v29 }
 0x842   :  { %v5557_v43 = vpop.eup %5556  ;;  %5568 = vtanh.f32 %v3670_v3 }
 0x843   :  { %v5559_v49 = vpop.eup %5558  ;;  %5570 = vtanh.f32 %v3668_v33  ;;  %v3792_v33 = vsel %vm7559_vm14, 65537, %v5643_v2 }
 0x844   :  { %v5561_v53 = vpop.eup %5560  ;;  %v4360_v40 = vcombine.low %v3791_v30, %v3792_v33 }
 0x845   :  { %v5563_v48 = vpop.eup %5562  ;;  %v5055_v62 = vpop.f32.mrb[72].mxu1  ;;  %v3696_v28 = vpack.c.bf16 %v5561_v53, %v5557_v43 }
 0x846   :  { %v3673_v36 = vadd.f32 %v7506_v9, %v5055_v62  ;;  %v3632_v46 = vpop.f32.mrb[73].mxu1  ;;  %v3695_v39 = vpack.c.bf16 %v5563_v48, %v5559_v49  ;;  %v3750_v43 = vpop.permute.xlu0 %3749  ;;  %vm3827_vm8 = vcmp.ne.s16.totalorder %v4360_v40, 0 }
 0x847   :  { %v3671_v20 = vadd.f32 %v7506_v9, %v3632_v46  ;;  %v5056_v12 = vpop.f32.mrb[74].mxu1  ;;  %v3832_v44 = vsel %vm3824_vm7, %v3696_v28, %v7364_v19  ;;  %vm3766_vm15 = vcmp.eq.s32.totalorder %v3750_v43, 1  ;;  %vm3781_vm7 = vmpackc.low %vm3765_vm4, %vm3765_vm4 }
 0x848   :  { %5572 = vtanh.f32 %v3673_v36  ;;  %v3674_v5 = vadd.f32 %v7506_v9, %v5056_v12  ;;  %v3635_v25 = vpop.f32.mrb[75].mxu1  ;;  %v3831_v45 = vsel %vm3823_vm11, %v3695_v39, %v7359_v0  ;;  %vm3779_vm11 = vmpackc.low %vm3763_vm6, %vm3763_vm6  ;;  %v3797_v48 = vsel %vm3781_vm7, 65537, %v5643_v2 }
 0x849   :  { %5574 = vtanh.f32 %v3671_v20  ;;  %v3672_v54 = vadd.f32 %v7506_v9, %v3635_v25  ;;  %5077 = vmatprep.mubr.bf16.mxu0 %v3831_v45  ;;  %vm3782_vm10 = vmpackc.low %vm3766_vm15, %vm3766_vm15  ;;  %v3795_v53 = vsel %vm3779_vm11, 65537, %v5643_v2 }
 0x84a   :  { %v5565_v32 = vpop.eup %5564  ;;  %5576 = vtanh.f32 %v3674_v5  ;;  %5078 = vmatmul.mubr.bf16.vlgmr.msra.gmra.mrb[64].mxu0 %v3832_v44  ;;  %v3798_v36 = vsel %vm3782_vm10, 65537, %v5643_v2  ;;  %v4362_v46 = vcombine.low %v3795_v53, %v3796_v24 }
 0x84b   :  { %v5567_v0 = vpop.eup %5566  ;;  %5578 = vtanh.f32 %v3672_v54  ;;  %v4363_v34 = vcombine.low %v3797_v48, %v3798_v36 }
 0x84c   :  { %v5569_v19 = vpop.eup %5568  ;;  %vm3829_vm9 = vcmp.ne.s16.totalorder %v4362_v46, 0 }
 0x84d   :  { %v5571_v37 = vpop.eup %5570  ;;  %v5059_v13 = vpop.f32.mrb[76].mxu1  ;;  %v3698_v56 = vpack.c.bf16 %v5569_v19, %v5565_v32  ;;  %vm3830_vm13 = vcmp.ne.s16.totalorder %v4363_v34, 0 }
 0x84e   :  { %v3677_v60 = vadd.f32 %v7506_v9, %v5059_v13  ;;  %v3648_v14 = vpop.f32.mrb[77].mxu1  ;;  %v3697_v18 = vpack.c.bf16 %v5571_v37, %v5567_v0 }
 0x84f   :  { %v3675_v26 = vadd.f32 %v7506_v9, %v3648_v14  ;;  %v5060_v42 = vpop.f32.mrb[78].mxu1  ;;  %v3834_v3 = vsel %vm3826_vm0, %v3698_v56, %v7420_v41  ;;  %v4361_v41 = vcombine.low %v3793_v8, %v3794_v61 }
 0x850   :  { %5580 = vtanh.f32 %v3677_v60  ;;  %v3678_v15 = vadd.f32 %v7506_v9, %v5060_v42  ;;  %v3651_v10 = vpop.f32.mrb[79].mxu1  ;;  %v3833_v57 = vsel %vm3825_vm2, %v3697_v18, %v7407_v51 }
 0x851   :  { %5582 = vtanh.f32 %v3675_v26  ;;  %v3676_v23 = vadd.f32 %v7506_v9, %v3651_v10  ;;  %5081 = vmatprep.mubr.bf16.mxu0 %v3833_v57  ;;  %vm3828_vm3 = vcmp.ne.s16.totalorder %v4361_v41, 0 }
 0x852   :  { %v5573_v29 = vpop.eup %5572  ;;  %5584 = vtanh.f32 %v3678_v15  ;;  %5082 = vmatmul.mubr.bf16.gmra.mrb[68].mxu0 %v3834_v3 }
 0x853   :  { %v5575_v51 = vpop.eup %5574  ;;  %5586 = vtanh.f32 %v3676_v23 }
 0x854   :  { %v5577_v9 = vpop.eup %5576 }
 0x855   :  { %v5579_v49 = vpop.eup %5578  ;;  %v3700_v47 = vpack.c.bf16 %v5577_v9, %v5573_v29 }
 0x856   :  { %v3699_v22 = vpack.c.bf16 %v5579_v49, %v5575_v51 }
 0x857   :  { %v3836_v62 = vsel %vm3828_vm3, %v3700_v47, %v7443_v11 }
 0x858   :  { %v3835_v17 = vsel %vm3827_vm8, %v3699_v22, %v7438_v7 }
 0x859   :  { %5085 = vmatprep.mubr.bf16.mxu0 %v3835_v17 }
 0x85a   :  { %v5581_v28 = vpop.eup %5580  ;;  %5086 = vmatmul.mubr.bf16.gmra.mrb[72].mxu0 %v3836_v62 }
 0x85b   :  { %v5583_v63 = vpop.eup %5582 }
 0x85c   :  { %v5585_v39 = vpop.eup %5584 }
 0x85d   :  { %v5587_v58 = vpop.eup %5586  ;;  %v3702_v20 = vpack.c.bf16 %v5585_v39, %v5581_v28 }
 0x85e   :  { %v3701_v12 = vpack.c.bf16 %v5587_v58, %v5583_v63 }
 0x85f   :  { %v3838_v11 = vsel %vm3830_vm13, %v3702_v20, %v7456_v35 }
 0x860   :  { %v3837_v7 = vsel %vm3829_vm9, %v3701_v12, %v7452_v38 }
 0x861   :  { %5089 = vmatprep.mubr.bf16.mxu0 %v3837_v7 }
 0x862   :  { %5090 = vmatmul.mubr.bf16.gmra.mrb[76].mxu0 %v3838_v11 }
 0x91d   :  { %v5079_v5 = vpop.f32.mrb[64].mxu0 }
 0x91e   :  { %v3953_v2 = vadd.f32 %v5079_v5, %v4364_v21  ;;  %v3944_v25 = vpop.f32.mrb[65].mxu0 }
 0x91f   :  { %v3945_v45 = vadd.f32 %v4364_v21, %v3944_v25  ;;  %v5080_v54 = vpop.f32.mrb[66].mxu0 }
 0x920   :  { %4009 = vst [vmem:[#allocation2 + $0x10] sm:$0xff] %v3953_v2  ;;  %v3956_v44 = vadd.f32 %v5080_v54, %v4364_v21  ;;  %v3947_v32 = vpop.f32.mrb[67].mxu0 }
 0x921   :  { %4007 = vst [vmem:[#allocation2] sm:$0xff] %v3945_v45  ;;  %v3948_v52 = vadd.f32 %v4364_v21, %v3947_v32 }
 0x922   :  { %4010 = vst [vmem:[#allocation2 + $0x18] sm:$0xff] %v3956_v44 }
 0x923   :  { %4008 = vst [vmem:[#allocation2 + $0x8] sm:$0xff] %v3948_v52 }
 0x925   :  { %v5083_v38 = vpop.f32.mrb[68].mxu0 }
 0x926   :  { %v3969_v55 = vadd.f32 %v5083_v38, %v4364_v21  ;;  %v3960_v35 = vpop.f32.mrb[69].mxu0 }
 0x927   :  { %v3961_v4 = vadd.f32 %v4364_v21, %v3960_v35  ;;  %v5084_v0 = vpop.f32.mrb[70].mxu0 }
 0x928   :  { %4013 = vst [vmem:[#allocation2 + $0x30] sm:$0xff] %v3969_v55  ;;  %v3972_v59 = vadd.f32 %v5084_v0, %v4364_v21  ;;  %v3963_v16 = vpop.f32.mrb[71].mxu0 }
 0x929   :  { %4011 = vst [vmem:[#allocation2 + $0x20] sm:$0xff] %v3961_v4  ;;  %v3964_v19 = vadd.f32 %v4364_v21, %v3963_v16 }
 0x92a   :  { %4014 = vst [vmem:[#allocation2 + $0x38] sm:$0xff] %v3972_v59 }
 0x92b   :  { %4012 = vst [vmem:[#allocation2 + $0x28] sm:$0xff] %v3964_v19 }
 0x92d   :  { %v5087_v27 = vpop.f32.mrb[72].mxu0 }
 0x92e   :  { %v3985_v37 = vadd.f32 %v5087_v27, %v4364_v21  ;;  %v3976_v13 = vpop.f32.mrb[73].mxu0 }
 0x92f   :  { %v3977_v56 = vadd.f32 %v4364_v21, %v3976_v13  ;;  %v5088_v6 = vpop.f32.mrb[74].mxu0 }
 0x930   :  { %4017 = vst [vmem:[#allocation2 + $0x50] sm:$0xff] %v3985_v37  ;;  %v3988_v60 = vadd.f32 %v5088_v6, %v4364_v21  ;;  %v3979_v14 = vpop.f32.mrb[75].mxu0 }
 0x931   :  { %4015 = vst [vmem:[#allocation2 + $0x40] sm:$0xff] %v3977_v56  ;;  %v3980_v18 = vadd.f32 %v4364_v21, %v3979_v14 }
 0x932   :  { %4018 = vst [vmem:[#allocation2 + $0x58] sm:$0xff] %v3988_v60 }
 0x933   :  { %4016 = vst [vmem:[#allocation2 + $0x48] sm:$0xff] %v3980_v18 }
 0x935   :  { %v5091_v50 = vpop.f32.mrb[76].mxu0 }
 0x936   :  { %v4001_v26 = vadd.f32 %v5091_v50, %v4364_v21  ;;  %v3992_v42 = vpop.f32.mrb[77].mxu0 }
 0x937   :  { %v3993_v31 = vadd.f32 %v4364_v21, %v3992_v42  ;;  %v5092_v30 = vpop.f32.mrb[78].mxu0 }
 0x938   :  { %4021 = vst [vmem:[#allocation2 + $0x70] sm:$0xff] %v4001_v26  ;;  %v4004_v1 = vadd.f32 %v5092_v30, %v4364_v21  ;;  %v3995_v15 = vpop.f32.mrb[79].mxu0 }
 0x939   :  { %4019 = vst [vmem:[#allocation2 + $0x60] sm:$0xff] %v3993_v31  ;;  %v3996_v10 = vadd.f32 %v4364_v21, %v3995_v15 }
 0x93a   :  { %4022 = vst [vmem:[#allocation2 + $0x78] sm:$0xff] %v4004_v1 }
 0x93b   :  { %4020 = vst [vmem:[#allocation2 + $0x68] sm:$0xff] %v3996_v10 }
 0x93c   :  { %5630 = shalt.err (!%p5627_p4)
}
 0x93d   :  { %s5631_s23 = scalar_lea.hbm %s7612_s7, 2048 }
 0x93e   :  { %p5632_p5 = scmp.ne.s32.totalorder %s7612_s7, %s5631_s23  ;;  %p5635_p6 = scmp.lt.u32.totalorder %s5631_s23, %s7612_s7 }
 0x940   :  { %p5637_p7 = pnand %p5635_p6, %p5632_p5 }
 0x942   :  { %5640 = shalt.err (!%p5637_p7)
}
 0x943   :  { %s5652_s28 = smov 128   ;;  %s5653_s29 = smov 8  }
 0x944   :  { %4034 = dma.vmem_to_hbm [thread:$0]  %s4029_s20, 2048, %s7612_s7, [#allocation3], %s5652_s28, %s5652_s28, %s5653_s29  }
 0x945   :  { %5641 = dma.done.wait [#allocation3], 2048  }
 0x946   :  { %5642 = vsyncadd [#allocation3], 4294965248 }
 0x947   :  { %4038 = vsyncpa [#allocation3], 1 }

</bundles_post_ra>
